<compile_context>
chip_gen: v7x
topology: tpu7x:2x2x1
jax: 0.10.0
libtpu: 0.0.40
codegen_flags: <defaults>
</compile_context>

<pallas_src>
import functools
import numpy as np

import jax
import jax.numpy as jnp
from jax.experimental import pallas as pl
from jax.experimental.pallas import tpu as pltpu


BLOCK_LN_EPS = 1e-5   # Block(...) uses nn.LayerNorm (default eps=1e-5)
FINAL_LN_EPS = 1e-6   # dec_norm = partial(nn.LayerNorm, eps=1e-6)
NEG_INF = -1e30       # finite "-inf" so masked rows never produce inf - inf = NaN


# ---------------------------------------------------------------------------
# sincos image-index embedding (matches the PyTorch buffer exactly)
# ---------------------------------------------------------------------------
def get_1d_sincos_pos_embed_from_grid(embed_dim, pos):
    assert embed_dim % 2 == 0
    omega = np.arange(embed_dim // 2, dtype=float)
    omega /= embed_dim / 2.0
    omega = 1.0 / 10000 ** omega
    pos = pos.reshape(-1)
    out = np.einsum("m,d->md", pos, omega)
    emb_sin = np.sin(out)
    emb_cos = np.cos(out)
    return np.concatenate([emb_sin, emb_cos], axis=1)


# ---------------------------------------------------------------------------
# small helpers
# ---------------------------------------------------------------------------
def _cdiv(a, b):
    return -(-a // b)


def _round_up(x, m):
    return _cdiv(x, m) * m


_VMEM_LIMIT = None


def _vmem_limit_bytes():
    """Explicit VMEM budget: scoped defaults (16/32 MiB) are far below physical."""
    global _VMEM_LIMIT
    if _VMEM_LIMIT is None:
        cap = 0
        try:
            cap = int(getattr(pltpu.get_tpu_info(), "vmem_capacity_bytes", 0) or 0)
        except Exception:
            cap = 0
        if cap <= 0:
            cap = 64 * 1024 * 1024          # safe on v5e/v6e (128 MiB) and v7x (64 MiB)
        _VMEM_LIMIT = int(min(cap, 128 * 1024 * 1024) * 7 // 8)   # leave headroom
    return _VMEM_LIMIT


def _compiler_params(dimension_semantics):
    return pltpu.CompilerParams(
        dimension_semantics=dimension_semantics,
        vmem_limit_bytes=_vmem_limit_bytes())


_SINGLE_BUF = None


def _weights_single_buffered():
    """Probe whether pipeline_mode=pl.Buffered(1) (single-buffered weights) works."""
    global _SINGLE_BUF
    if _SINGLE_BUF is None:
        try:
            wspec = pl.BlockSpec((8, 128), lambda b, t: (0, 0),
                                 pipeline_mode=pl.Buffered(1))

            def _k(x_ref, w_ref, o_ref):
                o_ref[...] = x_ref[...] + w_ref[...]

            f = pl.pallas_call(
                _k,
                out_shape=jax.ShapeDtypeStruct((16, 256), jnp.float32),
                grid=(2, 2),
                in_specs=[pl.BlockSpec((8, 128), lambda b, t: (b, t)), wspec],
                out_specs=pl.BlockSpec((8, 128), lambda b, t: (b, t)),
            )
            r = f(jnp.ones((16, 256), jnp.float32), jnp.ones((8, 128), jnp.float32))
            jax.block_until_ready(r)
            _SINGLE_BUF = bool(jnp.all(r == 2.0))
        except Exception:
            _SINGLE_BUF = False
    return _SINGLE_BUF


def _const_spec(shape, index_map):
    """Weight spec replicated across the grid; single-buffered when supported."""
    if _weights_single_buffered():
        return pl.BlockSpec(shape, index_map, pipeline_mode=pl.Buffered(1))
    return pl.BlockSpec(shape, index_map)


def _layernorm(x, gamma, beta, eps):
    """One-pass LayerNorm (variance via E[x^2] - mu^2)."""
    mu = jnp.mean(x, axis=-1, keepdims=True)
    var = jnp.maximum(jnp.mean(x * x, axis=-1, keepdims=True) - mu * mu, 0.0)
    return (x - mu) * jax.lax.rsqrt(var + eps) * gamma + beta


def _lane_view(rep128, width):
    """View of a lane-replicated (rows, 128) value broadcastable against (rows, width)."""
    return rep128[:, :width] if width <= 128 else rep128[:, :1]


def _pick_head_group(num_heads, dh):
    """Pack heads so the packed lane width is a multiple of 128 (prefer <= 256)."""
    valid = [g for g in range(1, num_heads + 1)
             if num_heads % g == 0 and (g * dh) % 128 == 0]
    if valid:
        small = [g for g in valid if g * dh <= 256]
        return max(small) if small else min(valid)
    return num_heads            # fall back to a full-D block (always a legal BlockSpec)


# ---------------------------------------------------------------------------
# VMEM-aware token-tile planning
# ---------------------------------------------------------------------------
def _qkv_vmem_bytes(tn, D, wf):
    weights = wf * 2 * 3 * D * D + 4 * 5 * D
    streams = 2 * tn * D * (4 + 3 * 2)            # double-buffered x in, q/k/v out
    live = 8 * 4 * tn * D                         # LN temps + one f32 projection
    return weights + streams + live


def _attn_vmem_bytes(tq, tk, gw, group):
    streams = 2 * (tq * gw * 2 + 2 * tk * gw * 2 + tq * gw * 2)
    scratch = tq * gw * 4 + 2 * group * tq * 128 * 4
    live = 4 * tq * tk + 4 * tq * max(gw, 128)
    return streams + scratch + live


def _proj_mlp_vmem_bytes(tn, D, Dm, wf):
    weights = wf * 2 * (D * D + 2 * D * Dm) + 4 * (6 * D + Dm)
    streams = 2 * tn * D * (4 + 2 + 4)            # double-buffered x, attn, out
    live = 4 * tn * Dm + 8 * 4 * tn * D           # fc1 activation + f32 temporaries
    return weights + streams + live


def _plan_tiles(n_tokens, batch, D, Dm, num_heads, group):
    """Pick the token tile (multiple of 16) and the padded token count."""
    dh = D // num_heads
    gw = group * dh
    wf = 1 if _weights_single_buffered() else 2    # weight buffering factor
    budget = int(_vmem_limit_bytes() * 0.8)
    tn = 512
    # keep >= 4 total grid steps so both v7x TensorCores get work on small inputs
    while tn > 16 and batch * _cdiv(n_tokens, tn) < 4:
        tn //= 2
    # shrink until the largest per-block kernel fits the (v7x-sized) VMEM budget.
    # TODO(synk): for very large D / mlp_ratio, stream the Dm axis with an
    # accumulator grid axis instead of shrinking tn further.
    while tn > 16 and max(_qkv_vmem_bytes(tn, D, wf),
                          _attn_vmem_bytes(tn, tn, gw, group),
                          _proj_mlp_vmem_bytes(tn, D, Dm, wf)) > budget:
        tn //= 2
    tn = max(tn, 16)
    return tn, _round_up(max(n_tokens, 1), tn)


# ---------------------------------------------------------------------------
# Pallas kernels
# ---------------------------------------------------------------------------
def embed_kernel(x_ref, w_ref, b_ref, pos_ref, o_ref):
    """o = x @ W + b + image_pos (decoder_embed fused with the pos add)."""
    x = x_ref[0].astype(jnp.bfloat16)                          # bf16 at the MXU
    y = jnp.dot(x, w_ref[...], preferred_element_type=jnp.float32) + b_ref[...]
    o_ref[0] = y + pos_ref[0].astype(jnp.float32)


def qkv_kernel(x_ref, ln1_g_ref, ln1_b_ref,
               q_w_ref, q_b_ref, k_w_ref, k_b_ref, v_w_ref, v_b_ref,
               q_ref, k_ref, v_ref, *, eps, scale):
    """LN1 + q/k/v projections; lane-dense (tn, D) bf16 outputs, q pre-scaled."""
    x = x_ref[0]                                               # (tn, D) f32
    h = _layernorm(x, ln1_g_ref[...], ln1_b_ref[...], eps)
    hb = h.astype(jnp.bfloat16)
    q = jnp.dot(hb, q_w_ref[...], preferred_element_type=jnp.float32) + q_b_ref[...]
    q_ref[0] = (q * scale).astype(jnp.bfloat16)                # attention scale folded here
    k = jnp.dot(hb, k_w_ref[...], preferred_element_type=jnp.float32) + k_b_ref[...]
    k_ref[0] = k.astype(jnp.bfloat16)
    v = jnp.dot(hb, v_w_ref[...], preferred_element_type=jnp.float32) + v_b_ref[...]
    v_ref[0] = v.astype(jnp.bfloat16)


def flash_attn_kernel(q_ref, k_ref, v_ref, o_ref, m_ref, l_ref, acc_ref, *,
                      group, dh, tk, n_valid, n_padded):
    """Flash attention over a head group of lane width group*dh (online softmax)."""
    kt = pl.program_id(3)

    @pl.when(kt == 0)
    def _():
        m_ref[...] = jnp.full(m_ref.shape, NEG_INF, m_ref.dtype)
        l_ref[...] = jnp.zeros(l_ref.shape, l_ref.dtype)
        acc_ref[...] = jnp.zeros(acc_ref.shape, acc_ref.dtype)

    q = q_ref[0]                                               # (tq, group*dh) bf16
    k = k_ref[0]                                               # (tk, group*dh) bf16
    v = v_ref[0]                                               # (tk, group*dh) bf16

    kv_valid = None
    if n_valid < n_padded:                                     # static: padding present
        kv_idx = kt * tk + jax.lax.broadcasted_iota(jnp.int32, (1, tk), 1)
        kv_valid = kv_idx < n_valid

    for h in range(group):                                     # static per-head loop
        sl = slice(h * dh, (h + 1) * dh)
        s = jax.lax.dot_general(q[:, sl], k[:, sl], (((1,), (1,)), ((), ())),
                                preferred_element_type=jnp.float32)   # (tq, tk)
        if kv_valid is not None:
            s = jnp.where(kv_valid, s, NEG_INF)

        m_prev = m_ref[h]                                      # (tq, 128) lane-replicated
        s_max = jnp.max(s, axis=-1, keepdims=True)             # (tq, 1)
        m_new = jnp.maximum(m_prev, s_max)                     # (tq, 128)
        alpha = jnp.exp(m_prev - m_new)                        # (tq, 128)
        p = jnp.exp(s - m_new[:, :1])                          # (tq, tk)
        l_ref[h] = alpha * l_ref[h] + jnp.sum(p, axis=-1, keepdims=True)
        m_ref[h] = m_new
        pv = jnp.dot(p.astype(jnp.bfloat16), v[:, sl],
                     preferred_element_type=jnp.float32)       # (tq, dh)
        acc_ref[:, sl] = _lane_view(alpha, dh) * acc_ref[:, sl] + pv

    @pl.when(kt == pl.num_programs(3) - 1)
    def _():
        for h in range(group):
            sl = slice(h * dh, (h + 1) * dh)
            inv_l = pl.reciprocal(_lane_view(l_ref[h], dh), approx=True)   # EUP slot
            o_ref[0, :, sl] = (acc_ref[:, sl] * inv_l).astype(o_ref.dtype)


def proj_mlp_kernel(x_ref, attn_ref, proj_w_ref, proj_b_ref,
                    ln2_g_ref, ln2_b_ref, fc1_w_ref, fc1_b_ref,
                    fc2_w_ref, fc2_b_ref, fln_g_ref, fln_b_ref,
                    o_ref, *, eps, final_eps, apply_final_ln):
    """x + proj(attn) ; then + MLP(LN2(.)) ; optionally dec_norm fused in."""
    x = x_ref[0]                                               # (tn, D) f32
    # lane-dense attention output -> single (tn, D) x (D, D) MXU matmul (K = D)
    proj = jnp.dot(attn_ref[0], proj_w_ref[...], preferred_element_type=jnp.float32)
    x = x + proj + proj_b_ref[...]

    h2 = _layernorm(x, ln2_g_ref[...], ln2_b_ref[...], eps)
    m = jnp.dot(h2.astype(jnp.bfloat16), fc1_w_ref[...],
                preferred_element_type=jnp.float32) + fc1_b_ref[...]
    # TODO(synk): PyTorch nn.GELU defaults to the exact erf GELU; the tanh
    # approximation is used here for robust Mosaic lowering (~1e-3 difference).
    m = jax.nn.gelu(m, approximate=True)
    y = jnp.dot(m.astype(jnp.bfloat16), fc2_w_ref[...],
                preferred_element_type=jnp.float32) + fc2_b_ref[...]
    x = x + y
    if apply_final_ln:                                         # fused dec_norm (last layer)
        x = _layernorm(x, fln_g_ref[...], fln_b_ref[...], final_eps)
    o_ref[0] = x


# ---------------------------------------------------------------------------
# pallas_call wrappers
# ---------------------------------------------------------------------------
def decoder_embed(x, w, b, image_pos, tn):
    B, Np, De = x.shape
    D = w.shape[1]
    cost = pl.CostEstimate(flops=int(2 * B * Np * De * D), transcendentals=0,
                           bytes_accessed=int(B * Np * (4 * De + 2 * D + 4 * D)
                                              + 2 * De * D + 4 * D))
    return pl.pallas_call(
        embed_kernel,
        out_shape=jax.ShapeDtypeStruct((B, Np, D), jnp.float32),
        grid=(B, Np // tn),
        in_specs=[pl.BlockSpec((1, tn, De), lambda bi, t: (bi, t, 0)),
                  _const_spec((De, D), lambda bi, t: (0, 0)),
                  _const_spec((1, D), lambda bi, t: (0, 0)),
                  pl.BlockSpec((1, tn, D), lambda bi, t: (bi, t, 0))],
        out_specs=pl.BlockSpec((1, tn, D), lambda bi, t: (bi, t, 0)),
        compiler_params=_compiler_params(("parallel", "parallel")),
        cost_estimate=cost,
    )(x, w, b, image_pos)


def qkv_project(x, p, tn, scale):
    B, Np, D = x.shape
    kernel = functools.partial(qkv_kernel, eps=BLOCK_LN_EPS, scale=scale)
    tok_spec = pl.BlockSpec((1, tn, D), lambda bi, t: (bi, t, 0))
    vec_spec = _const_spec((1, D), lambda bi, t: (0, 0))
    w_spec = _const_spec((D, D), lambda bi, t: (0, 0))
    out_sd = jax.ShapeDtypeStruct((B, Np, D), jnp.bfloat16)
    out_spec = pl.BlockSpec((1, tn, D), lambda bi, t: (bi, t, 0))
    cost = pl.CostEstimate(flops=int(2 * B * Np * D * 3 * D),
                           transcendentals=int(B * Np),
                           bytes_accessed=int(B * Np * D * (4 + 3 * 2)
                                              + 3 * (2 * D * D + 4 * D) + 8 * D))
    return pl.pallas_call(
        kernel,
        out_shape=(out_sd, out_sd, out_sd),
        grid=(B, Np // tn),
        in_specs=[tok_spec, vec_spec, vec_spec,
                  w_spec, vec_spec, w_spec, vec_spec, w_spec, vec_spec],
        out_specs=(out_spec, out_spec, out_spec),
        compiler_params=_compiler_params(("parallel", "parallel")),
        cost_estimate=cost,
    )(x, p["ln1_g"], p["ln1_b"], p["q_w"], p["q_b"], p["k_w"], p["k_b"],
      p["v_w"], p["v_b"])


def flash_attention(q, k, v, num_heads, group, tq, n_valid):
    B, Np, D = q.shape
    dh = D // num_heads
    gw = group * dh
    HG = num_heads // group
    tk = tq
    kernel = functools.partial(flash_attn_kernel, group=group, dh=dh, tk=tk,
                               n_valid=n_valid, n_padded=Np)
    q_spec = pl.BlockSpec((1, tq, gw), lambda b, g, qi, ki: (b, qi, g))
    kv_spec = pl.BlockSpec((1, tk, gw), lambda b, g, qi, ki: (b, ki, g))
    n_q_tiles = Np // tq
    cost = pl.CostEstimate(
        flops=int(4 * B * num_heads * Np * Np * dh),
        transcendentals=int(B * num_heads * Np * Np),
        bytes_accessed=int(B * Np * D * 2 * (2 + 2 * n_q_tiles)))
    return pl.pallas_call(
        kernel,
        out_shape=jax.ShapeDtypeStruct((B, Np, D), jnp.bfloat16),
        grid=(B, HG, Np // tq, Np // tk),
        in_specs=[q_spec, kv_spec, kv_spec],
        out_specs=pl.BlockSpec((1, tq, gw), lambda b, g, qi, ki: (b, qi, g)),
        scratch_shapes=[pltpu.VMEM((group, tq, 128), jnp.float32),   # m (lane-replicated)
                        pltpu.VMEM((group, tq, 128), jnp.float32),   # l (lane-replicated)
                        pltpu.VMEM((tq, gw), jnp.float32)],          # acc
        compiler_params=_compiler_params(
            ("parallel", "parallel", "parallel", "arbitrary")),
        cost_estimate=cost,
    )(q, k, v)


def proj_mlp(x, attn, p, tn, final_ln=None):
    B, Np, D = x.shape
    Dm = p["fc1_w"].shape[1]
    apply_final = final_ln is not None
    fg, fb = final_ln if apply_final else (p["ln2_g"], p["ln2_b"])  # placeholders if unused
    kernel = functools.partial(proj_mlp_kernel, eps=BLOCK_LN_EPS,
                               final_eps=FINAL_LN_EPS, apply_final_ln=apply_final)
    vec = _const_spec((1, D), lambda bi, t: (0, 0))
    cost = pl.CostEstimate(
        flops=int(2 * B * Np * (D * D + 2 * D * Dm)),
        transcendentals=int(B * Np * (Dm + 2)),
        bytes_accessed=int(B * Np * (4 * D + 2 * D + 4 * D)
                           + 2 * (D * D + 2 * D * Dm)))
    return pl.pallas_call(
        kernel,
        out_shape=jax.ShapeDtypeStruct((B, Np, D), jnp.float32),
        grid=(B, Np // tn),
        in_specs=[pl.BlockSpec((1, tn, D), lambda bi, t: (bi, t, 0)),
                  pl.BlockSpec((1, tn, D), lambda bi, t: (bi, t, 0)),
                  _const_spec((D, D), lambda bi, t: (0, 0)),
                  vec, vec, vec,
                  _const_spec((D, Dm), lambda bi, t: (0, 0)),
                  _const_spec((1, Dm), lambda bi, t: (0, 0)),
                  _const_spec((Dm, D), lambda bi, t: (0, 0)),
                  vec, vec, vec],
        out_specs=pl.BlockSpec((1, tn, D), lambda bi, t: (bi, t, 0)),
        compiler_params=_compiler_params(("parallel", "parallel")),
        cost_estimate=cost,
    )(x, attn, p["proj_w"], p["proj_b"], p["ln2_g"], p["ln2_b"],
      p["fc1_w"], p["fc1_b"], p["fc2_w"], p["fc2_b"], fg, fb)


def transformer_block(x, p, num_heads, group, tn, n_valid, final_ln=None):
    D = x.shape[-1]
    dh = D // num_heads
    q, k, v = qkv_project(x, p, tn, scale=dh ** -0.5)
    attn = flash_attention(q, k, v, num_heads, group, tn, n_valid)
    return proj_mlp(x, attn, p, tn, final_ln=final_ln)


# ---------------------------------------------------------------------------
# parameter init (deterministic, shapes match the PyTorch __init__)
# ---------------------------------------------------------------------------
def init_params(key, enc_embed_dim, embed_dim, num_heads, depth, mlp_ratio,
                max_image_idx):
    D = embed_dim
    Dm = int(D * mlp_ratio)
    dh = D // num_heads
    assert dh * num_heads == D
    ks = iter(jax.random.split(key, 1 + depth * 6))

    def lin(k, d_in, d_out):
        # weights kept in bf16 (bf16 operands at the MXU); biases stay f32.
        w = (jax.random.normal(k, (d_in, d_out), jnp.float32) * 0.02).astype(jnp.bfloat16)
        b = jnp.zeros((1, d_out), jnp.float32)
        return w, b

    params = {}
    params["embed_w"], params["embed_b"] = lin(next(ks), enc_embed_dim, D)
    blocks = []
    for _ in range(depth):
        bp = {}
        bp["ln1_g"] = jnp.ones((1, D), jnp.float32)
        bp["ln1_b"] = jnp.zeros((1, D), jnp.float32)
        # q/k/v as separate (D, D) column sections of the fused qkv Linear;
        # columns are head-major so attention carves lane-dense head groups
        # straight out of the (B, N, D) projections.
        bp["q_w"], bp["q_b"] = lin(next(ks), D, D)
        bp["k_w"], bp["k_b"] = lin(next(ks), D, D)
        bp["v_w"], bp["v_b"] = lin(next(ks), D, D)
        bp["proj_w"], bp["proj_b"] = lin(next(ks), D, D)
        bp["ln2_g"] = jnp.ones((1, D), jnp.float32)
        bp["ln2_b"] = jnp.zeros((1, D), jnp.float32)
        bp["fc1_w"], bp["fc1_b"] = lin(next(ks), D, Dm)
        bp["fc2_w"], bp["fc2_b"] = lin(next(ks), Dm, D)
        blocks.append(bp)
    params["blocks"] = blocks
    params["dec_norm_g"] = jnp.ones((1, D), jnp.float32)
    params["dec_norm_b"] = jnp.zeros((1, D), jnp.float32)
    params["image_idx_emb"] = jnp.asarray(
        get_1d_sincos_pos_embed_from_grid(D, np.arange(max_image_idx)), jnp.float32)
    return params


# ---------------------------------------------------------------------------
# full forward (mirrors Fast3RDecoder.forward, random_image_idx_embedding=False)
# ---------------------------------------------------------------------------
def fast3r_decoder_forward(encoded_feats, positions, image_ids, params, num_heads):
    # `positions` is accepted for API parity; the decoder blocks are built
    # without RoPE so attention never consumes it.
    del positions
    x = jnp.concatenate(encoded_feats, axis=1)                 # (B, Ntot, enc_D)
    final_output = [x]

    B, N, _ = x.shape
    D = params["embed_w"].shape[1]
    Dm = params["blocks"][0]["fc1_w"].shape[1]
    dh = D // num_heads
    group = _pick_head_group(num_heads, dh)
    tn, n_pad = _plan_tiles(N, B, D, Dm, num_heads, group)

    # image-index embedding: direct gather (no host sync), stored bf16 to halve
    # the positional stream into the embed kernel.
    image_pos = params["image_idx_emb"][image_ids].astype(jnp.bfloat16)

    if n_pad != N:
        pad = ((0, 0), (0, n_pad - N), (0, 0))
        x_in = jnp.pad(x, pad)
        image_pos = jnp.pad(image_pos, pad)
    else:
        x_in = x

    xp = decoder_embed(x_in, params["embed_w"], params["embed_b"], image_pos, tn)
    n_blocks = len(params["blocks"])
    for li, bp in enumerate(params["blocks"]):
        is_last = li == n_blocks - 1
        final_ln = ((params["dec_norm_g"], params["dec_norm_b"])
                    if is_last else None)                      # dec_norm fused in last layer
        xp = transformer_block(xp, bp, num_heads, group, tn, N, final_ln=final_ln)
        final_output.append(xp if n_pad == N else xp[:, :N])
    return final_output


# ---------------------------------------------------------------------------
# pure-JAX reference (same bf16-at-MXU policy) for correctness checking
# ---------------------------------------------------------------------------
def _reference_forward(encoded_feats, image_ids, params, num_heads):
    def ln(v, g, b, eps):
        mu = jnp.mean(v, -1, keepdims=True)
        var = jnp.maximum(jnp.mean(v * v, -1, keepdims=True) - mu * mu, 0.0)
        return (v - mu) * jax.lax.rsqrt(var + eps) * g + b

    x = jnp.concatenate(encoded_feats, axis=1)
    outs = [x]
    pos = params["image_idx_emb"][image_ids].astype(jnp.bfloat16)
    x = (jnp.dot(x.astype(jnp.bfloat16), params["embed_w"],
                 preferred_element_type=jnp.float32)
         + params["embed_b"] + pos.astype(jnp.float32))
    B, N, D = x.shape
    dh = D // num_heads
    scale = dh ** -0.5
    nb = len(params["blocks"])
    for li, p in enumerate(params["blocks"]):
        h = ln(x, p["ln1_g"], p["ln1_b"], BLOCK_LN_EPS).astype(jnp.bfloat16)
        q = (jnp.dot(h, p["q_w"], preferred_element_type=jnp.float32) + p["q_b"]) * scale
        k = jnp.dot(h, p["k_w"], preferred_element_type=jnp.float32) + p["k_b"]
        v = jnp.dot(h, p["v_w"], preferred_element_type=jnp.float32) + p["v_b"]

        def heads(t):
            return t.reshape(B, N, num_heads, dh).transpose(0, 2, 1, 3).astype(jnp.bfloat16)

        qh, kh, vh = heads(q), heads(k), heads(v)
        s = jnp.einsum("bhqd,bhkd->bhqk", qh, kh, preferred_element_type=jnp.float32)
        pa = jax.nn.softmax(s, axis=-1)
        o = jnp.einsum("bhqk,bhkd->bhqd", pa.astype(jnp.bfloat16), vh,
                       preferred_element_type=jnp.float32)
        o = o.transpose(0, 2, 1, 3).reshape(B, N, D).astype(jnp.bfloat16)
        proj = jnp.dot(o, p["proj_w"], preferred_element_type=jnp.float32)
        x = x + proj + p["proj_b"]
        h2 = ln(x, p["ln2_g"], p["ln2_b"], BLOCK_LN_EPS)
        m = jnp.dot(h2.astype(jnp.bfloat16), p["fc1_w"],
                    preferred_element_type=jnp.float32) + p["fc1_b"]
        m = jax.nn.gelu(m, approximate=True)
        y = jnp.dot(m.astype(jnp.bfloat16), p["fc2_w"],
                    preferred_element_type=jnp.float32) + p["fc2_b"]
        x = x + y
        if li == nb - 1:
            x = ln(x, params["dec_norm_g"], params["dec_norm_b"], FINAL_LN_EPS)
        outs.append(x)
    return outs


# ---------------------------------------------------------------------------
if __name__ == "__main__":
    key = jax.random.PRNGKey(0)
    B, num_views, patches = 2, 2, 8
    enc_embed_dim, embed_dim, num_heads, depth = 32, 32, 4, 2
    mlp_ratio, max_image_idx = 4.0, 64

    kfeat, kpos, kparam = jax.random.split(key, 3)
    feat_keys = jax.random.split(kfeat, num_views)
    pos_keys = jax.random.split(kpos, num_views)

    encoded_feats = [jax.random.normal(feat_keys[v], (B, patches, enc_embed_dim),
                                       jnp.float32) for v in range(num_views)]
    positions = [jax.random.randint(pos_keys[v], (B, patches, 2), 0, 16)
                 for v in range(num_views)]
    image_ids = jnp.concatenate(
        [jnp.full((B, patches), v, jnp.int32) for v in range(num_views)], axis=1)

    params = init_params(kparam, enc_embed_dim, embed_dim, num_heads, depth,
                         mlp_ratio, max_image_idx)

    _vmem_limit_bytes()          # resolve hardware query outside of jit
    _weights_single_buffered()   # Buffered(1) capability probe outside of jit

    fwd = jax.jit(functools.partial(fast3r_decoder_forward, num_heads=num_heads))
    outs = fwd(encoded_feats, positions, image_ids, params)
    jax.block_until_ready(outs)

    # structural checks
    N = num_views * patches
    assert len(outs) == depth + 1
    assert outs[0].shape == (B, N, enc_embed_dim)
    for o in outs[1:]:
        assert o.shape == (B, N, embed_dim)
        assert bool(jnp.all(jnp.isfinite(o)))

    # numerical check against a pure-JAX reference using the same bf16-at-MXU policy
    refs = _reference_forward(encoded_feats, image_ids, params, num_heads)
    for got, want in zip(outs[1:], refs[1:]):
        err = float(jnp.max(jnp.abs(got - want)))
        assert err < 5e-2, f"kernel/reference mismatch: max abs err = {err}"

    print("KERNEL_OK")
</pallas_src>

<mosaic_0001>
module attributes {stable_mosaic.version = 11 : i64} {
  func.func @_k(%arg0: i32, %arg1: i32, %arg2: memref<8x128xf32, #tpu.memory_space<vmem>>, %arg3: memref<8x128xf32, #tpu.memory_space<vmem>>, %arg4: memref<8x128xf32, #tpu.memory_space<vmem>>) attributes {dimension_semantics = [#tpu.dimension_semantics<arbitrary>, #tpu.dimension_semantics<arbitrary>], iteration_bounds = array<i64: 2, 2>, scalar_prefetch = 0 : i64, scratch_operands = 0 : i64, tpu.core_type = #tpu.core_type<tc>, window_params = [{transform_indices = @transform_0, window_bounds = array<i64: 8, 128>}, {pipeline_mode = #tpu.pipeline_mode<synchronous>, transform_indices = @transform_1, window_bounds = array<i64: 8, 128>}, {transform_indices = @transform_2, window_bounds = array<i64: 8, 128>}]} {
    %c0 = arith.constant 0 : index
    %c0_0 = arith.constant 0 : index
    %0 = vector.load %arg2[%c0, %c0_0] : memref<8x128xf32, #tpu.memory_space<vmem>>, vector<8x128xf32>
    %c0_1 = arith.constant 0 : index
    %c0_2 = arith.constant 0 : index
    %1 = vector.load %arg3[%c0_1, %c0_2] : memref<8x128xf32, #tpu.memory_space<vmem>>, vector<8x128xf32>
    %2 = arith.addf %0, %1 : vector<8x128xf32>
    %c0_3 = arith.constant 0 : index
    %c0_4 = arith.constant 0 : index
    %3 = vector.load %arg4[%c0_3, %c0_4] : memref<8x128xf32, #tpu.memory_space<vmem>>, vector<8x128xf32>
    tpu.vector_store %arg4[%c0_3, %c0_4], %2 {strides = array<i32>} : memref<8x128xf32, #tpu.memory_space<vmem>>, vector<8x128xf32>,
    return
  }
  func.func @transform_0(%arg0: i32, %arg1: i32) -> (i32, i32) {
    %c0_i32 = arith.constant 0 : i32
    return %arg0, %arg1 : i32, i32
  }
  func.func @transform_1(%arg0: i32, %arg1: i32) -> (i32, i32) {
    %c0_i32 = arith.constant 0 : i32
    %c0_i32_0 = arith.constant 0 : i32
    %c0_i32_1 = arith.constant 0 : i32
    return %c0_i32, %c0_i32_0 : i32, i32
  }
  func.func @transform_2(%arg0: i32, %arg1: i32) -> (i32, i32) {
    %c0_i32 = arith.constant 0 : i32
    return %arg0, %arg1 : i32, i32
  }
}

module attributes {stable_mosaic.version = 11 : i64} {
  func.func @qkv_kernel(%arg0: i32, %arg1: i32, %arg2: memref<1x16x32xf32, #tpu.memory_space<vmem>>, %arg3: memref<1x32xf32, #tpu.memory_space<vmem>>, %arg4: memref<1x32xf32, #tpu.memory_space<vmem>>, %arg5: memref<32x32xbf16, #tpu.memory_space<vmem>>, %arg6: memref<1x32xf32, #tpu.memory_space<vmem>>, %arg7: memref<32x32xbf16, #tpu.memory_space<vmem>>, %arg8: memref<1x32xf32, #tpu.memory_space<vmem>>, %arg9: memref<32x32xbf16, #tpu.memory_space<vmem>>, %arg10: memref<1x32xf32, #tpu.memory_space<vmem>>, %arg11: memref<1x16x32xbf16, #tpu.memory_space<vmem>>, %arg12: memref<1x16x32xbf16, #tpu.memory_space<vmem>>, %arg13: memref<1x16x32xbf16, #tpu.memory_space<vmem>>) attributes {dimension_semantics = [#tpu.dimension_semantics<parallel>, #tpu.dimension_semantics<parallel>], iteration_bounds = array<i64: 2, 1>, scalar_prefetch = 0 : i64, scratch_operands = 0 : i64, tpu.core_type = #tpu.core_type<tc>, window_params = [{transform_indices = @transform_0, window_bounds = array<i64: 1, 16, 32>}, {pipeline_mode = #tpu.pipeline_mode<synchronous>, transform_indices = @transform_1, window_bounds = array<i64: 1, 32>}, {pipeline_mode = #tpu.pipeline_mode<synchronous>, transform_indices = @transform_2, window_bounds = array<i64: 1, 32>}, {pipeline_mode = #tpu.pipeline_mode<synchronous>, transform_indices = @transform_3, window_bounds = array<i64: 32, 32>}, {pipeline_mode = #tpu.pipeline_mode<synchronous>, transform_indices = @transform_4, window_bounds = array<i64: 1, 32>}, {pipeline_mode = #tpu.pipeline_mode<synchronous>, transform_indices = @transform_5, window_bounds = array<i64: 32, 32>}, {pipeline_mode = #tpu.pipeline_mode<synchronous>, transform_indices = @transform_6, window_bounds = array<i64: 1, 32>}, {pipeline_mode = #tpu.pipeline_mode<synchronous>, transform_indices = @transform_7, window_bounds = array<i64: 32, 32>}, {pipeline_mode = #tpu.pipeline_mode<synchronous>, transform_indices = @transform_8, window_bounds = array<i64: 1, 32>}, {transform_indices = @transform_9, window_bounds = array<i64: 1, 16, 32>}, {transform_indices = @transform_10, window_bounds = array<i64: 1, 16, 32>}, {transform_indices = @transform_11, window_bounds = array<i64: 1, 16, 32>}]} {
    %c0 = arith.constant 0 : index
    %c0_0 = arith.constant 0 : index
    %c0_1 = arith.constant 0 : index
    %0 = vector.load %arg2[%c0, %c0_0, %c0_1] : memref<1x16x32xf32, #tpu.memory_space<vmem>>, vector<1x16x32xf32>
    %1 = vector.shape_cast %0 : vector<1x16x32xf32> to vector<16x32xf32>
    %c0_2 = arith.constant 0 : index
    %c0_3 = arith.constant 0 : index
    %2 = vector.load %arg3[%c0_2, %c0_3] : memref<1x32xf32, #tpu.memory_space<vmem>>, vector<1x32xf32>
    %c0_4 = arith.constant 0 : index
    %c0_5 = arith.constant 0 : index
    %3 = vector.load %arg4[%c0_4, %c0_5] : memref<1x32xf32, #tpu.memory_space<vmem>>, vector<1x32xf32>
    %cst = arith.constant dense<0.000000e+00> : vector<16xf32>
    %4 = vector.multi_reduction <add>, %1, %cst [1] : vector<16x32xf32> to vector<16xf32>
    %5 = vector.shape_cast %4 : vector<16xf32> to vector<16x1xf32>
    %cst_6 = arith.constant 3.200000e+01 : f32
    %6 = vector.broadcast %cst_6 : f32 to vector<16x1xf32>
    %7 = arith.divf %5, %6 : vector<16x1xf32>
    %8 = arith.mulf %1, %1 : vector<16x32xf32>
    %cst_7 = arith.constant dense<0.000000e+00> : vector<16xf32>
    %9 = vector.multi_reduction <add>, %8, %cst_7 [1] : vector<16x32xf32> to vector<16xf32>
    %10 = vector.shape_cast %9 : vector<16xf32> to vector<16x1xf32>
    %cst_8 = arith.constant 3.200000e+01 : f32
    %11 = vector.broadcast %cst_8 : f32 to vector<16x1xf32>
    %12 = arith.divf %10, %11 : vector<16x1xf32>
    %13 = arith.mulf %7, %7 : vector<16x1xf32>
    %14 = arith.subf %12, %13 : vector<16x1xf32>
    %cst_9 = arith.constant 0.000000e+00 : f32
    %15 = vector.broadcast %cst_9 : f32 to vector<16x1xf32>
    %16 = arith.maximumf %14, %15 : vector<16x1xf32>
    %17 = vector.broadcast %7 : vector<16x1xf32> to vector<16x32xf32>
    %18 = arith.subf %1, %17 : vector<16x32xf32>
    %cst_10 = arith.constant 9.99999974E-6 : f32
    %19 = vector.broadcast %cst_10 : f32 to vector<16x1xf32>
    %20 = arith.addf %16, %19 : vector<16x1xf32>
    %21 = math.rsqrt %20 : vector<16x1xf32>
    %22 = vector.broadcast %21 : vector<16x1xf32> to vector<16x32xf32>
    %23 = arith.mulf %18, %22 : vector<16x32xf32>
    %24 = vector.broadcast %2 : vector<1x32xf32> to vector<16x32xf32>
    %25 = arith.mulf %23, %24 : vector<16x32xf32>
    %26 = vector.broadcast %3 : vector<1x32xf32> to vector<16x32xf32>
    %27 = arith.addf %25, %26 : vector<16x32xf32>
    %28 = arith.truncf %27 : vector<16x32xf32> to vector<16x32xbf16>
    %c0_11 = arith.constant 0 : index
    %c0_12 = arith.constant 0 : index
    %29 = vector.load %arg5[%c0_11, %c0_12] : memref<32x32xbf16, #tpu.memory_space<vmem>>, vector<32x32xbf16>
    %cst_13 = arith.constant dense<0.000000e+00> : vector<16x32xf32>
    %30 = tpu.matmul %28, %29, %cst_13 {dimension_numbers = #tpu.dot_dimension_numbers<[1], [0], [0], [1], [0, 0, 1, 1], [], []>} : vector<16x32xbf16>, vector<32x32xbf16>, vector<16x32xf32> -> vector<16x32xf32>
    %c0_14 = arith.constant 0 : index
    %c0_15 = arith.constant 0 : index
    %31 = vector.load %arg6[%c0_14, %c0_15] : memref<1x32xf32, #tpu.memory_space<vmem>>, vector<1x32xf32>
    %32 = vector.broadcast %31 : vector<1x32xf32> to vector<16x32xf32>
    %33 = arith.addf %30, %32 : vector<16x32xf32>
    %cst_16 = arith.constant 0.353553385 : f32
    %34 = vector.broadcast %cst_16 : f32 to vector<16x32xf32>
    %35 = arith.mulf %33, %34 : vector<16x32xf32>
    %36 = arith.truncf %35 : vector<16x32xf32> to vector<16x32xbf16>
    %c0_17 = arith.constant 0 : index
    %c0_18 = arith.constant 0 : index
    %c0_19 = arith.constant 0 : index
    %37 = vector.load %arg11[%c0_17, %c0_18, %c0_19] : memref<1x16x32xbf16, #tpu.memory_space<vmem>>, vector<1x16x32xbf16>
    %38 = vector.shape_cast %37 : vector<1x16x32xbf16> to vector<16x32xbf16>
    %39 = vector.shape_cast %36 : vector<16x32xbf16> to vector<1x16x32xbf16>
    tpu.vector_store %arg11[%c0_17, %c0_18, %c0_19], %39 {strides = array<i32>} : memref<1x16x32xbf16, #tpu.memory_space<vmem>>, vector<1x16x32xbf16>,
    %c0_20 = arith.constant 0 : index
    %c0_21 = arith.constant 0 : index
    %40 = vector.load %arg7[%c0_20, %c0_21] : memref<32x32xbf16, #tpu.memory_space<vmem>>, vector<32x32xbf16>
    %cst_22 = arith.constant dense<0.000000e+00> : vector<16x32xf32>
    %41 = tpu.matmul %28, %40, %cst_22 {dimension_numbers = #tpu.dot_dimension_numbers<[1], [0], [0], [1], [0, 0, 1, 1], [], []>} : vector<16x32xbf16>, vector<32x32xbf16>, vector<16x32xf32> -> vector<16x32xf32>
    %c0_23 = arith.constant 0 : index
    %c0_24 = arith.constant 0 : index
    %42 = vector.load %arg8[%c0_23, %c0_24] : memref<1x32xf32, #tpu.memory_space<vmem>>, vector<1x32xf32>
    %43 = vector.broadcast %42 : vector<1x32xf32> to vector<16x32xf32>
    %44 = arith.addf %41, %43 : vector<16x32xf32>
    %45 = arith.truncf %44 : vector<16x32xf32> to vector<16x32xbf16>
    %c0_25 = arith.constant 0 : index
    %c0_26 = arith.constant 0 : index
    %c0_27 = arith.constant 0 : index
    %46 = vector.load %arg12[%c0_25, %c0_26, %c0_27] : memref<1x16x32xbf16, #tpu.memory_space<vmem>>, vector<1x16x32xbf16>
    %47 = vector.shape_cast %46 : vector<1x16x32xbf16> to vector<16x32xbf16>
    %48 = vector.shape_cast %45 : vector<16x32xbf16> to vector<1x16x32xbf16>
    tpu.vector_store %arg12[%c0_25, %c0_26, %c0_27], %48 {strides = array<i32>} : memref<1x16x32xbf16, #tpu.memory_space<vmem>>, vector<1x16x32xbf16>,
    %c0_28 = arith.constant 0 : index
    %c0_29 = arith.constant 0 : index
    %49 = vector.load %arg9[%c0_28, %c0_29] : memref<32x32xbf16, #tpu.memory_space<vmem>>, vector<32x32xbf16>
    %cst_30 = arith.constant dense<0.000000e+00> : vector<16x32xf32>
    %50 = tpu.matmul %28, %49, %cst_30 {dimension_numbers = #tpu.dot_dimension_numbers<[1], [0], [0], [1], [0, 0, 1, 1], [], []>} : vector<16x32xbf16>, vector<32x32xbf16>, vector<16x32xf32> -> vector<16x32xf32>
    %c0_31 = arith.constant 0 : index
    %c0_32 = arith.constant 0 : index
    %51 = vector.load %arg10[%c0_31, %c0_32] : memref<1x32xf32, #tpu.memory_space<vmem>>, vector<1x32xf32>
    %52 = vector.broadcast %51 : vector<1x32xf32> to vector<16x32xf32>
    %53 = arith.addf %50, %52 : vector<16x32xf32>
    %54 = arith.truncf %53 : vector<16x32xf32> to vector<16x32xbf16>
    %c0_33 = arith.constant 0 : index
    %c0_34 = arith.constant 0 : index
    %c0_35 = arith.constant 0 : index
    %55 = vector.load %arg13[%c0_33, %c0_34, %c0_35] : memref<1x16x32xbf16, #tpu.memory_space<vmem>>, vector<1x16x32xbf16>
    %56 = vector.shape_cast %55 : vector<1x16x32xbf16> to vector<16x32xbf16>
    %57 = vector.shape_cast %54 : vector<16x32xbf16> to vector<1x16x32xbf16>
    tpu.vector_store %arg13[%c0_33, %c0_34, %c0_35], %57 {strides = array<i32>} : memref<1x16x32xbf16, #tpu.memory_space<vmem>>, vector<1x16x32xbf16>,
    return
  }
  func.func @transform_0(%arg0: i32, %arg1: i32) -> (i32, i32, i32) {
    %c0_i32 = arith.constant 0 : i32
    %c0_i32_0 = arith.constant 0 : i32
    return %arg0, %arg1, %c0_i32 : i32, i32, i32
  }
  func.func @transform_1(%arg0: i32, %arg1: i32) -> (i32, i32) {
    %c0_i32 = arith.constant 0 : i32
    %c0_i32_0 = arith.constant 0 : i32
    %c0_i32_1 = arith.constant 0 : i32
    return %c0_i32, %c0_i32_0 : i32, i32
  }
  func.func @transform_2(%arg0: i32, %arg1: i32) -> (i32, i32) {
    %c0_i32 = arith.constant 0 : i32
    %c0_i32_0 = arith.constant 0 : i32
    %c0_i32_1 = arith.constant 0 : i32
    return %c0_i32, %c0_i32_0 : i32, i32
  }
  func.func @transform_3(%arg0: i32, %arg1: i32) -> (i32, i32) {
    %c0_i32 = arith.constant 0 : i32
    %c0_i32_0 = arith.constant 0 : i32
    %c0_i32_1 = arith.constant 0 : i32
    return %c0_i32, %c0_i32_0 : i32, i32
  }
  func.func @transform_4(%arg0: i32, %arg1: i32) -> (i32, i32) {
    %c0_i32 = arith.constant 0 : i32
    %c0_i32_0 = arith.constant 0 : i32
    %c0_i32_1 = arith.constant 0 : i32
    return %c0_i32, %c0_i32_0 : i32, i32
  }
  func.func @transform_5(%arg0: i32, %arg1: i32) -> (i32, i32) {
    %c0_i32 = arith.constant 0 : i32
    %c0_i32_0 = arith.constant 0 : i32
    %c0_i32_1 = arith.constant 0 : i32
    return %c0_i32, %c0_i32_0 : i32, i32
  }
  func.func @transform_6(%arg0: i32, %arg1: i32) -> (i32, i32) {
    %c0_i32 = arith.constant 0 : i32
    %c0_i32_0 = arith.constant 0 : i32
    %c0_i32_1 = arith.constant 0 : i32
    return %c0_i32, %c0_i32_0 : i32, i32
  }
  func.func @transform_7(%arg0: i32, %arg1: i32) -> (i32, i32) {
    %c0_i32 = arith.constant 0 : i32
    %c0_i32_0 = arith.constant 0 : i32
    %c0_i32_1 = arith.constant 0 : i32
    return %c0_i32, %c0_i32_0 : i32, i32
  }
  func.func @transform_8(%arg0: i32, %arg1: i32) -> (i32, i32) {
    %c0_i32 = arith.constant 0 : i32
    %c0_i32_0 = arith.constant 0 : i32
    %c0_i32_1 = arith.constant 0 : i32
    return %c0_i32, %c0_i32_0 : i32, i32
  }
  func.func @transform_9(%arg0: i32, %arg1: i32) -> (i32, i32, i32) {
    %c0_i32 = arith.constant 0 : i32
    %c0_i32_0 = arith.constant 0 : i32
    return %arg0, %arg1, %c0_i32 : i32, i32, i32
  }
  func.func @transform_10(%arg0: i32, %arg1: i32) -> (i32, i32, i32) {
    %c0_i32 = arith.constant 0 : i32
    %c0_i32_0 = arith.constant 0 : i32
    return %arg0, %arg1, %c0_i32 : i32, i32, i32
  }
  func.func @transform_11(%arg0: i32, %arg1: i32) -> (i32, i32, i32) {
    %c0_i32 = arith.constant 0 : i32
    %c0_i32_0 = arith.constant 0 : i32
    return %arg0, %arg1, %c0_i32 : i32, i32, i32
  }
}

module attributes {stable_mosaic.version = 11 : i64} {
  func.func @embed_kernel(%arg0: i32, %arg1: i32, %arg2: memref<1x16x32xf32, #tpu.memory_space<vmem>>, %arg3: memref<32x32xbf16, #tpu.memory_space<vmem>>, %arg4: memref<1x32xf32, #tpu.memory_space<vmem>>, %arg5: memref<1x16x32xbf16, #tpu.memory_space<vmem>>, %arg6: memref<1x16x32xf32, #tpu.memory_space<vmem>>) attributes {dimension_semantics = [#tpu.dimension_semantics<parallel>, #tpu.dimension_semantics<parallel>], iteration_bounds = array<i64: 2, 1>, scalar_prefetch = 0 : i64, scratch_operands = 0 : i64, tpu.core_type = #tpu.core_type<tc>, window_params = [{transform_indices = @transform_0, window_bounds = array<i64: 1, 16, 32>}, {pipeline_mode = #tpu.pipeline_mode<synchronous>, transform_indices = @transform_1, window_bounds = array<i64: 32, 32>}, {pipeline_mode = #tpu.pipeline_mode<synchronous>, transform_indices = @transform_2, window_bounds = array<i64: 1, 32>}, {transform_indices = @transform_3, window_bounds = array<i64: 1, 16, 32>}, {transform_indices = @transform_4, window_bounds = array<i64: 1, 16, 32>}]} {
    %c0 = arith.constant 0 : index
    %c0_0 = arith.constant 0 : index
    %c0_1 = arith.constant 0 : index
    %0 = vector.load %arg2[%c0, %c0_0, %c0_1] : memref<1x16x32xf32, #tpu.memory_space<vmem>>, vector<1x16x32xf32>
    %1 = vector.shape_cast %0 : vector<1x16x32xf32> to vector<16x32xf32>
    %2 = arith.truncf %1 : vector<16x32xf32> to vector<16x32xbf16>
    %c0_2 = arith.constant 0 : index
    %c0_3 = arith.constant 0 : index
    %3 = vector.load %arg3[%c0_2, %c0_3] : memref<32x32xbf16, #tpu.memory_space<vmem>>, vector<32x32xbf16>
    %cst = arith.constant dense<0.000000e+00> : vector<16x32xf32>
    %4 = tpu.matmul %2, %3, %cst {dimension_numbers = #tpu.dot_dimension_numbers<[1], [0], [0], [1], [0, 0, 1, 1], [], []>} : vector<16x32xbf16>, vector<32x32xbf16>, vector<16x32xf32> -> vector<16x32xf32>
    %c0_4 = arith.constant 0 : index
    %c0_5 = arith.constant 0 : index
    %5 = vector.load %arg4[%c0_4, %c0_5] : memref<1x32xf32, #tpu.memory_space<vmem>>, vector<1x32xf32>
    %6 = vector.broadcast %5 : vector<1x32xf32> to vector<16x32xf32>
    %7 = arith.addf %4, %6 : vector<16x32xf32>
    %c0_6 = arith.constant 0 : index
    %c0_7 = arith.constant 0 : index
    %c0_8 = arith.constant 0 : index
    %8 = vector.load %arg5[%c0_6, %c0_7, %c0_8] : memref<1x16x32xbf16, #tpu.memory_space<vmem>>, vector<1x16x32xbf16>
    %9 = vector.shape_cast %8 : vector<1x16x32xbf16> to vector<16x32xbf16>
    %10 = arith.extf %9 : vector<16x32xbf16> to vector<16x32xf32>
    %11 = arith.addf %7, %10 : vector<16x32xf32>
    %c0_9 = arith.constant 0 : index
    %c0_10 = arith.constant 0 : index
    %c0_11 = arith.constant 0 : index
    %12 = vector.load %arg6[%c0_9, %c0_10, %c0_11] : memref<1x16x32xf32, #tpu.memory_space<vmem>>, vector<1x16x32xf32>
    %13 = vector.shape_cast %12 : vector<1x16x32xf32> to vector<16x32xf32>
    %14 = vector.shape_cast %11 : vector<16x32xf32> to vector<1x16x32xf32>
    tpu.vector_store %arg6[%c0_9, %c0_10, %c0_11], %14 {strides = array<i32>} : memref<1x16x32xf32, #tpu.memory_space<vmem>>, vector<1x16x32xf32>,
    return
  }
  func.func @transform_0(%arg0: i32, %arg1: i32) -> (i32, i32, i32) {
    %c0_i32 = arith.constant 0 : i32
    %c0_i32_0 = arith.constant 0 : i32
    return %arg0, %arg1, %c0_i32 : i32, i32, i32
  }
  func.func @transform_1(%arg0: i32, %arg1: i32) -> (i32, i32) {
    %c0_i32 = arith.constant 0 : i32
    %c0_i32_0 = arith.constant 0 : i32
    %c0_i32_1 = arith.constant 0 : i32
    return %c0_i32, %c0_i32_0 : i32, i32
  }
  func.func @transform_2(%arg0: i32, %arg1: i32) -> (i32, i32) {
    %c0_i32 = arith.constant 0 : i32
    %c0_i32_0 = arith.constant 0 : i32
    %c0_i32_1 = arith.constant 0 : i32
    return %c0_i32, %c0_i32_0 : i32, i32
  }
  func.func @transform_3(%arg0: i32, %arg1: i32) -> (i32, i32, i32) {
    %c0_i32 = arith.constant 0 : i32
    %c0_i32_0 = arith.constant 0 : i32
    return %arg0, %arg1, %c0_i32 : i32, i32, i32
  }
  func.func @transform_4(%arg0: i32, %arg1: i32) -> (i32, i32, i32) {
    %c0_i32 = arith.constant 0 : i32
    %c0_i32_0 = arith.constant 0 : i32
    return %arg0, %arg1, %c0_i32 : i32, i32, i32
  }
}

module attributes {stable_mosaic.version = 11 : i64} {
  func.func @flash_attn_kernel(%arg0: i32, %arg1: i32, %arg2: i32, %arg3: i32, %arg4: memref<1x16x32xbf16, #tpu.memory_space<vmem>>, %arg5: memref<1x16x32xbf16, #tpu.memory_space<vmem>>, %arg6: memref<1x16x32xbf16, #tpu.memory_space<vmem>>, %arg7: memref<1x16x32xbf16, #tpu.memory_space<vmem>>, %arg8: memref<4x16x128xf32, #tpu.memory_space<vmem>>, %arg9: memref<4x16x128xf32, #tpu.memory_space<vmem>>, %arg10: memref<16x32xf32, #tpu.memory_space<vmem>>) attributes {dimension_semantics = [#tpu.dimension_semantics<parallel>, #tpu.dimension_semantics<parallel>, #tpu.dimension_semantics<parallel>, #tpu.dimension_semantics<arbitrary>], iteration_bounds = array<i64: 2, 1, 1, 1>, scalar_prefetch = 0 : i64, scratch_operands = 3 : i64, tpu.core_type = #tpu.core_type<tc>, window_params = [{transform_indices = @transform_0, window_bounds = array<i64: 1, 16, 32>}, {transform_indices = @transform_1, window_bounds = array<i64: 1, 16, 32>}, {transform_indices = @transform_2, window_bounds = array<i64: 1, 16, 32>}, {transform_indices = @transform_3, window_bounds = array<i64: 1, 16, 32>}]} {
    %c0_i32 = arith.constant 0 : i32
    %0 = arith.cmpi eq, %arg3, %c0_i32 : i32
    %1 = arith.extui %0 : i1 to i32
    %c0_i32_0 = arith.constant 0 : i32
    %2 = arith.cmpi ne, %1, %c0_i32_0 : i32
    scf.if %2 {
      %cst_84 = arith.constant -1.000000e+30 : f32
      %156 = vector.broadcast %cst_84 : f32 to vector<4x16x128xf32>
      %c0_85 = arith.constant 0 : index
      %c0_86 = arith.constant 0 : index
      %c0_87 = arith.constant 0 : index
      %157 = vector.load %arg8[%c0_85, %c0_86, %c0_87] : memref<4x16x128xf32, #tpu.memory_space<vmem>>, vector<4x16x128xf32>
      tpu.vector_store %arg8[%c0_85, %c0_86, %c0_87], %156 {strides = array<i32>} : memref<4x16x128xf32, #tpu.memory_space<vmem>>, vector<4x16x128xf32>,
      %cst_88 = arith.constant 0.000000e+00 : f32
      %158 = vector.broadcast %cst_88 : f32 to vector<4x16x128xf32>
      %c0_89 = arith.constant 0 : index
      %c0_90 = arith.constant 0 : index
      %c0_91 = arith.constant 0 : index
      %159 = vector.load %arg9[%c0_89, %c0_90, %c0_91] : memref<4x16x128xf32, #tpu.memory_space<vmem>>, vector<4x16x128xf32>
      tpu.vector_store %arg9[%c0_89, %c0_90, %c0_91], %158 {strides = array<i32>} : memref<4x16x128xf32, #tpu.memory_space<vmem>>, vector<4x16x128xf32>,
      %cst_92 = arith.constant 0.000000e+00 : f32
      %160 = vector.broadcast %cst_92 : f32 to vector<16x32xf32>
      %c0_93 = arith.constant 0 : index
      %c0_94 = arith.constant 0 : index
      %161 = vector.load %arg10[%c0_93, %c0_94] : memref<16x32xf32, #tpu.memory_space<vmem>>, vector<16x32xf32>
      tpu.vector_store %arg10[%c0_93, %c0_94], %160 {strides = array<i32>} : memref<16x32xf32, #tpu.memory_space<vmem>>, vector<16x32xf32>,
    } else {
    }
    %c0 = arith.constant 0 : index
    %c0_1 = arith.constant 0 : index
    %c0_2 = arith.constant 0 : index
    %3 = vector.load %arg4[%c0, %c0_1, %c0_2] : memref<1x16x32xbf16, #tpu.memory_space<vmem>>, vector<1x16x32xbf16>
    %4 = vector.shape_cast %3 : vector<1x16x32xbf16> to vector<16x32xbf16>
    %c0_3 = arith.constant 0 : index
    %c0_4 = arith.constant 0 : index
    %c0_5 = arith.constant 0 : index
    %5 = vector.load %arg5[%c0_3, %c0_4, %c0_5] : memref<1x16x32xbf16, #tpu.memory_space<vmem>>, vector<1x16x32xbf16>
    %6 = vector.shape_cast %5 : vector<1x16x32xbf16> to vector<16x32xbf16>
    %c0_6 = arith.constant 0 : index
    %c0_7 = arith.constant 0 : index
    %c0_8 = arith.constant 0 : index
    %7 = vector.load %arg6[%c0_6, %c0_7, %c0_8] : memref<1x16x32xbf16, #tpu.memory_space<vmem>>, vector<1x16x32xbf16>
    %8 = vector.shape_cast %7 : vector<1x16x32xbf16> to vector<16x32xbf16>
    %9 = vector.extract_strided_slice %4 {offsets = [0, 0], sizes = [16, 8], strides = [1, 1]} : vector<16x32xbf16> to vector<16x8xbf16>
    %10 = vector.extract_strided_slice %6 {offsets = [0, 0], sizes = [16, 8], strides = [1, 1]} : vector<16x32xbf16> to vector<16x8xbf16>
    %cst = arith.constant dense<0.000000e+00> : vector<16x16xf32>
    %11 = tpu.matmul %9, %10, %cst {dimension_numbers = #tpu.dot_dimension_numbers<[1], [1], [0], [0], [0, 0, 1, 0], [], []>} : vector<16x8xbf16>, vector<16x8xbf16>, vector<16x16xf32> -> vector<16x16xf32>
    %c0_9 = arith.constant 0 : index
    %c0_10 = arith.constant 0 : index
    %c0_11 = arith.constant 0 : index
    %12 = vector.load %arg8[%c0_9, %c0_10, %c0_11] : memref<4x16x128xf32, #tpu.memory_space<vmem>>, vector<1x16x128xf32>
    %13 = vector.shape_cast %12 : vector<1x16x128xf32> to vector<16x128xf32>
    %cst_12 = arith.constant dense<0xFF800000> : vector<16xf32>
    %14 = vector.multi_reduction <maximumf>, %11, %cst_12 [1] : vector<16x16xf32> to vector<16xf32>
    %15 = vector.shape_cast %14 : vector<16xf32> to vector<16x1xf32>
    %16 = vector.broadcast %15 : vector<16x1xf32> to vector<16x128xf32>
    %17 = arith.maximumf %13, %16 : vector<16x128xf32>
    %18 = arith.subf %13, %17 : vector<16x128xf32>
    %19 = math.exp %18 : vector<16x128xf32>
    %20 = vector.extract_strided_slice %17 {offsets = [0, 0], sizes = [16, 1], strides = [1, 1]} : vector<16x128xf32> to vector<16x1xf32>
    %21 = vector.broadcast %20 : vector<16x1xf32> to vector<16x16xf32>
    %22 = arith.subf %11, %21 : vector<16x16xf32>
    %23 = math.exp %22 : vector<16x16xf32>
    %c0_13 = arith.constant 0 : index
    %c0_14 = arith.constant 0 : index
    %c0_15 = arith.constant 0 : index
    %24 = vector.load %arg9[%c0_13, %c0_14, %c0_15] : memref<4x16x128xf32, #tpu.memory_space<vmem>>, vector<1x16x128xf32>
    %25 = vector.shape_cast %24 : vector<1x16x128xf32> to vector<16x128xf32>
    %26 = arith.mulf %19, %25 : vector<16x128xf32>
    %cst_16 = arith.constant dense<0.000000e+00> : vector<16xf32>
    %27 = vector.multi_reduction <add>, %23, %cst_16 [1] : vector<16x16xf32> to vector<16xf32>
    %28 = vector.shape_cast %27 : vector<16xf32> to vector<16x1xf32>
    %29 = vector.broadcast %28 : vector<16x1xf32> to vector<16x128xf32>
    %30 = arith.addf %26, %29 : vector<16x128xf32>
    %c0_17 = arith.constant 0 : index
    %c0_18 = arith.constant 0 : index
    %c0_19 = arith.constant 0 : index
    %31 = vector.load %arg9[%c0_17, %c0_18, %c0_19] : memref<4x16x128xf32, #tpu.memory_space<vmem>>, vector<1x16x128xf32>
    %32 = vector.shape_cast %31 : vector<1x16x128xf32> to vector<16x128xf32>
    %33 = vector.shape_cast %30 : vector<16x128xf32> to vector<1x16x128xf32>
    tpu.vector_store %arg9[%c0_17, %c0_18, %c0_19], %33 {strides = array<i32>} : memref<4x16x128xf32, #tpu.memory_space<vmem>>, vector<1x16x128xf32>,
    %c0_20 = arith.constant 0 : index
    %c0_21 = arith.constant 0 : index
    %c0_22 = arith.constant 0 : index
    %34 = vector.load %arg8[%c0_20, %c0_21, %c0_22] : memref<4x16x128xf32, #tpu.memory_space<vmem>>, vector<1x16x128xf32>
    %35 = vector.shape_cast %34 : vector<1x16x128xf32> to vector<16x128xf32>
    %36 = vector.shape_cast %17 : vector<16x128xf32> to vector<1x16x128xf32>
    tpu.vector_store %arg8[%c0_20, %c0_21, %c0_22], %36 {strides = array<i32>} : memref<4x16x128xf32, #tpu.memory_space<vmem>>, vector<1x16x128xf32>,
    %37 = arith.truncf %23 : vector<16x16xf32> to vector<16x16xbf16>
    %38 = vector.extract_strided_slice %8 {offsets = [0, 0], sizes = [16, 8], strides = [1, 1]} : vector<16x32xbf16> to vector<16x8xbf16>
    %cst_23 = arith.constant dense<0.000000e+00> : vector<16x8xf32>
    %39 = tpu.matmul %37, %38, %cst_23 {dimension_numbers = #tpu.dot_dimension_numbers<[1], [0], [0], [1], [0, 0, 1, 1], [], []>} : vector<16x16xbf16>, vector<16x8xbf16>, vector<16x8xf32> -> vector<16x8xf32>
    %40 = vector.extract_strided_slice %19 {offsets = [0, 0], sizes = [16, 8], strides = [1, 1]} : vector<16x128xf32> to vector<16x8xf32>
    %c0_24 = arith.constant 0 : index
    %c0_25 = arith.constant 0 : index
    %41 = vector.load %arg10[%c0_24, %c0_25] : memref<16x32xf32, #tpu.memory_space<vmem>>, vector<16x8xf32>
    %42 = arith.mulf %40, %41 : vector<16x8xf32>
    %43 = arith.addf %42, %39 : vector<16x8xf32>
    %c0_26 = arith.constant 0 : index
    %c0_27 = arith.constant 0 : index
    %44 = vector.load %arg10[%c0_26, %c0_27] : memref<16x32xf32, #tpu.memory_space<vmem>>, vector<16x8xf32>
    tpu.vector_store %arg10[%c0_26, %c0_27], %43 {strides = array<i32>} : memref<16x32xf32, #tpu.memory_space<vmem>>, vector<16x8xf32>,
    %45 = vector.extract_strided_slice %4 {offsets = [0, 8], sizes = [16, 8], strides = [1, 1]} : vector<16x32xbf16> to vector<16x8xbf16>
    %46 = vector.extract_strided_slice %6 {offsets = [0, 8], sizes = [16, 8], strides = [1, 1]} : vector<16x32xbf16> to vector<16x8xbf16>
    %cst_28 = arith.constant dense<0.000000e+00> : vector<16x16xf32>
    %47 = tpu.matmul %45, %46, %cst_28 {dimension_numbers = #tpu.dot_dimension_numbers<[1], [1], [0], [0], [0, 0, 1, 0], [], []>} : vector<16x8xbf16>, vector<16x8xbf16>, vector<16x16xf32> -> vector<16x16xf32>
    %c1 = arith.constant 1 : index
    %c0_29 = arith.constant 0 : index
    %c0_30 = arith.constant 0 : index
    %48 = vector.load %arg8[%c1, %c0_29, %c0_30] : memref<4x16x128xf32, #tpu.memory_space<vmem>>, vector<1x16x128xf32>
    %49 = vector.shape_cast %48 : vector<1x16x128xf32> to vector<16x128xf32>
    %cst_31 = arith.constant dense<0xFF800000> : vector<16xf32>
    %50 = vector.multi_reduction <maximumf>, %47, %cst_31 [1] : vector<16x16xf32> to vector<16xf32>
    %51 = vector.shape_cast %50 : vector<16xf32> to vector<16x1xf32>
    %52 = vector.broadcast %51 : vector<16x1xf32> to vector<16x128xf32>
    %53 = arith.maximumf %49, %52 : vector<16x128xf32>
    %54 = arith.subf %49, %53 : vector<16x128xf32>
    %55 = math.exp %54 : vector<16x128xf32>
    %56 = vector.extract_strided_slice %53 {offsets = [0, 0], sizes = [16, 1], strides = [1, 1]} : vector<16x128xf32> to vector<16x1xf32>
    %57 = vector.broadcast %56 : vector<16x1xf32> to vector<16x16xf32>
    %58 = arith.subf %47, %57 : vector<16x16xf32>
    %59 = math.exp %58 : vector<16x16xf32>
    %c1_32 = arith.constant 1 : index
    %c0_33 = arith.constant 0 : index
    %c0_34 = arith.constant 0 : index
    %60 = vector.load %arg9[%c1_32, %c0_33, %c0_34] : memref<4x16x128xf32, #tpu.memory_space<vmem>>, vector<1x16x128xf32>
    %61 = vector.shape_cast %60 : vector<1x16x128xf32> to vector<16x128xf32>
    %62 = arith.mulf %55, %61 : vector<16x128xf32>
    %cst_35 = arith.constant dense<0.000000e+00> : vector<16xf32>
    %63 = vector.multi_reduction <add>, %59, %cst_35 [1] : vector<16x16xf32> to vector<16xf32>
    %64 = vector.shape_cast %63 : vector<16xf32> to vector<16x1xf32>
    %65 = vector.broadcast %64 : vector<16x1xf32> to vector<16x128xf32>
    %66 = arith.addf %62, %65 : vector<16x128xf32>
    %c1_36 = arith.constant 1 : index
    %c0_37 = arith.constant 0 : index
    %c0_38 = arith.constant 0 : index
    %67 = vector.load %arg9[%c1_36, %c0_37, %c0_38] : memref<4x16x128xf32, #tpu.memory_space<vmem>>, vector<1x16x128xf32>
    %68 = vector.shape_cast %67 : vector<1x16x128xf32> to vector<16x128xf32>
    %69 = vector.shape_cast %66 : vector<16x128xf32> to vector<1x16x128xf32>
    tpu.vector_store %arg9[%c1_36, %c0_37, %c0_38], %69 {strides = array<i32>} : memref<4x16x128xf32, #tpu.memory_space<vmem>>, vector<1x16x128xf32>,
    %c1_39 = arith.constant 1 : index
    %c0_40 = arith.constant 0 : index
    %c0_41 = arith.constant 0 : index
    %70 = vector.load %arg8[%c1_39, %c0_40, %c0_41] : memref<4x16x128xf32, #tpu.memory_space<vmem>>, vector<1x16x128xf32>
    %71 = vector.shape_cast %70 : vector<1x16x128xf32> to vector<16x128xf32>
    %72 = vector.shape_cast %53 : vector<16x128xf32> to vector<1x16x128xf32>
    tpu.vector_store %arg8[%c1_39, %c0_40, %c0_41], %72 {strides = array<i32>} : memref<4x16x128xf32, #tpu.memory_space<vmem>>, vector<1x16x128xf32>,
    %73 = arith.truncf %59 : vector<16x16xf32> to vector<16x16xbf16>
    %74 = vector.extract_strided_slice %8 {offsets = [0, 8], sizes = [16, 8], strides = [1, 1]} : vector<16x32xbf16> to vector<16x8xbf16>
    %cst_42 = arith.constant dense<0.000000e+00> : vector<16x8xf32>
    %75 = tpu.matmul %73, %74, %cst_42 {dimension_numbers = #tpu.dot_dimension_numbers<[1], [0], [0], [1], [0, 0, 1, 1], [], []>} : vector<16x16xbf16>, vector<16x8xbf16>, vector<16x8xf32> -> vector<16x8xf32>
    %76 = vector.extract_strided_slice %55 {offsets = [0, 0], sizes = [16, 8], strides = [1, 1]} : vector<16x128xf32> to vector<16x8xf32>
    %c0_43 = arith.constant 0 : index
    %c8 = arith.constant 8 : index
    %77 = vector.load %arg10[%c0_43, %c8] : memref<16x32xf32, #tpu.memory_space<vmem>>, vector<16x8xf32>
    %78 = arith.mulf %76, %77 : vector<16x8xf32>
    %79 = arith.addf %78, %75 : vector<16x8xf32>
    %c0_44 = arith.constant 0 : index
    %c8_45 = arith.constant 8 : index
    %80 = vector.load %arg10[%c0_44, %c8_45] : memref<16x32xf32, #tpu.memory_space<vmem>>, vector<16x8xf32>
    tpu.vector_store %arg10[%c0_44, %c8_45], %79 {strides = array<i32>} : memref<16x32xf32, #tpu.memory_space<vmem>>, vector<16x8xf32>,
    %81 = vector.extract_strided_slice %4 {offsets = [0, 16], sizes = [16, 8], strides = [1, 1]} : vector<16x32xbf16> to vector<16x8xbf16>
    %82 = vector.extract_strided_slice %6 {offsets = [0, 16], sizes = [16, 8], strides = [1, 1]} : vector<16x32xbf16> to vector<16x8xbf16>
    %cst_46 = arith.constant dense<0.000000e+00> : vector<16x16xf32>
    %83 = tpu.matmul %81, %82, %cst_46 {dimension_numbers = #tpu.dot_dimension_numbers<[1], [1], [0], [0], [0, 0, 1, 0], [], []>} : vector<16x8xbf16>, vector<16x8xbf16>, vector<16x16xf32> -> vector<16x16xf32>
    %c2 = arith.constant 2 : index
    %c0_47 = arith.constant 0 : index
    %c0_48 = arith.constant 0 : index
    %84 = vector.load %arg8[%c2, %c0_47, %c0_48] : memref<4x16x128xf32, #tpu.memory_space<vmem>>, vector<1x16x128xf32>
    %85 = vector.shape_cast %84 : vector<1x16x128xf32> to vector<16x128xf32>
    %cst_49 = arith.constant dense<0xFF800000> : vector<16xf32>
    %86 = vector.multi_reduction <maximumf>, %83, %cst_49 [1] : vector<16x16xf32> to vector<16xf32>
    %87 = vector.shape_cast %86 : vector<16xf32> to vector<16x1xf32>
    %88 = vector.broadcast %87 : vector<16x1xf32> to vector<16x128xf32>
    %89 = arith.maximumf %85, %88 : vector<16x128xf32>
    %90 = arith.subf %85, %89 : vector<16x128xf32>
    %91 = math.exp %90 : vector<16x128xf32>
    %92 = vector.extract_strided_slice %89 {offsets = [0, 0], sizes = [16, 1], strides = [1, 1]} : vector<16x128xf32> to vector<16x1xf32>
    %93 = vector.broadcast %92 : vector<16x1xf32> to vector<16x16xf32>
    %94 = arith.subf %83, %93 : vector<16x16xf32>
    %95 = math.exp %94 : vector<16x16xf32>
    %c2_50 = arith.constant 2 : index
    %c0_51 = arith.constant 0 : index
    %c0_52 = arith.constant 0 : index
    %96 = vector.load %arg9[%c2_50, %c0_51, %c0_52] : memref<4x16x128xf32, #tpu.memory_space<vmem>>, vector<1x16x128xf32>
    %97 = vector.shape_cast %96 : vector<1x16x128xf32> to vector<16x128xf32>
    %98 = arith.mulf %91, %97 : vector<16x128xf32>
    %cst_53 = arith.constant dense<0.000000e+00> : vector<16xf32>
    %99 = vector.multi_reduction <add>, %95, %cst_53 [1] : vector<16x16xf32> to vector<16xf32>
    %100 = vector.shape_cast %99 : vector<16xf32> to vector<16x1xf32>
    %101 = vector.broadcast %100 : vector<16x1xf32> to vector<16x128xf32>
    %102 = arith.addf %98, %101 : vector<16x128xf32>
    %c2_54 = arith.constant 2 : index
    %c0_55 = arith.constant 0 : index
    %c0_56 = arith.constant 0 : index
    %103 = vector.load %arg9[%c2_54, %c0_55, %c0_56] : memref<4x16x128xf32, #tpu.memory_space<vmem>>, vector<1x16x128xf32>
    %104 = vector.shape_cast %103 : vector<1x16x128xf32> to vector<16x128xf32>
    %105 = vector.shape_cast %102 : vector<16x128xf32> to vector<1x16x128xf32>
    tpu.vector_store %arg9[%c2_54, %c0_55, %c0_56], %105 {strides = array<i32>} : memref<4x16x128xf32, #tpu.memory_space<vmem>>, vector<1x16x128xf32>,
    %c2_57 = arith.constant 2 : index
    %c0_58 = arith.constant 0 : index
    %c0_59 = arith.constant 0 : index
    %106 = vector.load %arg8[%c2_57, %c0_58, %c0_59] : memref<4x16x128xf32, #tpu.memory_space<vmem>>, vector<1x16x128xf32>
    %107 = vector.shape_cast %106 : vector<1x16x128xf32> to vector<16x128xf32>
    %108 = vector.shape_cast %89 : vector<16x128xf32> to vector<1x16x128xf32>
    tpu.vector_store %arg8[%c2_57, %c0_58, %c0_59], %108 {strides = array<i32>} : memref<4x16x128xf32, #tpu.memory_space<vmem>>, vector<1x16x128xf32>,
    %109 = arith.truncf %95 : vector<16x16xf32> to vector<16x16xbf16>
    %110 = vector.extract_strided_slice %8 {offsets = [0, 16], sizes = [16, 8], strides = [1, 1]} : vector<16x32xbf16> to vector<16x8xbf16>
    %cst_60 = arith.constant dense<0.000000e+00> : vector<16x8xf32>
    %111 = tpu.matmul %109, %110, %cst_60 {dimension_numbers = #tpu.dot_dimension_numbers<[1], [0], [0], [1], [0, 0, 1, 1], [], []>} : vector<16x16xbf16>, vector<16x8xbf16>, vector<16x8xf32> -> vector<16x8xf32>
    %112 = vector.extract_strided_slice %91 {offsets = [0, 0], sizes = [16, 8], strides = [1, 1]} : vector<16x128xf32> to vector<16x8xf32>
    %c0_61 = arith.constant 0 : index
    %c16 = arith.constant 16 : index
    %113 = vector.load %arg10[%c0_61, %c16] : memref<16x32xf32, #tpu.memory_space<vmem>>, vector<16x8xf32>
    %114 = arith.mulf %112, %113 : vector<16x8xf32>
    %115 = arith.addf %114, %111 : vector<16x8xf32>
    %c0_62 = arith.constant 0 : index
    %c16_63 = arith.constant 16 : index
    %116 = vector.load %arg10[%c0_62, %c16_63] : memref<16x32xf32, #tpu.memory_space<vmem>>, vector<16x8xf32>
    tpu.vector_store %arg10[%c0_62, %c16_63], %115 {strides = array<i32>} : memref<16x32xf32, #tpu.memory_space<vmem>>, vector<16x8xf32>,
    %117 = vector.extract_strided_slice %4 {offsets = [0, 24], sizes = [16, 8], strides = [1, 1]} : vector<16x32xbf16> to vector<16x8xbf16>
    %118 = vector.extract_strided_slice %6 {offsets = [0, 24], sizes = [16, 8], strides = [1, 1]} : vector<16x32xbf16> to vector<16x8xbf16>
    %cst_64 = arith.constant dense<0.000000e+00> : vector<16x16xf32>
    %119 = tpu.matmul %117, %118, %cst_64 {dimension_numbers = #tpu.dot_dimension_numbers<[1], [1], [0], [0], [0, 0, 1, 0], [], []>} : vector<16x8xbf16>, vector<16x8xbf16>, vector<16x16xf32> -> vector<16x16xf32>
    %c3 = arith.constant 3 : index
    %c0_65 = arith.constant 0 : index
    %c0_66 = arith.constant 0 : index
    %120 = vector.load %arg8[%c3, %c0_65, %c0_66] : memref<4x16x128xf32, #tpu.memory_space<vmem>>, vector<1x16x128xf32>
    %121 = vector.shape_cast %120 : vector<1x16x128xf32> to vector<16x128xf32>
    %cst_67 = arith.constant dense<0xFF800000> : vector<16xf32>
    %122 = vector.multi_reduction <maximumf>, %119, %cst_67 [1] : vector<16x16xf32> to vector<16xf32>
    %123 = vector.shape_cast %122 : vector<16xf32> to vector<16x1xf32>
    %124 = vector.broadcast %123 : vector<16x1xf32> to vector<16x128xf32>
    %125 = arith.maximumf %121, %124 : vector<16x128xf32>
    %126 = arith.subf %121, %125 : vector<16x128xf32>
    %127 = math.exp %126 : vector<16x128xf32>
    %128 = vector.extract_strided_slice %125 {offsets = [0, 0], sizes = [16, 1], strides = [1, 1]} : vector<16x128xf32> to vector<16x1xf32>
    %129 = vector.broadcast %128 : vector<16x1xf32> to vector<16x16xf32>
    %130 = arith.subf %119, %129 : vector<16x16xf32>
    %131 = math.exp %130 : vector<16x16xf32>
    %c3_68 = arith.constant 3 : index
    %c0_69 = arith.constant 0 : index
    %c0_70 = arith.constant 0 : index
    %132 = vector.load %arg9[%c3_68, %c0_69, %c0_70] : memref<4x16x128xf32, #tpu.memory_space<vmem>>, vector<1x16x128xf32>
    %133 = vector.shape_cast %132 : vector<1x16x128xf32> to vector<16x128xf32>
    %134 = arith.mulf %127, %133 : vector<16x128xf32>
    %cst_71 = arith.constant dense<0.000000e+00> : vector<16xf32>
    %135 = vector.multi_reduction <add>, %131, %cst_71 [1] : vector<16x16xf32> to vector<16xf32>
    %136 = vector.shape_cast %135 : vector<16xf32> to vector<16x1xf32>
    %137 = vector.broadcast %136 : vector<16x1xf32> to vector<16x128xf32>
    %138 = arith.addf %134, %137 : vector<16x128xf32>
    %c3_72 = arith.constant 3 : index
    %c0_73 = arith.constant 0 : index
    %c0_74 = arith.constant 0 : index
    %139 = vector.load %arg9[%c3_72, %c0_73, %c0_74] : memref<4x16x128xf32, #tpu.memory_space<vmem>>, vector<1x16x128xf32>
    %140 = vector.shape_cast %139 : vector<1x16x128xf32> to vector<16x128xf32>
    %141 = vector.shape_cast %138 : vector<16x128xf32> to vector<1x16x128xf32>
    tpu.vector_store %arg9[%c3_72, %c0_73, %c0_74], %141 {strides = array<i32>} : memref<4x16x128xf32, #tpu.memory_space<vmem>>, vector<1x16x128xf32>,
    %c3_75 = arith.constant 3 : index
    %c0_76 = arith.constant 0 : index
    %c0_77 = arith.constant 0 : index
    %142 = vector.load %arg8[%c3_75, %c0_76, %c0_77] : memref<4x16x128xf32, #tpu.memory_space<vmem>>, vector<1x16x128xf32>
    %143 = vector.shape_cast %142 : vector<1x16x128xf32> to vector<16x128xf32>
    %144 = vector.shape_cast %125 : vector<16x128xf32> to vector<1x16x128xf32>
    tpu.vector_store %arg8[%c3_75, %c0_76, %c0_77], %144 {strides = array<i32>} : memref<4x16x128xf32, #tpu.memory_space<vmem>>, vector<1x16x128xf32>,
    %145 = arith.truncf %131 : vector<16x16xf32> to vector<16x16xbf16>
    %146 = vector.extract_strided_slice %8 {offsets = [0, 24], sizes = [16, 8], strides = [1, 1]} : vector<16x32xbf16> to vector<16x8xbf16>
    %cst_78 = arith.constant dense<0.000000e+00> : vector<16x8xf32>
    %147 = tpu.matmul %145, %146, %cst_78 {dimension_numbers = #tpu.dot_dimension_numbers<[1], [0], [0], [1], [0, 0, 1, 1], [], []>} : vector<16x16xbf16>, vector<16x8xbf16>, vector<16x8xf32> -> vector<16x8xf32>
    %148 = vector.extract_strided_slice %127 {offsets = [0, 0], sizes = [16, 8], strides = [1, 1]} : vector<16x128xf32> to vector<16x8xf32>
    %c0_79 = arith.constant 0 : index
    %c24 = arith.constant 24 : index
    %149 = vector.load %arg10[%c0_79, %c24] : memref<16x32xf32, #tpu.memory_space<vmem>>, vector<16x8xf32>
    %150 = arith.mulf %148, %149 : vector<16x8xf32>
    %151 = arith.addf %150, %147 : vector<16x8xf32>
    %c0_80 = arith.constant 0 : index
    %c24_81 = arith.constant 24 : index
    %152 = vector.load %arg10[%c0_80, %c24_81] : memref<16x32xf32, #tpu.memory_space<vmem>>, vector<16x8xf32>
    tpu.vector_store %arg10[%c0_80, %c24_81], %151 {strides = array<i32>} : memref<16x32xf32, #tpu.memory_space<vmem>>, vector<16x8xf32>,
    %c0_i32_82 = arith.constant 0 : i32
    %153 = arith.cmpi eq, %arg3, %c0_i32_82 : i32
    %154 = arith.extui %153 : i1 to i32
    %c0_i32_83 = arith.constant 0 : i32
    %155 = arith.cmpi ne, %154, %c0_i32_83 : i32
    scf.if %155 {
      %c0_84 = arith.constant 0 : index
      %c0_85 = arith.constant 0 : index
      %c0_86 = arith.constant 0 : index
      %156 = vector.load %arg9[%c0_84, %c0_85, %c0_86] : memref<4x16x128xf32, #tpu.memory_space<vmem>>, vector<1x16x128xf32>
      %157 = vector.shape_cast %156 : vector<1x16x128xf32> to vector<16x128xf32>
      %158 = vector.extract_strided_slice %157 {offsets = [0, 0], sizes = [16, 8], strides = [1, 1]} : vector<16x128xf32> to vector<16x8xf32>
      %159 = tpu.reciprocal %158 {approx = true} : vector<16x8xf32> -> vector<16x8xf32>
      %c0_87 = arith.constant 0 : index
      %c0_88 = arith.constant 0 : index
      %160 = vector.load %arg10[%c0_87, %c0_88] : memref<16x32xf32, #tpu.memory_space<vmem>>, vector<16x8xf32>
      %161 = arith.mulf %160, %159 : vector<16x8xf32>
      %162 = arith.truncf %161 : vector<16x8xf32> to vector<16x8xbf16>
      %c0_89 = arith.constant 0 : index
      %c0_90 = arith.constant 0 : index
      %c0_91 = arith.constant 0 : index
      %163 = vector.load %arg7[%c0_89, %c0_90, %c0_91] : memref<1x16x32xbf16, #tpu.memory_space<vmem>>, vector<1x16x8xbf16>
      %164 = vector.shape_cast %163 : vector<1x16x8xbf16> to vector<16x8xbf16>
      %165 = vector.shape_cast %162 : vector<16x8xbf16> to vector<1x16x8xbf16>
      tpu.vector_store %arg7[%c0_89, %c0_90, %c0_91], %165 {strides = array<i32>} : memref<1x16x32xbf16, #tpu.memory_space<vmem>>, vector<1x16x8xbf16>,
      %c1_92 = arith.constant 1 : index
      %c0_93 = arith.constant 0 : index
      %c0_94 = arith.constant 0 : index
      %166 = vector.load %arg9[%c1_92, %c0_93, %c0_94] : memref<4x16x128xf32, #tpu.memory_space<vmem>>, vector<1x16x128xf32>
      %167 = vector.shape_cast %166 : vector<1x16x128xf32> to vector<16x128xf32>
      %168 = vector.extract_strided_slice %167 {offsets = [0, 0], sizes = [16, 8], strides = [1, 1]} : vector<16x128xf32> to vector<16x8xf32>
      %169 = tpu.reciprocal %168 {approx = true} : vector<16x8xf32> -> vector<16x8xf32>
      %c0_95 = arith.constant 0 : index
      %c8_96 = arith.constant 8 : index
      %170 = vector.load %arg10[%c0_95, %c8_96] : memref<16x32xf32, #tpu.memory_space<vmem>>, vector<16x8xf32>
      %171 = arith.mulf %170, %169 : vector<16x8xf32>
      %172 = arith.truncf %171 : vector<16x8xf32> to vector<16x8xbf16>
      %c0_97 = arith.constant 0 : index
      %c0_98 = arith.constant 0 : index
      %c8_99 = arith.constant 8 : index
      %173 = vector.load %arg7[%c0_97, %c0_98, %c8_99] : memref<1x16x32xbf16, #tpu.memory_space<vmem>>, vector<1x16x8xbf16>
      %174 = vector.shape_cast %173 : vector<1x16x8xbf16> to vector<16x8xbf16>
      %175 = vector.shape_cast %172 : vector<16x8xbf16> to vector<1x16x8xbf16>
      tpu.vector_store %arg7[%c0_97, %c0_98, %c8_99], %175 {strides = array<i32>} : memref<1x16x32xbf16, #tpu.memory_space<vmem>>, vector<1x16x8xbf16>,
      %c2_100 = arith.constant 2 : index
      %c0_101 = arith.constant 0 : index
      %c0_102 = arith.constant 0 : index
      %176 = vector.load %arg9[%c2_100, %c0_101, %c0_102] : memref<4x16x128xf32, #tpu.memory_space<vmem>>, vector<1x16x128xf32>
      %177 = vector.shape_cast %176 : vector<1x16x128xf32> to vector<16x128xf32>
      %178 = vector.extract_strided_slice %177 {offsets = [0, 0], sizes = [16, 8], strides = [1, 1]} : vector<16x128xf32> to vector<16x8xf32>
      %179 = tpu.reciprocal %178 {approx = true} : vector<16x8xf32> -> vector<16x8xf32>
      %c0_103 = arith.constant 0 : index
      %c16_104 = arith.constant 16 : index
      %180 = vector.load %arg10[%c0_103, %c16_104] : memref<16x32xf32, #tpu.memory_space<vmem>>, vector<16x8xf32>
      %181 = arith.mulf %180, %179 : vector<16x8xf32>
      %182 = arith.truncf %181 : vector<16x8xf32> to vector<16x8xbf16>
      %c0_105 = arith.constant 0 : index
      %c0_106 = arith.constant 0 : index
      %c16_107 = arith.constant 16 : index
      %183 = vector.load %arg7[%c0_105, %c0_106, %c16_107] : memref<1x16x32xbf16, #tpu.memory_space<vmem>>, vector<1x16x8xbf16>
      %184 = vector.shape_cast %183 : vector<1x16x8xbf16> to vector<16x8xbf16>
      %185 = vector.shape_cast %182 : vector<16x8xbf16> to vector<1x16x8xbf16>
      tpu.vector_store %arg7[%c0_105, %c0_106, %c16_107], %185 {strides = array<i32>} : memref<1x16x32xbf16, #tpu.memory_space<vmem>>, vector<1x16x8xbf16>,
      %c3_108 = arith.constant 3 : index
      %c0_109 = arith.constant 0 : index
      %c0_110 = arith.constant 0 : index
      %186 = vector.load %arg9[%c3_108, %c0_109, %c0_110] : memref<4x16x128xf32, #tpu.memory_space<vmem>>, vector<1x16x128xf32>
      %187 = vector.shape_cast %186 : vector<1x16x128xf32> to vector<16x128xf32>
      %188 = vector.extract_strided_slice %187 {offsets = [0, 0], sizes = [16, 8], strides = [1, 1]} : vector<16x128xf32> to vector<16x8xf32>
      %189 = tpu.reciprocal %188 {approx = true} : vector<16x8xf32> -> vector<16x8xf32>
      %c0_111 = arith.constant 0 : index
      %c24_112 = arith.constant 24 : index
      %190 = vector.load %arg10[%c0_111, %c24_112] : memref<16x32xf32, #tpu.memory_space<vmem>>, vector<16x8xf32>
      %191 = arith.mulf %190, %189 : vector<16x8xf32>
      %192 = arith.truncf %191 : vector<16x8xf32> to vector<16x8xbf16>
      %c0_113 = arith.constant 0 : index
      %c0_114 = arith.constant 0 : index
      %c24_115 = arith.constant 24 : index
      %193 = vector.load %arg7[%c0_113, %c0_114, %c24_115] : memref<1x16x32xbf16, #tpu.memory_space<vmem>>, vector<1x16x8xbf16>
      %194 = vector.shape_cast %193 : vector<1x16x8xbf16> to vector<16x8xbf16>
      %195 = vector.shape_cast %192 : vector<16x8xbf16> to vector<1x16x8xbf16>
      tpu.vector_store %arg7[%c0_113, %c0_114, %c24_115], %195 {strides = array<i32>} : memref<1x16x32xbf16, #tpu.memory_space<vmem>>, vector<1x16x8xbf16>,
    } else {
    }
    return
  }
  func.func @transform_0(%arg0: i32, %arg1: i32, %arg2: i32, %arg3: i32) -> (i32, i32, i32) {
    %c0_i32 = arith.constant 0 : i32
    return %arg0, %arg2, %arg1 : i32, i32, i32
  }
  func.func @transform_1(%arg0: i32, %arg1: i32, %arg2: i32, %arg3: i32) -> (i32, i32, i32) {
    %c0_i32 = arith.constant 0 : i32
    return %arg0, %arg3, %arg1 : i32, i32, i32
  }
  func.func @transform_2(%arg0: i32, %arg1: i32, %arg2: i32, %arg3: i32) -> (i32, i32, i32) {
    %c0_i32 = arith.constant 0 : i32
    return %arg0, %arg3, %arg1 : i32, i32, i32
  }
  func.func @transform_3(%arg0: i32, %arg1: i32, %arg2: i32, %arg3: i32) -> (i32, i32, i32) {
    %c0_i32 = arith.constant 0 : i32
    return %arg0, %arg2, %arg1 : i32, i32, i32
  }
}

module attributes {stable_mosaic.version = 11 : i64} {
  func.func @proj_mlp_kernel(%arg0: i32, %arg1: i32, %arg2: memref<1x16x32xf32, #tpu.memory_space<vmem>>, %arg3: memref<1x16x32xbf16, #tpu.memory_space<vmem>>, %arg4: memref<32x32xbf16, #tpu.memory_space<vmem>>, %arg5: memref<1x32xf32, #tpu.memory_space<vmem>>, %arg6: memref<1x32xf32, #tpu.memory_space<vmem>>, %arg7: memref<1x32xf32, #tpu.memory_space<vmem>>, %arg8: memref<32x128xbf16, #tpu.memory_space<vmem>>, %arg9: memref<1x128xf32, #tpu.memory_space<vmem>>, %arg10: memref<128x32xbf16, #tpu.memory_space<vmem>>, %arg11: memref<1x32xf32, #tpu.memory_space<vmem>>, %arg12: memref<1x32xf32, #tpu.memory_space<vmem>>, %arg13: memref<1x32xf32, #tpu.memory_space<vmem>>, %arg14: memref<1x16x32xf32, #tpu.memory_space<vmem>>) attributes {dimension_semantics = [#tpu.dimension_semantics<parallel>, #tpu.dimension_semantics<parallel>], iteration_bounds = array<i64: 2, 1>, scalar_prefetch = 0 : i64, scratch_operands = 0 : i64, tpu.core_type = #tpu.core_type<tc>, window_params = [{transform_indices = @transform_0, window_bounds = array<i64: 1, 16, 32>}, {transform_indices = @transform_1, window_bounds = array<i64: 1, 16, 32>}, {pipeline_mode = #tpu.pipeline_mode<synchronous>, transform_indices = @transform_2, window_bounds = array<i64: 32, 32>}, {pipeline_mode = #tpu.pipeline_mode<synchronous>, transform_indices = @transform_3, window_bounds = array<i64: 1, 32>}, {pipeline_mode = #tpu.pipeline_mode<synchronous>, transform_indices = @transform_4, window_bounds = array<i64: 1, 32>}, {pipeline_mode = #tpu.pipeline_mode<synchronous>, transform_indices = @transform_5, window_bounds = array<i64: 1, 32>}, {pipeline_mode = #tpu.pipeline_mode<synchronous>, transform_indices = @transform_6, window_bounds = array<i64: 32, 128>}, {pipeline_mode = #tpu.pipeline_mode<synchronous>, transform_indices = @transform_7, window_bounds = array<i64: 1, 128>}, {pipeline_mode = #tpu.pipeline_mode<synchronous>, transform_indices = @transform_8, window_bounds = array<i64: 128, 32>}, {pipeline_mode = #tpu.pipeline_mode<synchronous>, transform_indices = @transform_9, window_bounds = array<i64: 1, 32>}, {pipeline_mode = #tpu.pipeline_mode<synchronous>, transform_indices = @transform_10, window_bounds = array<i64: 1, 32>}, {pipeline_mode = #tpu.pipeline_mode<synchronous>, transform_indices = @transform_11, window_bounds = array<i64: 1, 32>}, {transform_indices = @transform_12, window_bounds = array<i64: 1, 16, 32>}]} {
    %c0 = arith.constant 0 : index
    %c0_0 = arith.constant 0 : index
    %c0_1 = arith.constant 0 : index
    %0 = vector.load %arg2[%c0, %c0_0, %c0_1] : memref<1x16x32xf32, #tpu.memory_space<vmem>>, vector<1x16x32xf32>
    %1 = vector.shape_cast %0 : vector<1x16x32xf32> to vector<16x32xf32>
    %c0_2 = arith.constant 0 : index
    %c0_3 = arith.constant 0 : index
    %c0_4 = arith.constant 0 : index
    %2 = vector.load %arg3[%c0_2, %c0_3, %c0_4] : memref<1x16x32xbf16, #tpu.memory_space<vmem>>, vector<1x16x32xbf16>
    %3 = vector.shape_cast %2 : vector<1x16x32xbf16> to vector<16x32xbf16>
    %c0_5 = arith.constant 0 : index
    %c0_6 = arith.constant 0 : index
    %4 = vector.load %arg4[%c0_5, %c0_6] : memref<32x32xbf16, #tpu.memory_space<vmem>>, vector<32x32xbf16>
    %cst = arith.constant dense<0.000000e+00> : vector<16x32xf32>
    %5 = tpu.matmul %3, %4, %cst {dimension_numbers = #tpu.dot_dimension_numbers<[1], [0], [0], [1], [0, 0, 1, 1], [], []>} : vector<16x32xbf16>, vector<32x32xbf16>, vector<16x32xf32> -> vector<16x32xf32>
    %6 = arith.addf %1, %5 : vector<16x32xf32>
    %c0_7 = arith.constant 0 : index
    %c0_8 = arith.constant 0 : index
    %7 = vector.load %arg5[%c0_7, %c0_8] : memref<1x32xf32, #tpu.memory_space<vmem>>, vector<1x32xf32>
    %8 = vector.broadcast %7 : vector<1x32xf32> to vector<16x32xf32>
    %9 = arith.addf %6, %8 : vector<16x32xf32>
    %c0_9 = arith.constant 0 : index
    %c0_10 = arith.constant 0 : index
    %10 = vector.load %arg6[%c0_9, %c0_10] : memref<1x32xf32, #tpu.memory_space<vmem>>, vector<1x32xf32>
    %c0_11 = arith.constant 0 : index
    %c0_12 = arith.constant 0 : index
    %11 = vector.load %arg7[%c0_11, %c0_12] : memref<1x32xf32, #tpu.memory_space<vmem>>, vector<1x32xf32>
    %cst_13 = arith.constant dense<0.000000e+00> : vector<16xf32>
    %12 = vector.multi_reduction <add>, %9, %cst_13 [1] : vector<16x32xf32> to vector<16xf32>
    %13 = vector.shape_cast %12 : vector<16xf32> to vector<16x1xf32>
    %cst_14 = arith.constant 3.200000e+01 : f32
    %14 = vector.broadcast %cst_14 : f32 to vector<16x1xf32>
    %15 = arith.divf %13, %14 : vector<16x1xf32>
    %16 = arith.mulf %9, %9 : vector<16x32xf32>
    %cst_15 = arith.constant dense<0.000000e+00> : vector<16xf32>
    %17 = vector.multi_reduction <add>, %16, %cst_15 [1] : vector<16x32xf32> to vector<16xf32>
    %18 = vector.shape_cast %17 : vector<16xf32> to vector<16x1xf32>
    %cst_16 = arith.constant 3.200000e+01 : f32
    %19 = vector.broadcast %cst_16 : f32 to vector<16x1xf32>
    %20 = arith.divf %18, %19 : vector<16x1xf32>
    %21 = arith.mulf %15, %15 : vector<16x1xf32>
    %22 = arith.subf %20, %21 : vector<16x1xf32>
    %cst_17 = arith.constant 0.000000e+00 : f32
    %23 = vector.broadcast %cst_17 : f32 to vector<16x1xf32>
    %24 = arith.maximumf %22, %23 : vector<16x1xf32>
    %25 = vector.broadcast %15 : vector<16x1xf32> to vector<16x32xf32>
    %26 = arith.subf %9, %25 : vector<16x32xf32>
    %cst_18 = arith.constant 9.99999974E-6 : f32
    %27 = vector.broadcast %cst_18 : f32 to vector<16x1xf32>
    %28 = arith.addf %24, %27 : vector<16x1xf32>
    %29 = math.rsqrt %28 : vector<16x1xf32>
    %30 = vector.broadcast %29 : vector<16x1xf32> to vector<16x32xf32>
    %31 = arith.mulf %26, %30 : vector<16x32xf32>
    %32 = vector.broadcast %10 : vector<1x32xf32> to vector<16x32xf32>
    %33 = arith.mulf %31, %32 : vector<16x32xf32>
    %34 = vector.broadcast %11 : vector<1x32xf32> to vector<16x32xf32>
    %35 = arith.addf %33, %34 : vector<16x32xf32>
    %36 = arith.truncf %35 : vector<16x32xf32> to vector<16x32xbf16>
    %c0_19 = arith.constant 0 : index
    %c0_20 = arith.constant 0 : index
    %37 = vector.load %arg8[%c0_19, %c0_20] : memref<32x128xbf16, #tpu.memory_space<vmem>>, vector<32x128xbf16>
    %cst_21 = arith.constant dense<0.000000e+00> : vector<16x128xf32>
    %38 = tpu.matmul %36, %37, %cst_21 {dimension_numbers = #tpu.dot_dimension_numbers<[1], [0], [0], [1], [0, 0, 1, 1], [], []>} : vector<16x32xbf16>, vector<32x128xbf16>, vector<16x128xf32> -> vector<16x128xf32>
    %c0_22 = arith.constant 0 : index
    %c0_23 = arith.constant 0 : index
    %39 = vector.load %arg9[%c0_22, %c0_23] : memref<1x128xf32, #tpu.memory_space<vmem>>, vector<1x128xf32>
    %40 = vector.broadcast %39 : vector<1x128xf32> to vector<16x128xf32>
    %41 = arith.addf %38, %40 : vector<16x128xf32>
    %42 = arith.mulf %41, %41 : vector<16x128xf32>
    %43 = arith.mulf %41, %42 : vector<16x128xf32>
    %cst_24 = arith.constant 4.471500e-02 : f32
    %44 = vector.broadcast %cst_24 : f32 to vector<16x128xf32>
    %45 = arith.mulf %44, %43 : vector<16x128xf32>
    %46 = arith.addf %41, %45 : vector<16x128xf32>
    %cst_25 = arith.constant 0.797884583 : f32
    %47 = vector.broadcast %cst_25 : f32 to vector<16x128xf32>
    %48 = arith.mulf %47, %46 : vector<16x128xf32>
    %49 = math.tanh %48 : vector<16x128xf32>
    %cst_26 = arith.constant 1.000000e+00 : f32
    %50 = vector.broadcast %cst_26 : f32 to vector<16x128xf32>
    %51 = arith.addf %50, %49 : vector<16x128xf32>
    %cst_27 = arith.constant 5.000000e-01 : f32
    %52 = vector.broadcast %cst_27 : f32 to vector<16x128xf32>
    %53 = arith.mulf %52, %51 : vector<16x128xf32>
    %54 = arith.mulf %41, %53 : vector<16x128xf32>
    %55 = arith.truncf %54 : vector<16x128xf32> to vector<16x128xbf16>
    %c0_28 = arith.constant 0 : index
    %c0_29 = arith.constant 0 : index
    %56 = vector.load %arg10[%c0_28, %c0_29] : memref<128x32xbf16, #tpu.memory_space<vmem>>, vector<128x32xbf16>
    %cst_30 = arith.constant dense<0.000000e+00> : vector<16x32xf32>
    %57 = tpu.matmul %55, %56, %cst_30 {dimension_numbers = #tpu.dot_dimension_numbers<[1], [0], [0], [1], [0, 0, 1, 1], [], []>} : vector<16x128xbf16>, vector<128x32xbf16>, vector<16x32xf32> -> vector<16x32xf32>
    %c0_31 = arith.constant 0 : index
    %c0_32 = arith.constant 0 : index
    %58 = vector.load %arg11[%c0_31, %c0_32] : memref<1x32xf32, #tpu.memory_space<vmem>>, vector<1x32xf32>
    %59 = vector.broadcast %58 : vector<1x32xf32> to vector<16x32xf32>
    %60 = arith.addf %57, %59 : vector<16x32xf32>
    %61 = arith.addf %9, %60 : vector<16x32xf32>
    %c0_33 = arith.constant 0 : index
    %c0_34 = arith.constant 0 : index
    %c0_35 = arith.constant 0 : index
    %62 = vector.load %arg14[%c0_33, %c0_34, %c0_35] : memref<1x16x32xf32, #tpu.memory_space<vmem>>, vector<1x16x32xf32>
    %63 = vector.shape_cast %62 : vector<1x16x32xf32> to vector<16x32xf32>
    %64 = vector.shape_cast %61 : vector<16x32xf32> to vector<1x16x32xf32>
    tpu.vector_store %arg14[%c0_33, %c0_34, %c0_35], %64 {strides = array<i32>} : memref<1x16x32xf32, #tpu.memory_space<vmem>>, vector<1x16x32xf32>,
    return
  }
  func.func @transform_0(%arg0: i32, %arg1: i32) -> (i32, i32, i32) {
    %c0_i32 = arith.constant 0 : i32
    %c0_i32_0 = arith.constant 0 : i32
    return %arg0, %arg1, %c0_i32 : i32, i32, i32
  }
  func.func @transform_1(%arg0: i32, %arg1: i32) -> (i32, i32, i32) {
    %c0_i32 = arith.constant 0 : i32
    %c0_i32_0 = arith.constant 0 : i32
    return %arg0, %arg1, %c0_i32 : i32, i32, i32
  }
  func.func @transform_2(%arg0: i32, %arg1: i32) -> (i32, i32) {
    %c0_i32 = arith.constant 0 : i32
    %c0_i32_0 = arith.constant 0 : i32
    %c0_i32_1 = arith.constant 0 : i32
    return %c0_i32, %c0_i32_0 : i32, i32
  }
  func.func @transform_3(%arg0: i32, %arg1: i32) -> (i32, i32) {
    %c0_i32 = arith.constant 0 : i32
    %c0_i32_0 = arith.constant 0 : i32
    %c0_i32_1 = arith.constant 0 : i32
    return %c0_i32, %c0_i32_0 : i32, i32
  }
  func.func @transform_4(%arg0: i32, %arg1: i32) -> (i32, i32) {
    %c0_i32 = arith.constant 0 : i32
    %c0_i32_0 = arith.constant 0 : i32
    %c0_i32_1 = arith.constant 0 : i32
    return %c0_i32, %c0_i32_0 : i32, i32
  }
  func.func @transform_5(%arg0: i32, %arg1: i32) -> (i32, i32) {
    %c0_i32 = arith.constant 0 : i32
    %c0_i32_0 = arith.constant 0 : i32
    %c0_i32_1 = arith.constant 0 : i32
    return %c0_i32, %c0_i32_0 : i32, i32
  }
  func.func @transform_6(%arg0: i32, %arg1: i32) -> (i32, i32) {
    %c0_i32 = arith.constant 0 : i32
    %c0_i32_0 = arith.constant 0 : i32
    %c0_i32_1 = arith.constant 0 : i32
    return %c0_i32, %c0_i32_0 : i32, i32
  }
  func.func @transform_7(%arg0: i32, %arg1: i32) -> (i32, i32) {
    %c0_i32 = arith.constant 0 : i32
    %c0_i32_0 = arith.constant 0 : i32
    %c0_i32_1 = arith.constant 0 : i32
    return %c0_i32, %c0_i32_0 : i32, i32
  }
  func.func @transform_8(%arg0: i32, %arg1: i32) -> (i32, i32) {
    %c0_i32 = arith.constant 0 : i32
    %c0_i32_0 = arith.constant 0 : i32
    %c0_i32_1 = arith.constant 0 : i32
    return %c0_i32, %c0_i32_0 : i32, i32
  }
  func.func @transform_9(%arg0: i32, %arg1: i32) -> (i32, i32) {
    %c0_i32 = arith.constant 0 : i32
    %c0_i32_0 = arith.constant 0 : i32
    %c0_i32_1 = arith.constant 0 : i32
    return %c0_i32, %c0_i32_0 : i32, i32
  }
  func.func @transform_10(%arg0: i32, %arg1: i32) -> (i32, i32) {
    %c0_i32 = arith.constant 0 : i32
    %c0_i32_0 = arith.constant 0 : i32
    %c0_i32_1 = arith.constant 0 : i32
    return %c0_i32, %c0_i32_0 : i32, i32
  }
  func.func @transform_11(%arg0: i32, %arg1: i32) -> (i32, i32) {
    %c0_i32 = arith.constant 0 : i32
    %c0_i32_0 = arith.constant 0 : i32
    %c0_i32_1 = arith.constant 0 : i32
    return %c0_i32, %c0_i32_0 : i32, i32
  }
  func.func @transform_12(%arg0: i32, %arg1: i32) -> (i32, i32, i32) {
    %c0_i32 = arith.constant 0 : i32
    %c0_i32_0 = arith.constant 0 : i32
    return %arg0, %arg1, %c0_i32 : i32, i32, i32
  }
}

module attributes {stable_mosaic.version = 11 : i64} {
  func.func @proj_mlp_kernel(%arg0: i32, %arg1: i32, %arg2: memref<1x16x32xf32, #tpu.memory_space<vmem>>, %arg3: memref<1x16x32xbf16, #tpu.memory_space<vmem>>, %arg4: memref<32x32xbf16, #tpu.memory_space<vmem>>, %arg5: memref<1x32xf32, #tpu.memory_space<vmem>>, %arg6: memref<1x32xf32, #tpu.memory_space<vmem>>, %arg7: memref<1x32xf32, #tpu.memory_space<vmem>>, %arg8: memref<32x128xbf16, #tpu.memory_space<vmem>>, %arg9: memref<1x128xf32, #tpu.memory_space<vmem>>, %arg10: memref<128x32xbf16, #tpu.memory_space<vmem>>, %arg11: memref<1x32xf32, #tpu.memory_space<vmem>>, %arg12: memref<1x32xf32, #tpu.memory_space<vmem>>, %arg13: memref<1x32xf32, #tpu.memory_space<vmem>>, %arg14: memref<1x16x32xf32, #tpu.memory_space<vmem>>) attributes {dimension_semantics = [#tpu.dimension_semantics<parallel>, #tpu.dimension_semantics<parallel>], iteration_bounds = array<i64: 2, 1>, scalar_prefetch = 0 : i64, scratch_operands = 0 : i64, tpu.core_type = #tpu.core_type<tc>, window_params = [{transform_indices = @transform_0, window_bounds = array<i64: 1, 16, 32>}, {transform_indices = @transform_1, window_bounds = array<i64: 1, 16, 32>}, {pipeline_mode = #tpu.pipeline_mode<synchronous>, transform_indices = @transform_2, window_bounds = array<i64: 32, 32>}, {pipeline_mode = #tpu.pipeline_mode<synchronous>, transform_indices = @transform_3, window_bounds = array<i64: 1, 32>}, {pipeline_mode = #tpu.pipeline_mode<synchronous>, transform_indices = @transform_4, window_bounds = array<i64: 1, 32>}, {pipeline_mode = #tpu.pipeline_mode<synchronous>, transform_indices = @transform_5, window_bounds = array<i64: 1, 32>}, {pipeline_mode = #tpu.pipeline_mode<synchronous>, transform_indices = @transform_6, window_bounds = array<i64: 32, 128>}, {pipeline_mode = #tpu.pipeline_mode<synchronous>, transform_indices = @transform_7, window_bounds = array<i64: 1, 128>}, {pipeline_mode = #tpu.pipeline_mode<synchronous>, transform_indices = @transform_8, window_bounds = array<i64: 128, 32>}, {pipeline_mode = #tpu.pipeline_mode<synchronous>, transform_indices = @transform_9, window_bounds = array<i64: 1, 32>}, {pipeline_mode = #tpu.pipeline_mode<synchronous>, transform_indices = @transform_10, window_bounds = array<i64: 1, 32>}, {pipeline_mode = #tpu.pipeline_mode<synchronous>, transform_indices = @transform_11, window_bounds = array<i64: 1, 32>}, {transform_indices = @transform_12, window_bounds = array<i64: 1, 16, 32>}]} {
    %c0 = arith.constant 0 : index
    %c0_0 = arith.constant 0 : index
    %c0_1 = arith.constant 0 : index
    %0 = vector.load %arg2[%c0, %c0_0, %c0_1] : memref<1x16x32xf32, #tpu.memory_space<vmem>>, vector<1x16x32xf32>
    %1 = vector.shape_cast %0 : vector<1x16x32xf32> to vector<16x32xf32>
    %c0_2 = arith.constant 0 : index
    %c0_3 = arith.constant 0 : index
    %c0_4 = arith.constant 0 : index
    %2 = vector.load %arg3[%c0_2, %c0_3, %c0_4] : memref<1x16x32xbf16, #tpu.memory_space<vmem>>, vector<1x16x32xbf16>
    %3 = vector.shape_cast %2 : vector<1x16x32xbf16> to vector<16x32xbf16>
    %c0_5 = arith.constant 0 : index
    %c0_6 = arith.constant 0 : index
    %4 = vector.load %arg4[%c0_5, %c0_6] : memref<32x32xbf16, #tpu.memory_space<vmem>>, vector<32x32xbf16>
    %cst = arith.constant dense<0.000000e+00> : vector<16x32xf32>
    %5 = tpu.matmul %3, %4, %cst {dimension_numbers = #tpu.dot_dimension_numbers<[1], [0], [0], [1], [0, 0, 1, 1], [], []>} : vector<16x32xbf16>, vector<32x32xbf16>, vector<16x32xf32> -> vector<16x32xf32>
    %6 = arith.addf %1, %5 : vector<16x32xf32>
    %c0_7 = arith.constant 0 : index
    %c0_8 = arith.constant 0 : index
    %7 = vector.load %arg5[%c0_7, %c0_8] : memref<1x32xf32, #tpu.memory_space<vmem>>, vector<1x32xf32>
    %8 = vector.broadcast %7 : vector<1x32xf32> to vector<16x32xf32>
    %9 = arith.addf %6, %8 : vector<16x32xf32>
    %c0_9 = arith.constant 0 : index
    %c0_10 = arith.constant 0 : index
    %10 = vector.load %arg6[%c0_9, %c0_10] : memref<1x32xf32, #tpu.memory_space<vmem>>, vector<1x32xf32>
    %c0_11 = arith.constant 0 : index
    %c0_12 = arith.constant 0 : index
    %11 = vector.load %arg7[%c0_11, %c0_12] : memref<1x32xf32, #tpu.memory_space<vmem>>, vector<1x32xf32>
    %cst_13 = arith.constant dense<0.000000e+00> : vector<16xf32>
    %12 = vector.multi_reduction <add>, %9, %cst_13 [1] : vector<16x32xf32> to vector<16xf32>
    %13 = vector.shape_cast %12 : vector<16xf32> to vector<16x1xf32>
    %cst_14 = arith.constant 3.200000e+01 : f32
    %14 = vector.broadcast %cst_14 : f32 to vector<16x1xf32>
    %15 = arith.divf %13, %14 : vector<16x1xf32>
    %16 = arith.mulf %9, %9 : vector<16x32xf32>
    %cst_15 = arith.constant dense<0.000000e+00> : vector<16xf32>
    %17 = vector.multi_reduction <add>, %16, %cst_15 [1] : vector<16x32xf32> to vector<16xf32>
    %18 = vector.shape_cast %17 : vector<16xf32> to vector<16x1xf32>
    %cst_16 = arith.constant 3.200000e+01 : f32
    %19 = vector.broadcast %cst_16 : f32 to vector<16x1xf32>
    %20 = arith.divf %18, %19 : vector<16x1xf32>
    %21 = arith.mulf %15, %15 : vector<16x1xf32>
    %22 = arith.subf %20, %21 : vector<16x1xf32>
    %cst_17 = arith.constant 0.000000e+00 : f32
    %23 = vector.broadcast %cst_17 : f32 to vector<16x1xf32>
    %24 = arith.maximumf %22, %23 : vector<16x1xf32>
    %25 = vector.broadcast %15 : vector<16x1xf32> to vector<16x32xf32>
    %26 = arith.subf %9, %25 : vector<16x32xf32>
    %cst_18 = arith.constant 9.99999974E-6 : f32
    %27 = vector.broadcast %cst_18 : f32 to vector<16x1xf32>
    %28 = arith.addf %24, %27 : vector<16x1xf32>
    %29 = math.rsqrt %28 : vector<16x1xf32>
    %30 = vector.broadcast %29 : vector<16x1xf32> to vector<16x32xf32>
    %31 = arith.mulf %26, %30 : vector<16x32xf32>
    %32 = vector.broadcast %10 : vector<1x32xf32> to vector<16x32xf32>
    %33 = arith.mulf %31, %32 : vector<16x32xf32>
    %34 = vector.broadcast %11 : vector<1x32xf32> to vector<16x32xf32>
    %35 = arith.addf %33, %34 : vector<16x32xf32>
    %36 = arith.truncf %35 : vector<16x32xf32> to vector<16x32xbf16>
    %c0_19 = arith.constant 0 : index
    %c0_20 = arith.constant 0 : index
    %37 = vector.load %arg8[%c0_19, %c0_20] : memref<32x128xbf16, #tpu.memory_space<vmem>>, vector<32x128xbf16>
    %cst_21 = arith.constant dense<0.000000e+00> : vector<16x128xf32>
    %38 = tpu.matmul %36, %37, %cst_21 {dimension_numbers = #tpu.dot_dimension_numbers<[1], [0], [0], [1], [0, 0, 1, 1], [], []>} : vector<16x32xbf16>, vector<32x128xbf16>, vector<16x128xf32> -> vector<16x128xf32>
    %c0_22 = arith.constant 0 : index
    %c0_23 = arith.constant 0 : index
    %39 = vector.load %arg9[%c0_22, %c0_23] : memref<1x128xf32, #tpu.memory_space<vmem>>, vector<1x128xf32>
    %40 = vector.broadcast %39 : vector<1x128xf32> to vector<16x128xf32>
    %41 = arith.addf %38, %40 : vector<16x128xf32>
    %42 = arith.mulf %41, %41 : vector<16x128xf32>
    %43 = arith.mulf %41, %42 : vector<16x128xf32>
    %cst_24 = arith.constant 4.471500e-02 : f32
    %44 = vector.broadcast %cst_24 : f32 to vector<16x128xf32>
    %45 = arith.mulf %44, %43 : vector<16x128xf32>
    %46 = arith.addf %41, %45 : vector<16x128xf32>
    %cst_25 = arith.constant 0.797884583 : f32
    %47 = vector.broadcast %cst_25 : f32 to vector<16x128xf32>
    %48 = arith.mulf %47, %46 : vector<16x128xf32>
    %49 = math.tanh %48 : vector<16x128xf32>
    %cst_26 = arith.constant 1.000000e+00 : f32
    %50 = vector.broadcast %cst_26 : f32 to vector<16x128xf32>
    %51 = arith.addf %50, %49 : vector<16x128xf32>
    %cst_27 = arith.constant 5.000000e-01 : f32
    %52 = vector.broadcast %cst_27 : f32 to vector<16x128xf32>
    %53 = arith.mulf %52, %51 : vector<16x128xf32>
    %54 = arith.mulf %41, %53 : vector<16x128xf32>
    %55 = arith.truncf %54 : vector<16x128xf32> to vector<16x128xbf16>
    %c0_28 = arith.constant 0 : index
    %c0_29 = arith.constant 0 : index
    %56 = vector.load %arg10[%c0_28, %c0_29] : memref<128x32xbf16, #tpu.memory_space<vmem>>, vector<128x32xbf16>
    %cst_30 = arith.constant dense<0.000000e+00> : vector<16x32xf32>
    %57 = tpu.matmul %55, %56, %cst_30 {dimension_numbers = #tpu.dot_dimension_numbers<[1], [0], [0], [1], [0, 0, 1, 1], [], []>} : vector<16x128xbf16>, vector<128x32xbf16>, vector<16x32xf32> -> vector<16x32xf32>
    %c0_31 = arith.constant 0 : index
    %c0_32 = arith.constant 0 : index
    %58 = vector.load %arg11[%c0_31, %c0_32] : memref<1x32xf32, #tpu.memory_space<vmem>>, vector<1x32xf32>
    %59 = vector.broadcast %58 : vector<1x32xf32> to vector<16x32xf32>
    %60 = arith.addf %57, %59 : vector<16x32xf32>
    %61 = arith.addf %9, %60 : vector<16x32xf32>
    %c0_33 = arith.constant 0 : index
    %c0_34 = arith.constant 0 : index
    %62 = vector.load %arg12[%c0_33, %c0_34] : memref<1x32xf32, #tpu.memory_space<vmem>>, vector<1x32xf32>
    %c0_35 = arith.constant 0 : index
    %c0_36 = arith.constant 0 : index
    %63 = vector.load %arg13[%c0_35, %c0_36] : memref<1x32xf32, #tpu.memory_space<vmem>>, vector<1x32xf32>
    %cst_37 = arith.constant dense<0.000000e+00> : vector<16xf32>
    %64 = vector.multi_reduction <add>, %61, %cst_37 [1] : vector<16x32xf32> to vector<16xf32>
    %65 = vector.shape_cast %64 : vector<16xf32> to vector<16x1xf32>
    %cst_38 = arith.constant 3.200000e+01 : f32
    %66 = vector.broadcast %cst_38 : f32 to vector<16x1xf32>
    %67 = arith.divf %65, %66 : vector<16x1xf32>
    %68 = arith.mulf %61, %61 : vector<16x32xf32>
    %cst_39 = arith.constant dense<0.000000e+00> : vector<16xf32>
    %69 = vector.multi_reduction <add>, %68, %cst_39 [1] : vector<16x32xf32> to vector<16xf32>
    %70 = vector.shape_cast %69 : vector<16xf32> to vector<16x1xf32>
    %cst_40 = arith.constant 3.200000e+01 : f32
    %71 = vector.broadcast %cst_40 : f32 to vector<16x1xf32>
    %72 = arith.divf %70, %71 : vector<16x1xf32>
    %73 = arith.mulf %67, %67 : vector<16x1xf32>
    %74 = arith.subf %72, %73 : vector<16x1xf32>
    %cst_41 = arith.constant 0.000000e+00 : f32
    %75 = vector.broadcast %cst_41 : f32 to vector<16x1xf32>
    %76 = arith.maximumf %74, %75 : vector<16x1xf32>
    %77 = vector.broadcast %67 : vector<16x1xf32> to vector<16x32xf32>
    %78 = arith.subf %61, %77 : vector<16x32xf32>
    %cst_42 = arith.constant 9.99999997E-7 : f32
    %79 = vector.broadcast %cst_42 : f32 to vector<16x1xf32>
    %80 = arith.addf %76, %79 : vector<16x1xf32>
    %81 = math.rsqrt %80 : vector<16x1xf32>
    %82 = vector.broadcast %81 : vector<16x1xf32> to vector<16x32xf32>
    %83 = arith.mulf %78, %82 : vector<16x32xf32>
    %84 = vector.broadcast %62 : vector<1x32xf32> to vector<16x32xf32>
    %85 = arith.mulf %83, %84 : vector<16x32xf32>
    %86 = vector.broadcast %63 : vector<1x32xf32> to vector<16x32xf32>
    %87 = arith.addf %85, %86 : vector<16x32xf32>
    %c0_43 = arith.constant 0 : index
    %c0_44 = arith.constant 0 : index
    %c0_45 = arith.constant 0 : index
    %88 = vector.load %arg14[%c0_43, %c0_44, %c0_45] : memref<1x16x32xf32, #tpu.memory_space<vmem>>, vector<1x16x32xf32>
    %89 = vector.shape_cast %88 : vector<1x16x32xf32> to vector<16x32xf32>
    %90 = vector.shape_cast %87 : vector<16x32xf32> to vector<1x16x32xf32>
    tpu.vector_store %arg14[%c0_43, %c0_44, %c0_45], %90 {strides = array<i32>} : memref<1x16x32xf32, #tpu.memory_space<vmem>>, vector<1x16x32xf32>,
    return
  }
  func.func @transform_0(%arg0: i32, %arg1: i32) -> (i32, i32, i32) {
    %c0_i32 = arith.constant 0 : i32
    %c0_i32_0 = arith.constant 0 : i32
    return %arg0, %arg1, %c0_i32 : i32, i32, i32
  }
  func.func @transform_1(%arg0: i32, %arg1: i32) -> (i32, i32, i32) {
    %c0_i32 = arith.constant 0 : i32
    %c0_i32_0 = arith.constant 0 : i32
    return %arg0, %arg1, %c0_i32 : i32, i32, i32
  }
  func.func @transform_2(%arg0: i32, %arg1: i32) -> (i32, i32) {
    %c0_i32 = arith.constant 0 : i32
    %c0_i32_0 = arith.constant 0 : i32
    %c0_i32_1 = arith.constant 0 : i32
    return %c0_i32, %c0_i32_0 : i32, i32
  }
  func.func @transform_3(%arg0: i32, %arg1: i32) -> (i32, i32) {
    %c0_i32 = arith.constant 0 : i32
    %c0_i32_0 = arith.constant 0 : i32
    %c0_i32_1 = arith.constant 0 : i32
    return %c0_i32, %c0_i32_0 : i32, i32
  }
  func.func @transform_4(%arg0: i32, %arg1: i32) -> (i32, i32) {
    %c0_i32 = arith.constant 0 : i32
    %c0_i32_0 = arith.constant 0 : i32
    %c0_i32_1 = arith.constant 0 : i32
    return %c0_i32, %c0_i32_0 : i32, i32
  }
  func.func @transform_5(%arg0: i32, %arg1: i32) -> (i32, i32) {
    %c0_i32 = arith.constant 0 : i32
    %c0_i32_0 = arith.constant 0 : i32
    %c0_i32_1 = arith.constant 0 : i32
    return %c0_i32, %c0_i32_0 : i32, i32
  }
  func.func @transform_6(%arg0: i32, %arg1: i32) -> (i32, i32) {
    %c0_i32 = arith.constant 0 : i32
    %c0_i32_0 = arith.constant 0 : i32
    %c0_i32_1 = arith.constant 0 : i32
    return %c0_i32, %c0_i32_0 : i32, i32
  }
  func.func @transform_7(%arg0: i32, %arg1: i32) -> (i32, i32) {
    %c0_i32 = arith.constant 0 : i32
    %c0_i32_0 = arith.constant 0 : i32
    %c0_i32_1 = arith.constant 0 : i32
    return %c0_i32, %c0_i32_0 : i32, i32
  }
  func.func @transform_8(%arg0: i32, %arg1: i32) -> (i32, i32) {
    %c0_i32 = arith.constant 0 : i32
    %c0_i32_0 = arith.constant 0 : i32
    %c0_i32_1 = arith.constant 0 : i32
    return %c0_i32, %c0_i32_0 : i32, i32
  }
  func.func @transform_9(%arg0: i32, %arg1: i32) -> (i32, i32) {
    %c0_i32 = arith.constant 0 : i32
    %c0_i32_0 = arith.constant 0 : i32
    %c0_i32_1 = arith.constant 0 : i32
    return %c0_i32, %c0_i32_0 : i32, i32
  }
  func.func @transform_10(%arg0: i32, %arg1: i32) -> (i32, i32) {
    %c0_i32 = arith.constant 0 : i32
    %c0_i32_0 = arith.constant 0 : i32
    %c0_i32_1 = arith.constant 0 : i32
    return %c0_i32, %c0_i32_0 : i32, i32
  }
  func.func @transform_11(%arg0: i32, %arg1: i32) -> (i32, i32) {
    %c0_i32 = arith.constant 0 : i32
    %c0_i32_0 = arith.constant 0 : i32
    %c0_i32_1 = arith.constant 0 : i32
    return %c0_i32, %c0_i32_0 : i32, i32
  }
  func.func @transform_12(%arg0: i32, %arg1: i32) -> (i32, i32, i32) {
    %c0_i32 = arith.constant 0 : i32
    %c0_i32_0 = arith.constant 0 : i32
    return %arg0, %arg1, %c0_i32 : i32, i32, i32
  }
}

</mosaic_0001>

<bundles_post_ra>
// kernel: tpu_custom_call.1
= control target key start
LH: loop header
LB: loop body
LE: loop exit
PB: predicated region body
PF: predicated region fallthrough
CT: control target
= control target key end

     0   :  { %s829_s0 = inlined_call_operand.hbm [shape: f32[16,256], index: 0, kind: input, shape index: {}]   ;;  %s830_s1 = inlined_call_operand.hbm [shape: f32[8,128], index: 1, kind: input, shape index: {}]   ;;  %s831_s2 = inlined_call_operand.hbm [shape: f32[16,256], index: 2, kind: output, shape index: {}]  }
   0x1   :  { %838 = sst [smem:[#allocation13_spill]] %s830_s1 }
   0x2   :  { %7 = vsyncpa [#allocation3], 0 }
   0x3   :  { %9 = vsyncpa [#allocation3 + $0x1], 0 }
   0x4   :  { %10 = vsyncpa [#allocation6], 0 }
   0x5   :  { %11 = vsyncpa [#allocation4], 0 }
   0x6   :  { %13 = vsyncpa [#allocation4 + $0x1], 0  ;;  %s591_s9 = smov 0   ;;  %s593_s10 = smov 0  }
   0x7   :  { %s595_s11 = smov 0   ;;  %s597_s12 = smov 0  }
   0x8   :  { %s599_s13 = smov 0   ;;  %s601_s14 = smov 0  }
   0x9   :  { %s603_s15 = smov 0   ;;  %s605_s16 = smov 0  }
   0xa LB: > { %s305_s17 = sadd.s32 4294967295, %s571_s16   ;;  %s306_s18 = sadd.s32 4294967294, %s571_s16   ;;  %s571_s16 = sphi %s605_s16, %s19_s16   ;;  %s567_s15 = sphi %s603_s15, %s864_s15   ;;  %s563_s14 = sphi %s601_s14, %s863_s14   ;;  %s559_s13 = sphi %s599_s13, %s862_s13   ;;  %s555_s12 = sphi %s597_s12, %s861_s12   ;;  %s551_s11 = sphi %s595_s11, %s860_s11   ;;  %s547_s10 = sphi %s593_s10, %s859_s10   ;;  %s543_s9 = sphi %s591_s9, %s858_s9  }
   0xb   : > { %p53_p0 = scmp.ne.s32.totalorder %s547_s10, %s543_s9  ;;  %p635_p1 = scmp.eq.s32.totalorder %s305_s17, 0 }
   0xc   : > { %p639_p2 = scmp.eq.s32.totalorder %s305_s17, 3  ;;  %p106_p3 = scmp.eq.s32.totalorder %s306_s18, 3 }
   0xd   : > { %s839_s19 = scalar_select %p635_p1, 1, 0 }
   0xe   : > { %s840_s20 = scalar_select %p639_p2, 1, 0 }
   0xf   : > { %p645_p4 = por %p635_p1, %p53_p0  ;;  %p307_p5 = scmp.ge.s32.totalorder %s571_s16, 1 }
  0x10   : > { %p650_p6 = por %p106_p3, %p53_p0  ;;  %p113_p7 = scmp.lt.s32.totalorder %s571_s16, 5 }
  0x11   : > { %s841_s21 = scalar_select %p645_p4, 1, 0 }
  0x12   : > { %s842_s22 = scalar_select %p650_p6, 1, 0 }
  0x13   : > { %p655_p8 = pnand %p307_p5, %p113_p7  ;;  %s573_s24 = smov [#allocation5]  }
  0x14   : > { %843 = sst [smem:[#allocation11_spill]] %s842_s22  ;;  %s126_s25 = sshll.u32 %s573_s24, 4  ;;  %s127_s25 = int_to_ptr.vmem [resolvable:$true] %s126_s25 }
  0x15   : > { %s844_s23 = scalar_select %p655_p8, 1, 0 }
  0x16   : > { %p330_p9 = pneg %p655_p8  ;;  %s28_s27 = sadd.s32 1, %s563_s14 }
  0x17   : > { %s846_s1 = sld [smem:[#allocation13_spill]] }
  0x18   : > { %p663_p10 = pnand %p330_p9, %p635_p1 }
  0x1a   : > { %p413_p12 = pneg %p663_p10 }
  0x1d   : > { %s411_s30 = scalar_lea.hbm %s846_s1, 128 }
  0x1e   : > { %p412_p11 = scmp.ne.s32.totalorder %s846_s1, %s411_s30  ;;  %p418_p3 = scmp.lt.u32.totalorder %s411_s30, %s846_s1 }
  0x20   : > { %p414_p13 = pnand %p413_p12, %p412_p11 }
  0x22   : > { %p415_p0 = pneg %p414_p13 }
  0x24   : > { %p420_p5 = pnand %p418_p3, %p415_p0 }
  0x26   : > { %423 = shalt.err (!%p420_p5)
}
  0x27   : > { %s424_s7 = scalar_lea.vmem %s127_s25, 128  ;;  %p432_p1 = scmp.lt.s32.totalorder %s127_s25, %s127_s25 }
  0x28   : > { %p425_p7 = scmp.ne.s32.totalorder %s127_s25, %s424_s7  ;;  %p433_p4 = scmp.lt.s32.totalorder %s424_s7, %s424_s7 }
  0x2a   : > { %p427_p9 = pnand %p425_p7, %p413_p12  ;;  %p434_p8 = por %p433_p4, %p432_p1 }
  0x2c   : > { %p428_p6 = pneg %p427_p9 }
  0x2e   : > { %p435_p2 = pnand %p434_p8, %p428_p6 }
  0x30   : > { %438 = shalt.err (!%p435_p2)
}
  0x31   : > { %333 = dma.hbm_to_vmem [thread:$0]  (!%p663_p10), %s846_s1, 128, %s127_s25, [#allocation6]  }
  0x32   : > { %p29_p1 = scmp.ge.s32.totalorder %s28_s27, 2  ;;  %s31_s18 = sadd.s32 1, %s567_s15 }
  0x33   : > { %s40_s24 = sadd.s32 1, %s551_s11  ;;  %p47_p2 = scmp.ne.s32.totalorder %s551_s11, %s547_s10 }
  0x34   : > { %s866_s27 = smov (%p29_p1, %s28_s27), 0  ;;  %s868_s18 = smov (!%p29_p1, %s31_s18), %s567_s15 }
  0x35   : > { %847 = sst [smem:[#allocation12_spill]] %s866_s27  ;;  %s36_s26 = ssub.s32 %s563_s14, %s866_s27 }
  0x36   : > { %p48_p4 = scmp.eq.s32.totalorder %s571_s16, 0  ;;  %p33_p6 = scmp.ge.s32.totalorder %s868_s18, 2 }
  0x37   : > { %p848_p8 = scmp.ne.s32.totalorder %s840_s20, 0  ;;  %p343_p12 = scmp.lt.s32.totalorder %s571_s16, 4 }
  0x38   : > { %p700_p10 = por %p48_p4, %p47_p2  ;;  %s870_s18 = smov (%p33_p6, %s868_s18), 0 }
  0x39   : > { %p696_p11 = por %p848_p8, %p47_p2  ;;  %s137_s29 = sand.u32 1, %s551_s11  }
  0x3a   : > { %s311_s30 = sshll.u32 %s567_s15, 1  ;;  %s35_s3 = ssub.s32 %s567_s15, %s870_s18 }
  0x3b   : > { %s37_s4 = sor.u32 %s36_s26, %s35_s3  ;;  %s310_s5 = sshll.u32 %s137_s29, 3 }
  0x3c   : > { %p38_p13 = scmp.eq.s32.totalorder %s37_s4, 0  ;;  %s146_s20 = sadd.s32 %s563_s14, %s311_s30 }
  0x3d   : > { %s141_s6 = scalar_lea.vmem [#allocation2], %s310_s5  ;;  %s312_s17 = sshll.u32 %s146_s20, 7 }
  0x3e   : > { %s150_s7 = sshll.u32 %s141_s6, 4  ;;  %s720_s22 = scalar_lea.hbm %s829_s0, %s312_s17  ;;  %s715_s7 = int_to_ptr.vmem [resolvable:$true] %s150_s7 }
  0x3f   : > { %s713_s8 = scalar_select %p38_p13, %s551_s11, %s40_s24  }
  0x40   : > { %p726_p0 = pnand %p343_p12, %p700_p10  ;;  %s138_s24 = scalar_lea.sflag [#allocation3], %s137_s29 }
  0x41   : > { %s439_s30 = scalar_lea.hbm %s720_s22, 128  ;;  %s444_s25 = scalar_lea.hbm %s829_s0, 512 }
  0x42   : > { %p440_p3 = scmp.ne.s32.totalorder %s720_s22, %s439_s30  ;;  %p441_p5 = pneg %p726_p0 }
  0x43   : > { %p445_p1 = scmp.lt.u32.totalorder %s720_s22, %s829_s0  ;;  %p446_p2 = scmp.lt.u32.totalorder %s444_s25, %s439_s30 }
  0x44   : > { %p442_p7 = pnand %p441_p5, %p440_p3  ;;  %p448_p6 = scmp.lt.u32.totalorder %s439_s30, %s720_s22 }
  0x45   : > { %p447_p4 = por %p446_p2, %p445_p1 }
  0x46   : > { %p443_p9 = pneg %p442_p7 }
  0x47   : > { %p449_p8 = por %p448_p6, %p447_p4 }
  0x49   : > { %p450_p10 = pnand %p449_p8, %p443_p9 }
  0x4b   : > { %453 = shalt.err (!%p450_p10)
}
  0x4c   : > { %s454_s29 = scalar_lea.vmem %s715_s7, 128  ;;  %s574_s5 = smov [#allocation2]  }
  0x4d   : > { %p455_p12 = scmp.ne.s32.totalorder %s715_s7, %s454_s29  ;;  %s459_s20 = sshll.u32 %s574_s5, 4  ;;  %s460_s20 = int_to_ptr.vmem [resolvable:$false] %s459_s20 }
  0x4e   : > { %s461_s6 = scalar_lea.vmem %s460_s20, 256  ;;  %p462_p7 = scmp.lt.s32.totalorder %s715_s7, %s460_s20 }
  0x4f   : > { %p457_p13 = pnand %p455_p12, %p441_p5  ;;  %p463_p1 = scmp.lt.s32.totalorder %s461_s6, %s454_s29 }
  0x51   : > { %p458_p3 = pneg %p457_p13  ;;  %p464_p2 = por %p463_p1, %p462_p7 }
  0x53   : > { %p465_p4 = pnand %p464_p2, %p458_p3 }
  0x55   : > { %468 = shalt.err (!%p465_p4)
}
  0x56   : > { %337 = dma.hbm_to_vmem [thread:$0]  (!%p726_p0), %s720_s22, 128, %s715_s7, %s138_s24  }
  0x57   : > { %p852_p9 = scmp.ne.s32.totalorder %s844_s23, 0 }
  0x58   : > { %s758_s17 = sand.u32 (!%p852_p9), 1, %s547_s10   ;;  %p853_p5 = scmp.ne.s32.totalorder (!%p852_p9), %s841_s21, 0 }
  0x59   : > { %159 = sbr.rel (%p852_p9) target bundleno = 126 (0x7e), region = 28  ;;  %s314_s30 = sshll.u32 (!%p852_p9), %s758_s17, 3 }
  0x5a   : > { %s162_s1 = scalar_lea.sflag (!%p852_p9), [#allocation3], %s758_s17  ;;  %s165_s27 = scalar_lea.vmem (!%p852_p9), [#allocation2], %s314_s30 }
  0x60   : > { %530 = dma.done.wait (%p853_p5), %s162_s1, 128  }
  0x61   : > { %532 = vsyncadd (%p853_p5), %s162_s1, 4294967168  ;;  %p854_p6 = scmp.ne.s32.totalorder %s839_s19, 0 }
  0x63   : > { %534 = dma.done.wait (%p854_p6), [#allocation6], 128  }
  0x64   : > { %536 = vsyncadd (%p854_p6), [#allocation6], 4294967168  ;;  %s318_s22 = sshll.u32 %s559_s13, 1  ;;  %s189_s7 = scalar_lea.vmem [#allocation7], %s314_s30  ;;  %v190_v0 = vld [vmem:[%s165_s27] sm:$0xff]  ;;  %v191_v1 = vld [vmem:[#allocation5] sm:$0xff] }
  0x65   : > { %s206_s23 = sadd.s32 %s555_s12, %s318_s22  ;;  %s210_s26 = sshll.u32 %s189_s7, 4  ;;  %v192_v2 = vadd.f32 %v191_v1, %v190_v0  ;;  %s772_s26 = int_to_ptr.vmem [resolvable:$true] %s210_s26 }
  0x66   : > { %s319_s24 = sshll.u32 %s206_s23, 7  ;;  %s195_s3 = scalar_lea.sflag [#allocation4], %s758_s17 }
  0x67   : > { %s777_s19 = scalar_lea.hbm %s831_s2, %s319_s24  ;;  %193 = vst [vmem:[%s189_s7] sm:$0xff] %v192_v2  ;;  %s469_s13 = scalar_lea.vmem %s772_s26, 128 }
  0x68   : > { %p470_p0 = scmp.ne.s32.totalorder %s772_s26, %s469_s13  ;;  %s575_s12 = smov [#allocation7]  }
  0x69   : > { %s473_s4 = sshll.u32 %s575_s12, 4  ;;  %s474_s4 = int_to_ptr.vmem [resolvable:$false] %s473_s4 }
  0x6a   : > { %p471_p8 = pnand %p470_p0, %p696_p11  ;;  %s475_s29 = scalar_lea.vmem %s474_s4, 256 }
  0x6b   : > { %p476_p12 = scmp.lt.s32.totalorder %s772_s26, %s474_s4  ;;  %p477_p13 = scmp.lt.s32.totalorder %s475_s29, %s469_s13 }
  0x6c   : > { %p472_p10 = pneg %p471_p8 }
  0x6d   : > { %p478_p3 = por %p477_p13, %p476_p12 }
  0x6f   : > { %p479_p7 = pnand %p478_p3, %p472_p10 }
  0x71   : > { %482 = shalt.err (!%p479_p7)
}
  0x72   : > { %s483_s5 = scalar_lea.hbm %s777_s19, 128  ;;  %s487_s17 = scalar_lea.hbm %s831_s2, 512 }
  0x73   : > { %p484_p1 = scmp.ne.s32.totalorder %s777_s19, %s483_s5  ;;  %p488_p9 = scmp.lt.u32.totalorder %s777_s19, %s831_s2 }
  0x74   : > { %p489_p5 = scmp.lt.u32.totalorder %s487_s17, %s483_s5  ;;  %p491_p0 = scmp.lt.u32.totalorder %s483_s5, %s777_s19 }
  0x75   : > { %p485_p2 = pnand %p484_p1, %p696_p11 }
  0x76   : > { %p490_p6 = por %p489_p5, %p488_p9 }
  0x77   : > { %p486_p4 = pneg %p485_p2 }
  0x78   : > { %p492_p8 = por %p491_p0, %p490_p6 }
  0x7a   : > { %p493_p10 = pnand %p492_p8, %p486_p4 }
  0x7c   : > { %496 = shalt.err (!%p493_p10)
}
  0x7d   : > { %328 = dma.vmem_to_hbm [thread:$0]  (%p696_p11), %s772_s26, 128, %s777_s19, %s195_s3  }
  0x7e PF: > { %s855_s27 = sld [smem:[#allocation11_spill]]  ;;  %p345_p12 = scmp.ge.s32.totalorder %s571_s16, 2 }
  0x7f   : > { %s222_s22 = sand.u32 1, %s543_s9  }
  0x80   : > { %s223_s23 = scalar_lea.sflag [#allocation4], %s222_s22 }
  0x84   : > { %p856_p13 = scmp.ne.s32.totalorder %s855_s27, 0 }
  0x86   : > { %p339_p3 = pnand %p345_p12, %p856_p13 }
  0x88   : > { %538 = dma.done.wait (!%p339_p3), %s223_s23, 128  }
  0x89   : > { %540 = vsyncadd (!%p339_p3), %s223_s23, 4294967168  ;;  %s19_s16 = sadd.s32 1, %s571_s16   ;;  %s857_s28 = sld [smem:[#allocation12_spill]] }
  0x8a   : > { %p16_p7 = scmp.ge.s32.totalorder %s19_s16, 6   ;;  %s858_s9 = smov %s547_s10 }
  0x8b   : > { %s859_s10 = smov %s551_s11  ;;  %s860_s11 = smov %s713_s8 }
  0x8c   : > { %s861_s12 = smov %s563_s14  ;;  %s862_s13 = smov %s567_s15 }
  0x8d   : > { %s864_s15 = smov %s870_s18  ;;  %18 = sbr.rel (!%p16_p7) target bundleno = 10 (0xa), region = 77 }
  0x8f   : > { %s863_s14 = smov %s857_s28 }
  0x94   :  { %228 = vsyncpa [#allocation3], 1 }
  0x95   :  { %230 = vsyncpa [#allocation3 + $0x1], 1 }
  0x96   :  { %231 = vsyncpa [#allocation6], 1 }
  0x97   :  { %232 = vsyncpa [#allocation4], 1 }
  0x98   :  { %234 = vsyncpa [#allocation4 + $0x1], 1 }

// kernel: fast3r_decoder_forward.7
= control target key start
LH: loop header
LB: loop body
LE: loop exit
PB: predicated region body
PF: predicated region fallthrough
CT: control target
= control target key end

     0   :  { %s572_s15 = smov 0   ;;  %s574_s16 = smov 0   ;;  %s620_s0 = inlined_call_operand.vmem [shape: f32[2,16,32], index: 0, kind: input, shape index: {}]   ;;  %s621_s1 = inlined_call_operand.vmem [shape: bf16[32,32], index: 1, kind: input, shape index: {}]   ;;  %s622_s2 = inlined_call_operand.vmem [shape: f32[1,32], index: 2, kind: input, shape index: {}]   ;;  %s623_s3 = inlined_call_operand.vmem [shape: bf16[2,16,32], index: 3, kind: input, shape index: {}]   ;;  %s624_s4 = inlined_call_operand.vmem [shape: f32[2,16,32], index: 4, kind: output, shape index: {}]  }
   0x1   :  { %s576_s17 = smov 0  }
   0x2 LB: > { %s26_s18 = sadd.s32 1, %s539_s16  ;;  %p462_p0 = scmp.ge.s32.totalorder %s543_s17, 1  ;;  %s543_s17 = sphi %s576_s17, %s14_s17   ;;  %s539_s16 = sphi %s574_s16, %s626_s16   ;;  %s535_s15 = sphi %s572_s15, %s625_s15  }
   0x3   : > { %p28_p1 = scmp.ge.s32.totalorder %s26_s18, 2  ;;  %p200_p2 = scmp.lt.s32.totalorder %s543_s17, 3 }
   0x5   : > { %s628_s18 = smov (%p28_p1, %s26_s18), 0  ;;  %p201_p3 = pnand %p462_p0, %p200_p2 }
   0x6   : > { %v519_v0 = vld [vmem:[%s621_s1] sm:$0xff] (!%p201_p3)   ;;  %v545_v1 = vmov (!%p201_p3), 0.0   ;;  %v520_v2 = vld [vmem:[%s621_s1 + $0x8] sm:$0xff] (!%p201_p3)   ;;  %vm546_vm0 = vmmov (!%p201_p3), 0   ;;  %p244_p4 = scmp.lt.s32.totalorder (!%p201_p3), %s535_s15, 1  ;;  %vm300_vm1 = vcmask (!%p201_p3), 261120  }
   0x7   : > { %204 = sbr.rel (%p201_p3) target bundleno = 239 (0xef), region = 36  ;;  %485 = vmatprep.subr.bf16.mxu0 (!%p201_p3), %v545_v1  ;;  %489 = vmatprep.mubr.msk.bf16.mxu0 (!%p201_p3), %vm546_vm0, %v545_v1  ;;  %v469_v7 = vld [vmem:[%s622_s2] ss:$0 sm:$0xff] (!%p201_p3) }
   0x8   : > { %486 = vmatpush3.bf16.msra.mxu0 (!%p201_p3), %v519_v0 }
   0x9   : > { %487 = vmatprep.subr.bf16.mxu0 (!%p201_p3), %v545_v1 }
   0xc   : > { %488 = vmatpush3.bf16.msra.mxu0 (!%p201_p3), %v520_v2 }
   0xe   : > { %s630_s15 = smov (!%p244_p4, %s535_s15), 1 }
   0xf   : > { %s475_s23 = sshll.u32 %s630_s15, 4  ;;  %s476_s27 = sshll.u32 %s630_s15, 3 }
  0x10   : > { %s251_s26 = scalar_lea.vmem %s620_s0, %s475_s23  ;;  %s261_s30 = scalar_lea.vmem %s623_s3, %s476_s27 }
  0x11   : > { %v274_v3 = vld [vmem:[%s251_s26] sm:$0xff]  ;;  %v275_v4 = vld [vmem:[%s251_s26 + $0x8] sm:$0xff]  ;;  %s271_s9 = scalar_lea.vmem %s624_s4, %s475_s23 }
  0x12   : > { %v276_v5 = vpack.c.bf16 %v275_v4, %v274_v3  ;;  %v479_v6 = vld [vmem:[%s261_s30] sm:$0xff]  }
  0x13   : > { %v480_v8 = vunpack.c.l.bf16 %v479_v6  ;;  %v481_v12 = vunpack.c.h.bf16 %v479_v6 }
  0x14   : > { %490 = vmatmul.mubr.msk.bf16.vlgmr.msra.gmra.mrb[0].mxu0 %vm300_vm1, %v276_v5 }
  0xe7   : > { %v338_v9 = vpop.f32.mrb[0].mxu0 }
  0xe8   : > { %v339_v10 = vadd.f32 %v469_v7, %v338_v9  ;;  %v491_v11 = vpop.f32.mrb[1].mxu0 }
  0xe9   : > { %v341_v13 = vpop.f32.mrb[2].mxu0 }
  0xea   : > { %v349_v14 = vadd.f32 %v480_v8, %v339_v10  ;;  %v342_v15 = vadd.f32 %v469_v7, %v341_v13  ;;  %v492_v16 = vpop.f32.mrb[3].mxu0 }
  0xec   : > { %351 = vst.msk [vmem:[%s271_s9] sm:$0xff] %vm300_vm1, %v349_v14  ;;  %v350_v17 = vadd.f32 %v481_v12, %v342_v15 }
  0xee   : > { %352 = vst.msk [vmem:[%s271_s9 + $0x8] sm:$0xff] %vm300_vm1, %v350_v17 }
  0xef PF: > { %s14_s17 = sadd.s32 1, %s543_s17   ;;  %s625_s15 = smov %s539_s16 }
  0xf0   : > { %p11_p5 = scmp.ge.s32.totalorder %s14_s17, 4   ;;  %s626_s16 = smov %s628_s18 }
  0xf2   :  { %13 = sbr.rel (!%p11_p5) target bundleno = 2 (0x2), region = 69 }

// kernel: fast3r_decoder_forward.8
= control target key start
LH: loop header
LB: loop body
LE: loop exit
PB: predicated region body
PF: predicated region fallthrough
CT: control target
= control target key end

     0   :  { %s1144_s17 = smov 0   ;;  %s1146_s18 = smov 0   ;;  %s1241_s0 = inlined_call_operand.vmem [shape: f32[2,16,32], index: 0, kind: input, shape index: {}]   ;;  %s1242_s1 = inlined_call_operand.vmem [shape: f32[1,32], index: 1, kind: input, shape index: {}]   ;;  %s1243_s2 = inlined_call_operand.vmem [shape: f32[1,32], index: 2, kind: input, shape index: {}]   ;;  %s1244_s3 = inlined_call_operand.vmem [shape: bf16[32,32], index: 3, kind: input, shape index: {}]   ;;  %s1245_s4 = inlined_call_operand.vmem [shape: f32[1,32], index: 4, kind: input, shape index: {}]   ;;  %s1246_s5 = inlined_call_operand.vmem [shape: bf16[32,32], index: 5, kind: input, shape index: {}]   ;;  %s1247_s6 = inlined_call_operand.vmem [shape: f32[1,32], index: 6, kind: input, shape index: {}]   ;;  %s1248_s7 = inlined_call_operand.vmem [shape: bf16[32,32], index: 7, kind: input, shape index: {}]   ;;  %s1249_s8 = inlined_call_operand.vmem [shape: f32[1,32], index: 8, kind: input, shape index: {}]   ;;  %s1250_s9 = inlined_call_operand.vmem [shape: bf16[2,16,32], index: 9, kind: output, shape index: {0}]   ;;  %s1251_s10 = inlined_call_operand.vmem [shape: bf16[2,16,32], index: 10, kind: output, shape index: {1}]   ;;  %s1252_s11 = inlined_call_operand.vmem [shape: bf16[2,16,32], index: 11, kind: output, shape index: {2}]  }
   0x1   :  { %s1148_s19 = smov 0  }
   0x2 LB: > { %s34_s20 = sadd.s32 1, %s1076_s18  ;;  %p948_p0 = scmp.ge.s32.totalorder %s1080_s19, 1  ;;  %s1080_s19 = sphi %s1148_s19, %s22_s19   ;;  %s1076_s18 = sphi %s1146_s18, %s1254_s18   ;;  %s1072_s17 = sphi %s1144_s17, %s1253_s17  }
   0x3   : > { %p36_p1 = scmp.ge.s32.totalorder %s34_s20, 2  ;;  %p367_p2 = scmp.lt.s32.totalorder %s1080_s19, 3 }
   0x5   : > { %s1256_s20 = smov (%p36_p1, %s34_s20), 0  ;;  %p368_p3 = pnand %p948_p0, %p367_p2 }
   0x6   : > { %p434_p4 = scmp.lt.s32.totalorder (!%p368_p3), %s1072_s17, 1  ;;  %vm478_vm0 = vcmask (!%p368_p3), 261120   ;;  %v1048_v8 = vld [vmem:[%s1244_s3] sm:$0xff] (!%p368_p3)   ;;  %v1082_v10 = vmov (!%p368_p3), 0.0   ;;  %v1050_v11 = vld [vmem:[%s1244_s3 + $0x8] sm:$0xff] (!%p368_p3)   ;;  %vm1083_vm1 = vmmov (!%p368_p3), 0  }
   0x7   : > { %371 = sbr.rel (%p368_p3) target bundleno = 421 (0x1a5), region = 56  ;;  %v1049_v9 = vld [vmem:[%s1246_s5] sm:$0xff] (!%p368_p3)   ;;  %998 = vmatprep.subr.bf16.mxu0 (!%p368_p3), %v1082_v10  ;;  %1006 = vmatprep.subr.bf16.mxu1 (!%p368_p3), %v1082_v10  ;;  %v1051_v12 = vld [vmem:[%s1246_s5 + $0x8] sm:$0xff] (!%p368_p3)   ;;  %vm606_vm2 = vcmask (!%p368_p3), 257024  }
   0x8   : > { %999 = vmatpush3.bf16.msra.mxu0 (!%p368_p3), %v1048_v8  ;;  %1007 = vmatpush3.bf16.msra.mxu1 (!%p368_p3), %v1049_v9  ;;  %v957_v32 = vld [vmem:[%s1242_s1] ss:$0 sm:$0xff] (!%p368_p3)  ;;  %v1053_v43 = vld [vmem:[%s1248_s7 + $0x8] sm:$0xff] (!%p368_p3)  }
   0x9   : > { %1000 = vmatprep.subr.bf16.mxu0 (!%p368_p3), %v1082_v10  ;;  %1008 = vmatprep.subr.bf16.mxu1 (!%p368_p3), %v1082_v10  ;;  %v958_v37 = vld [vmem:[%s1243_s2] ss:$0 sm:$0xff] (!%p368_p3) }
   0xa   : > { %1002 = vmatprep.mubr.msk.bf16.mxu0 (!%p368_p3), %vm1083_vm1, %v1082_v10  ;;  %1010 = vmatprep.mubr.msk.bf16.mxu1 (!%p368_p3), %vm1083_vm1, %v1082_v10  ;;  %v1052_v41 = vld [vmem:[%s1248_s7] sm:$0xff] (!%p368_p3)  }
   0xb   : > { %v959_v44 = vld [vmem:[%s1245_s4] ss:$0 sm:$0xff] (!%p368_p3) }
   0xc   : > { %1001 = vmatpush3.bf16.msra.mxu0 (!%p368_p3), %v1050_v11  ;;  %1009 = vmatpush3.bf16.msra.mxu1 (!%p368_p3), %v1051_v12  ;;  %v965_v45 = vld [vmem:[%s1247_s6] ss:$0 sm:$0xff] (!%p368_p3) }
   0xd   : > { %1014 = vmatprep.subr.bf16.mxu0 (!%p368_p3), %v1082_v10  ;;  %v971_v63 = vld [vmem:[%s1249_s8] ss:$0 sm:$0xff] (!%p368_p3) }
   0xe   : > { %s1258_s17 = smov (!%p434_p4, %s1072_s17), 1 }
   0xf   : > { %s979_s21 = sshll.u32 %s1258_s17, 4  ;;  %s1209_s30 = sshll.u32 %s1258_s17, 3 }
  0x10   : > { %s441_s24 = scalar_lea.vmem %s1241_s0, %s979_s21  ;;  %s461_s14 = scalar_lea.vmem %s1251_s10, %s1209_s30 }
  0x11   : > { %v474_v0 = vld [vmem:[%s441_s24] sm:$0xff]  ;;  %v475_v1 = vld [vmem:[%s441_s24 + $0x8] sm:$0xff]  ;;  %s451_s16 = scalar_lea.vmem %s1250_s9, %s1209_s30  ;;  %s471_s25 = scalar_lea.vmem %s1252_s11, %s1209_s30 }
  0x12   : > { %v479_v2 = vsel %vm478_vm0, %v474_v0, 0.0  ;;  %v488_v3 = vmul.f32 %v474_v0, %v474_v0  ;;  %v489_v4 = vmul.f32 %v475_v1, %v475_v1  ;;  %v482_v6 = vsel %vm478_vm0, %v475_v1, 0.0 }
  0x13   : > { %480 = vadd.xlane.f32.xlu0 %v479_v2 }
  0x14   : > { %v490_v5 = vsel %vm478_vm0, %v488_v3, 0.0  ;;  %v493_v7 = vsel %vm478_vm0, %v489_v4, 0.0 }
  0x15   : > { %491 = vadd.xlane.f32.xlu1 %v490_v5 }
  0x17   : > { %483 = vadd.xlane.f32.xlu0 %v482_v6 }
  0x19   : > { %494 = vadd.xlane.f32.xlu1 %v493_v7 }
  0xa0   : > { %v481_v13 = vpop.xlane.xlu0 %480 }
  0xa1   : > { %v486_v14 = vmul.f32 0.03125, %v481_v13 }
  0xa2   : > { %v492_v15 = vpop.xlane.xlu1 %491 }
  0xa3   : > { %v498_v16 = vmul.f32 %v486_v14, %v486_v14  ;;  %v496_v17 = vmul.f32 0.03125, %v492_v15  ;;  %v504_v29 = vsub.f32 %v474_v0, %v486_v14 }
  0xa4   : > { %v484_v18 = vpop.xlane.xlu0 %483 }
  0xa5   : > { %v500_v19 = vsub.f32 %v496_v17, %v498_v16  ;;  %v487_v20 = vmul.f32 0.03125, %v484_v18 }
  0xa6   : > { %v495_v21 = vpop.xlane.xlu1 %494 }
  0xa7   : > { %v502_v22 = vmax.f32 %v500_v19, 0.0  ;;  %v499_v23 = vmul.f32 %v487_v20, %v487_v20  ;;  %v497_v24 = vmul.f32 0.03125, %v495_v21  ;;  %v505_v33 = vsub.f32 %v475_v1, %v487_v20 }
  0xa9   : > { %v506_v25 = vadd.f32 1e-05, %v502_v22  ;;  %v501_v26 = vsub.f32 %v497_v24, %v499_v23 }
  0xab   : > { %1054 = vrsqrt.f32 %v506_v25  ;;  %v503_v27 = vmax.f32 %v501_v26, 0.0 }
  0xad   : > { %v507_v28 = vadd.f32 1e-05, %v503_v27 }
  0xaf   : > { %1056 = vrsqrt.f32 %v507_v28 }
  0xb5   : > { %v1055_v30 = vpop.eup %1054 }
  0xb6   : > { %v510_v31 = vmul.f32 %v1055_v30, %v504_v29 }
  0xb8   : > { %v518_v36 = vmul.f32 %v957_v32, %v510_v31 }
  0xb9   : > { %v1057_v34 = vpop.eup %1056 }
  0xba   : > { %v511_v35 = vmul.f32 %v1057_v34, %v505_v33  ;;  %v526_v39 = vadd.f32 %v958_v37, %v518_v36 }
  0xbc   : > { %v519_v38 = vmul.f32 %v957_v32, %v511_v35 }
  0xbe   : > { %v527_v40 = vadd.f32 %v958_v37, %v519_v38 }
  0xc0   : > { %v528_v42 = vpack.c.bf16 %v527_v40, %v526_v39 }
  0xc2   : > { %1003 = vmatmul.mubr.msk.bf16.vlgmr.msra.gmra.mrb[0].mxu0 %vm478_vm0, %v528_v42  ;;  %1011 = vmatmul.mubr.msk.bf16.vlgmr.msra.gmra.mrb[0].mxu1 %vm478_vm0, %v528_v42 }
  0xc3   : > { %1015 = vmatpush3.bf16.msra.mxu0 %v1052_v41  ;;  %1018 = vmatprep.mubr.msk.bf16.mxu0 %vm1083_vm1, %v1082_v10 }
  0xc4   : > { %1016 = vmatprep.subr.bf16.mxu0 %v1082_v10 }
  0xc7   : > { %1017 = vmatpush3.bf16.msra.mxu0 %v1053_v43 }
  0xca   : > { %1019 = vmatmul.mubr.msk.bf16.vlgmr.msra.gmra.mrb[4].mxu0 %vm478_vm0, %v528_v42 }
 0x195   : > { %v589_v46 = vpop.f32.mrb[0].mxu0  ;;  %v666_v47 = vpop.f32.mrb[0].mxu1 }
 0x196   : > { %v590_v48 = vadd.f32 %v959_v44, %v589_v46  ;;  %v667_v49 = vadd.f32 %v965_v45, %v666_v47  ;;  %v1004_v50 = vpop.f32.mrb[1].mxu0  ;;  %v1012_v51 = vpop.f32.mrb[1].mxu1 }
 0x197   : > { %v592_v52 = vpop.f32.mrb[2].mxu0  ;;  %v669_v53 = vpop.f32.mrb[2].mxu1 }
 0x198   : > { %v596_v54 = vmul.f32 0.35355338, %v590_v48  ;;  %v985_v55 = vpack.c.bf16 %v667_v49, %v667_v49  ;;  %v593_v56 = vadd.f32 %v959_v44, %v592_v52  ;;  %v670_v57 = vadd.f32 %v965_v45, %v669_v53  ;;  %v1005_v58 = vpop.f32.mrb[3].mxu0  ;;  %v1013_v59 = vpop.f32.mrb[3].mxu1 }
 0x19a   : > { %v983_v60 = vpack.c.bf16 %v596_v54, %v596_v54  ;;  %681 = vst.msk [vmem:[%s461_s14] sm:$0xf] %vm606_vm2, %v985_v55  ;;  %v597_v61 = vmul.f32 0.35355338, %v593_v56  ;;  %v986_v62 = vpack.c.bf16 %v670_v57, %v670_v57 }
 0x19c   : > { %607 = vst.msk [vmem:[%s451_s16] sm:$0xf] %vm606_vm2, %v983_v60  ;;  %v984_v0 = vpack.c.bf16 %v597_v61, %v597_v61  ;;  %682 = vst.msk [vmem:[%s461_s14 + $0x4] sm:$0xf] %vm606_vm2, %v986_v62 }
 0x19d   : > { %v740_v1 = vpop.f32.mrb[4].mxu0 }
 0x19e   : > { %608 = vst.msk [vmem:[%s451_s16 + $0x4] sm:$0xf] %vm606_vm2, %v984_v0  ;;  %v741_v2 = vadd.f32 %v971_v63, %v740_v1  ;;  %v1020_v3 = vpop.f32.mrb[5].mxu0 }
 0x19f   : > { %v743_v4 = vpop.f32.mrb[6].mxu0 }
 0x1a0   : > { %v987_v5 = vpack.c.bf16 %v741_v2, %v741_v2  ;;  %v744_v6 = vadd.f32 %v971_v63, %v743_v4  ;;  %v1021_v7 = vpop.f32.mrb[7].mxu0 }
 0x1a2   : > { %755 = vst.msk [vmem:[%s471_s25] sm:$0xf] %vm606_vm2, %v987_v5  ;;  %v988_v8 = vpack.c.bf16 %v744_v6, %v744_v6 }
 0x1a4   : > { %756 = vst.msk [vmem:[%s471_s25 + $0x4] sm:$0xf] %vm606_vm2, %v988_v8 }
 0x1a5 PF: > { %s22_s19 = sadd.s32 1, %s1080_s19   ;;  %s1253_s17 = smov %s1076_s18 }
 0x1a6   : > { %p19_p5 = scmp.ge.s32.totalorder %s22_s19, 4   ;;  %s1254_s18 = smov %s1256_s20 }
 0x1a8   :  { %21 = sbr.rel (!%p19_p5) target bundleno = 2 (0x2), region = 110 }

// kernel: fast3r_decoder_forward.10
= control target key start
LH: loop header
LB: loop body
LE: loop exit
PB: predicated region body
PF: predicated region fallthrough
CT: control target
= control target key end

     0   :  { %s1155_s21 = smov 0   ;;  %s1157_s22 = smov 0   ;;  %s1287_s0 = inlined_call_operand.vmem [shape: f32[2,16,32], index: 0, kind: input, shape index: {}]   ;;  %s1288_s1 = inlined_call_operand.vmem [shape: bf16[2,16,32], index: 1, kind: input, shape index: {}]   ;;  %s1289_s2 = inlined_call_operand.vmem [shape: bf16[32,32], index: 2, kind: input, shape index: {}]   ;;  %s1290_s3 = inlined_call_operand.vmem [shape: f32[1,32], index: 3, kind: input, shape index: {}]   ;;  %s1291_s4 = inlined_call_operand.vmem [shape: f32[1,32], index: 4, kind: input, shape index: {}, may-alias: {4,10}]   ;;  %s1292_s5 = inlined_call_operand.vmem [shape: f32[1,32], index: 5, kind: input, shape index: {}, may-alias: {5,11}]   ;;  %s1293_s6 = inlined_call_operand.vmem [shape: bf16[32,128], index: 6, kind: input, shape index: {}]   ;;  %s1294_s7 = inlined_call_operand.vmem [shape: f32[1,128], index: 7, kind: input, shape index: {}]   ;;  %s1295_s8 = inlined_call_operand.vmem [shape: bf16[128,32], index: 8, kind: input, shape index: {}]   ;;  %s1296_s9 = inlined_call_operand.vmem [shape: f32[1,32], index: 9, kind: input, shape index: {}]   ;;  %s1297_s10 = inlined_call_operand.vmem [shape: f32[1,32], index: 10, kind: input, shape index: {}, may-alias: {4,10}]   ;;  %s1298_s11 = inlined_call_operand.vmem [shape: f32[1,32], index: 11, kind: input, shape index: {}, may-alias: {5,11}]   ;;  %s1299_s12 = inlined_call_operand.vmem [shape: f32[2,16,32], index: 12, kind: output, shape index: {}]  }
   0x1   :  { %s1159_s23 = smov 0  }
   0x2 LB: > { %s34_s10 = sadd.s32 1, %s1082_s22  ;;  %p934_p0 = scmp.ge.s32.totalorder %s1086_s23, 1  ;;  %s1086_s23 = sphi %s1159_s23, %s22_s23   ;;  %s1082_s22 = sphi %s1157_s22, %s1301_s22   ;;  %s1078_s21 = sphi %s1155_s21, %s1300_s21  }
   0x3   : > { %p36_p1 = scmp.ge.s32.totalorder %s34_s10, 2  ;;  %p400_p2 = scmp.lt.s32.totalorder %s1086_s23, 3 }
   0x5   : > { %s1303_s10 = smov (%p36_p1, %s34_s10), 0  ;;  %p401_p3 = pnand %p934_p0, %p400_p2 }
   0x6   : > { %v1043_v0 = vld [vmem:[%s1289_s2] sm:$0xff] (!%p401_p3)   ;;  %v1088_v1 = vmov (!%p401_p3), 0.0   ;;  %v1044_v2 = vld [vmem:[%s1289_s2 + $0x8] sm:$0xff] (!%p401_p3)   ;;  %vm1089_vm0 = vmmov (!%p401_p3), 0   ;;  %p460_p4 = scmp.lt.s32.totalorder (!%p401_p3), %s1078_s21, 1  ;;  %vm515_vm1 = vcmask (!%p401_p3), 261120  }
   0x7   : > { %404 = sbr.rel (%p401_p3) target bundleno = 874 (0x36a), region = 68  ;;  %981 = vmatprep.subr.bf16.mxu1 (!%p401_p3), %v1088_v1  ;;  %997 = vmatprep.subr.bf16.mxu0 (!%p401_p3), %v1088_v1  ;;  %v945_v6 = vld [vmem:[%s1290_s3] ss:$0 sm:$0xff] (!%p401_p3)  ;;  %v1047_v22 = vld [vmem:[%s1293_s6 + $0x8] sm:$0xff] (!%p401_p3)   ;;  %v1050_v54 = vld [vmem:[%s1295_s8 + $0x10] sm:$0xff] (!%p401_p3)  }
   0x8   : > { %982 = vmatpush3.bf16.msra.mxu1 (!%p401_p3), %v1043_v0  ;;  %985 = vmatprep.mubr.msk.bf16.mxu1 (!%p401_p3), %vm1089_vm0, %v1088_v1  ;;  %v1046_v21 = vld [vmem:[%s1293_s6] sm:$0xff] (!%p401_p3)   ;;  %v1049_v53 = vld [vmem:[%s1295_s8 + $0x8] sm:$0xff] (!%p401_p3)   ;;  %v1051_v55 = vld [vmem:[%s1295_s8 + $0x18] sm:$0xff] (!%p401_p3)  }
   0x9   : > { %983 = vmatprep.subr.bf16.mxu1 (!%p401_p3), %v1088_v1  ;;  %1013 = vmatprep.mubr.msk.bf16.mxu0 (!%p401_p3), %vm1089_vm0, %v1088_v1  ;;  %v946_v42 = vld [vmem:[%s1291_s4] ss:$0 sm:$0xff] (!%p401_p3)  ;;  %v1053_v57 = vld [vmem:[%s1295_s8 + $0x28] sm:$0xff] (!%p401_p3)   ;;  %v1054_v58 = vld [vmem:[%s1295_s8 + $0x30] sm:$0xff] (!%p401_p3)  }
   0xa   : > { %v947_v47 = vld [vmem:[%s1292_s5] ss:$0 sm:$0xff] (!%p401_p3)  ;;  %v1055_v59 = vld [vmem:[%s1295_s8 + $0x38] sm:$0xff] (!%p401_p3)  }
   0xb   : > { %v1048_v52 = vld [vmem:[%s1295_s8] sm:$0xff] (!%p401_p3)  }
   0xc   : > { %984 = vmatpush3.bf16.msra.mxu1 (!%p401_p3), %v1044_v2  ;;  %998 = vmatpush3.bf16.msra.mxu0 (!%p401_p3), %v1048_v52  ;;  %v1052_v56 = vld [vmem:[%s1295_s8 + $0x20] sm:$0xff] (!%p401_p3)  }
   0xd   : > { %989 = vmatprep.subr.bf16.mxu1 (!%p401_p3), %v1088_v1  ;;  %999 = vmatprep.subr.bf16.mxu0 (!%p401_p3), %v1088_v1  ;;  %v948_v60 = vld [vmem:[%s1294_s7] ss:$0 sm:$0xff] (!%p401_p3) }
   0xe   : > { %s1305_s21 = smov (!%p460_p4, %s1078_s21), 1 }
   0xf   : > { %s964_s27 = sshll.u32 %s1305_s21, 3  ;;  %s963_s13 = sshll.u32 %s1305_s21, 4 }
  0x10   : > { %s477_s30 = scalar_lea.vmem %s1288_s1, %s964_s27  ;;  %s467_s16 = scalar_lea.vmem %s1287_s0, %s963_s13  ;;  %1000 = vmatpush3.bf16.msra.mxu0 %v1049_v53 }
  0x11   : > { %v1045_v3 = vld [vmem:[%s477_s30] sm:$0xff]   ;;  %v491_v7 = vld [vmem:[%s467_s16 + $0x8] sm:$0xff]  ;;  %1001 = vmatprep.subr.bf16.mxu0 %v1088_v1  ;;  %s487_s19 = scalar_lea.vmem %s1299_s12, %s963_s13 }
  0x12   : > { %986 = vmatmul.mubr.msk.bf16.vlgmr.msra.gmra.mrb[0].mxu1 %vm515_vm1, %v1045_v3  ;;  %v490_v4 = vld [vmem:[%s467_s16] sm:$0xff] }
  0x13   : > { %993 = vmatprep.mubr.msk.bf16.mxu1 %vm1089_vm0, %v1088_v1  ;;  %990 = vmatpush3.bf16.msra.mxu1 %v1046_v21 }
  0x14   : > { %991 = vmatprep.subr.bf16.mxu1 %v1088_v1  ;;  %1002 = vmatpush3.bf16.msra.mxu0 %v1050_v54 }
  0x15   : > { %1003 = vmatprep.subr.bf16.mxu0 %v1088_v1 }
  0x17   : > { %992 = vmatpush3.bf16.msra.mxu1 %v1047_v22 }
  0x18   : > { %1004 = vmatpush3.bf16.msra.mxu0 %v1051_v55 }
  0x19   : > { %1005 = vmatprep.subr.bf16.mxu0 %v1088_v1 }
  0x1c   : > { %1006 = vmatpush3.bf16.msra.mxu0 %v1052_v56 }
  0x1d   : > { %1007 = vmatprep.subr.bf16.mxu0 %v1088_v1 }
  0x20   : > { %1008 = vmatpush3.bf16.msra.mxu0 %v1053_v57 }
  0x21   : > { %1009 = vmatprep.subr.bf16.mxu0 %v1088_v1 }
  0x24   : > { %1010 = vmatpush3.bf16.msra.mxu0 %v1054_v58 }
  0x25   : > { %1011 = vmatprep.subr.bf16.mxu0 %v1088_v1 }
  0x28   : > { %1012 = vmatpush3.bf16.msra.mxu0 %v1055_v59 }
  0xe5   : > { %v553_v5 = vpop.f32.mrb[0].mxu1 }
  0xe6   : > { %v560_v8 = vadd.f32 %v553_v5, %v490_v4  ;;  %v987_v9 = vpop.f32.mrb[1].mxu1 }
  0xe7   : > { %v556_v10 = vpop.f32.mrb[2].mxu1 }
  0xe8   : > { %v1202_v11 = vadd.f32 %v945_v6, %v560_v8  ;;  %v561_v12 = vadd.f32 %v556_v10, %v491_v7  ;;  %v988_v13 = vpop.f32.mrb[3].mxu1 }
  0xea   : > { %v1204_v14 = vadd.f32 %v945_v6, %v561_v12  ;;  %v573_v15 = vsel %vm515_vm1, %v1202_v11, 0.0  ;;  %v582_v16 = vmul.f32 %v1202_v11, %v1202_v11 }
  0xeb   : > { %574 = vadd.xlane.f32.xlu0 %v573_v15 }
  0xec   : > { %v584_v17 = vsel %vm515_vm1, %v582_v16, 0.0  ;;  %v583_v18 = vmul.f32 %v1204_v14, %v1204_v14  ;;  %v576_v19 = vsel %vm515_vm1, %v1204_v14, 0.0 }
  0xed   : > { %585 = vadd.xlane.f32.xlu1 %v584_v17 }
  0xee   : > { %v587_v20 = vsel %vm515_vm1, %v583_v18, 0.0 }
  0xef   : > { %577 = vadd.xlane.f32.xlu0 %v576_v19 }
  0xf1   : > { %588 = vadd.xlane.f32.xlu1 %v587_v20 }
 0x178   : > { %v575_v23 = vpop.xlane.xlu0 %574 }
 0x179   : > { %v580_v24 = vmul.f32 0.03125, %v575_v23 }
 0x17a   : > { %v586_v25 = vpop.xlane.xlu1 %585 }
 0x17b   : > { %v592_v26 = vmul.f32 %v580_v24, %v580_v24  ;;  %v590_v27 = vmul.f32 0.03125, %v586_v25  ;;  %v598_v39 = vsub.f32 %v1202_v11, %v580_v24  ;;  %v952_v24 = vld [vmem:[%s1296_s9] ss:$0 sm:$0xff] }
 0x17c   : > { %v578_v28 = vpop.xlane.xlu0 %577 }
 0x17d   : > { %v594_v29 = vsub.f32 %v590_v27, %v592_v26  ;;  %v581_v30 = vmul.f32 0.03125, %v578_v28 }
 0x17e   : > { %v589_v31 = vpop.xlane.xlu1 %588 }
 0x17f   : > { %v596_v32 = vmax.f32 %v594_v29, 0.0  ;;  %v593_v33 = vmul.f32 %v581_v30, %v581_v30  ;;  %v591_v34 = vmul.f32 0.03125, %v589_v31  ;;  %v599_v43 = vsub.f32 %v1204_v14, %v581_v30 }
 0x181   : > { %v600_v35 = vadd.f32 1e-05, %v596_v32  ;;  %v595_v36 = vsub.f32 %v591_v34, %v593_v33 }
 0x183   : > { %1056 = vrsqrt.f32 %v600_v35  ;;  %v597_v37 = vmax.f32 %v595_v36, 0.0 }
 0x185   : > { %v601_v38 = vadd.f32 1e-05, %v597_v37 }
 0x187   : > { %1058 = vrsqrt.f32 %v601_v38 }
 0x18d   : > { %v1057_v40 = vpop.eup %1056 }
 0x18e   : > { %v604_v41 = vmul.f32 %v1057_v40, %v598_v39 }
 0x190   : > { %v612_v46 = vmul.f32 %v946_v42, %v604_v41 }
 0x191   : > { %v1059_v44 = vpop.eup %1058 }
 0x192   : > { %v605_v45 = vmul.f32 %v1059_v44, %v599_v43  ;;  %v620_v49 = vadd.f32 %v947_v47, %v612_v46 }
 0x194   : > { %v613_v48 = vmul.f32 %v946_v42, %v605_v45 }
 0x196   : > { %v621_v50 = vadd.f32 %v947_v47, %v613_v48 }
 0x198   : > { %v622_v51 = vpack.c.bf16 %v621_v50, %v620_v49 }
 0x19a   : > { %994 = vmatmul.mubr.msk.bf16.vlgmr.msra.gmra.mrb[4].mxu1 %vm515_vm1, %v622_v51 }
 0x26d   : > { %v683_v61 = vpop.f32.mrb[4].mxu1 }
 0x26e   : > { %v684_v62 = vadd.f32 %v948_v60, %v683_v61  ;;  %v995_v63 = vpop.f32.mrb[5].mxu1 }
 0x26f   : > { %v686_v0 = vpop.f32.mrb[6].mxu1 }
 0x270   : > { %v690_v2 = vmul.f32 %v684_v62, %v684_v62  ;;  %v687_v3 = vadd.f32 %v948_v60, %v686_v0  ;;  %v996_v4 = vpop.f32.mrb[7].mxu1 }
 0x272   : > { %v692_v5 = vmul.f32 %v690_v2, %v684_v62  ;;  %v691_v6 = vmul.f32 %v687_v3, %v687_v3 }
 0x274   : > { %v694_v7 = vmul.f32 0.044715, %v692_v5  ;;  %v693_v8 = vmul.f32 %v691_v6, %v687_v3 }
 0x276   : > { %v696_v9 = vadd.f32 %v694_v7, %v684_v62  ;;  %v695_v10 = vmul.f32 0.044715, %v693_v8 }
 0x278   : > { %v698_v12 = vmul.f32 0.7978846, %v696_v9  ;;  %v697_v1 = vadd.f32 %v695_v10, %v687_v3 }
 0x27a   : > { %1060 = vtanh.f32 %v698_v12  ;;  %v699_v13 = vmul.f32 0.7978846, %v697_v1 }
 0x27c   : > { %1062 = vtanh.f32 %v699_v13 }
 0x284   : > { %v1061_v15 = vpop.eup %1060 }
 0x285   : > { %v702_v16 = vadd.f32 1.0, %v1061_v15 }
 0x286   : > { %v1063_v17 = vpop.eup %1062 }
 0x287   : > { %v703_v18 = vadd.f32 1.0, %v1063_v17  ;;  %v704_v19 = vmul.f32 0.5, %v702_v16 }
 0x289   : > { %v705_v20 = vmul.f32 0.5, %v703_v18  ;;  %v706_v21 = vmul.f32 %v704_v19, %v684_v62 }
 0x28b   : > { %v707_v22 = vmul.f32 %v705_v20, %v687_v3 }
 0x28d   : > { %v708_v23 = vpack.c.bf16 %v707_v22, %v706_v21 }
 0x28f   : > { %1014 = vmatmul.mubr.bf16.vlgmr.msra.gmra.mrb[0].mxu0 %v708_v23 }
 0x362   : > { %v814_v25 = vpop.f32.mrb[0].mxu0 }
 0x363   : > { %v815_v26 = vadd.f32 %v952_v24, %v814_v25  ;;  %v1015_v27 = vpop.f32.mrb[1].mxu0 }
 0x364   : > { %v817_v28 = vpop.f32.mrb[2].mxu0 }
 0x365   : > { %v821_v29 = vadd.f32 %v815_v26, %v1202_v11  ;;  %v818_v30 = vadd.f32 %v952_v24, %v817_v28  ;;  %v1016_v31 = vpop.f32.mrb[3].mxu0 }
 0x367   : > { %823 = vst.msk [vmem:[%s487_s19] sm:$0xff] %vm515_vm1, %v821_v29  ;;  %v822_v32 = vadd.f32 %v818_v30, %v1204_v14 }
 0x369   : > { %824 = vst.msk [vmem:[%s487_s19 + $0x8] sm:$0xff] %vm515_vm1, %v822_v32 }
 0x36a PF: > { %s22_s23 = sadd.s32 1, %s1086_s23   ;;  %s1300_s21 = smov %s1082_s22 }
 0x36b   : > { %p19_p5 = scmp.ge.s32.totalorder %s22_s23, 4   ;;  %s1301_s22 = smov %s1303_s10 }
 0x36d   :  { %21 = sbr.rel (!%p19_p5) target bundleno = 2 (0x2), region = 101 }

// kernel: fast3r_decoder_forward.9
= control target key start
LH: loop header
LB: loop body
LE: loop exit
PB: predicated region body
PF: predicated region fallthrough
CT: control target
= control target key end

     0   :  { %s1555_s12 = smov 0   ;;  %s1557_s13 = smov 0   ;;  %s1788_s0 = inlined_call_operand.vmem [shape: bf16[2,16,32], index: 0, kind: input, shape index: {}]   ;;  %s1789_s1 = inlined_call_operand.vmem [shape: bf16[2,16,32], index: 1, kind: input, shape index: {}]   ;;  %s1790_s2 = inlined_call_operand.vmem [shape: bf16[2,16,32], index: 2, kind: input, shape index: {}]   ;;  %s1791_s3 = inlined_call_operand.vmem [shape: bf16[2,16,32], index: 3, kind: output, shape index: {}]  }
   0x1   :  { %s1559_s14 = smov 0  }
   0x2 LB: > { %s39_s15 = sadd.s32 1, %s1520_s13  ;;  %p1310_p0 = scmp.ge.s32.totalorder %s1524_s14, 1  ;;  %s1524_s14 = sphi %s1559_s14, %s13_s14   ;;  %s1520_s13 = sphi %s1557_s13, %s1793_s13   ;;  %s1516_s12 = sphi %s1555_s12, %s1792_s12  }
   0x3   : > { %p41_p1 = scmp.ge.s32.totalorder %s39_s15, 2  ;;  %p223_p2 = scmp.lt.s32.totalorder %s1524_s14, 3 }
   0x5   : > { %s1795_s15 = smov (%p41_p1, %s39_s15), 0  ;;  %p224_p3 = pnand %p1310_p0, %p223_p2 }
   0x6   : > { %p286_p4 = scmp.lt.s32.totalorder (!%p224_p3), %s1516_s12, 1  ;;  %v1526_v0 = vmov (!%p224_p3), 0.0   ;;  %vm1527_vm0 = vmmov (!%p224_p3), 0   ;;  %vm377_vm1 = vcmask (!%p224_p3), 64512   ;;  %vm427_vm2 = vcmask (!%p224_p3), 130048   ;;  %s1529_s23 = smov (!%p224_p3), 120  }
   0x7   : > { %227 = sbr.rel (%p224_p3) target bundleno = 1908 (0x774), region = 32  ;;  %1368 = vmatprep.subr.bf16.mxu0 (!%p224_p3), %v1526_v0  ;;  %1370 = vmatprep.mubr.msk.bf16.mxu0 (!%p224_p3), %vm1527_vm0, %v1526_v0  ;;  %v1528_v10 = vmov (!%p224_p3), 0   ;;  %vm358_vm3 = vcmask (!%p224_p3), 261120   ;;  %s1530_s27 = smov (!%p224_p3), 112   ;;  %vm704_vm4 = vcmask (!%p224_p3), 130112   ;;  %vm878_vm5 = vcmask (!%p224_p3), 195712  }
   0x8   : > { %1374 = vmatprep.subr.bf16.mxu1 (!%p224_p3), %v1526_v0  ;;  %1376 = vmatprep.mubr.msk.bf16.mxu1 (!%p224_p3), %vm1527_vm0, %v1526_v0  ;;  %359 = vst.msk [vmem:[#allocation4] sm:$0xff] (!%p224_p3), %vm358_vm3, %v1526_v0  ;;  %360 = vst.msk [vmem:[#allocation4 + $0x8] sm:$0xff] (!%p224_p3), %vm358_vm3, %v1526_v0  ;;  %s1531_s28 = smov (!%p224_p3), 104   ;;  %s1532_s29 = smov (!%p224_p3), 8   ;;  %vm1052_vm6 = vcmask (!%p224_p3), 261312   ;;  %vm1074_vm7 = vcmask (!%p224_p3), 60416  }
   0x9   : > { %1449 = vset.pattern.permute.xlu1 (!%p224_p3), %v1528_v10  ;;  %1450 = vset.pattern.permute.xlu0 (!%p224_p3), %v1528_v10  ;;  %s1533_s30 = smov (!%p224_p3), 16   ;;  %s1534_s4 = smov (!%p224_p3), 24   ;;  %vm1101_vm8 = vcmask (!%p224_p3), 126016   ;;  %vm1128_vm9 = vcmask (!%p224_p3), 191616   ;;  %vm1155_vm10 = vcmask (!%p224_p3), 257216  }
   0xe   : > { %s1797_s12 = smov (!%p286_p4, %s1516_s12), 1 }
   0xf   : > { %s1579_s16 = sshll.u32 %s1797_s12, 3  ;;  %v525_v39 = vld [vmem:[#allocation4] sm:$0xff]  ;;  %v526_v41 = vld [vmem:[#allocation4 + $0x8] sm:$0xff] }
  0x10   : > { %s309_s19 = scalar_lea.vmem %s1789_s1, %s1579_s16  ;;  %s296_s22 = scalar_lea.vmem %s1788_s0, %s1579_s16 }
  0x11   : > { %v1451_v1 = vld [vmem:[%s309_s19] sm:$0xff]   ;;  %s322_s26 = scalar_lea.vmem %s1790_s2, %s1579_s16  ;;  %s1764_s7 = scalar_lea.vmem %s1791_s3, %s1579_s16 }
  0x12   : > { %v382_v2 = vsel %vm377_vm1, %v1451_v1, 0  ;;  %v1452_v3 = vld [vmem:[%s296_s22] sm:$0xff]  }
  0x13   : > { %1369 = vmatpush3.bf16.xpose.msra.mxu0 %v382_v2  ;;  %v1604_v15 = vld [vmem:[%s322_s26] sm:$0xff]  }
  0x14   : > { %1386 = vmatprep.subr.bf16.mxu0 %v1526_v0  ;;  %1375 = vmatpush3.bf16.msra.mxu1 %v1604_v15 }
  0x15   : > { %1380 = vmatprep.subr.bf16.mxu1 %v1526_v0 }
  0x1a   : > { %1371 = vmatmul.mubr.msk.bf16.vlgmr.msra.gmra.mrb[0].mxu0 %vm377_vm1, %v1452_v3 }
  0x1b   : > { %1388 = vmatprep.mubr.msk.bf16.mxu0 %vm1527_vm0, %v1526_v0 }
  0xed   : > { %v418_v4 = vpop.f32.mrb[0].mxu0 }
  0xee   : > { %v1372_v5 = vpop.f32.mrb[1].mxu0  ;;  %v428_v6 = vsel %vm427_vm2, %v418_v4, -inf }
  0xef   : > { %429 = vmax.xlane.f32.xlu0 %v428_v6  ;;  %v421_v7 = vpop.f32.mrb[2].mxu0 }
  0xf0   : > { %v1373_v8 = vpop.f32.mrb[3].mxu0  ;;  %v431_v9 = vsel %vm427_vm2, %v421_v7, -inf }
  0xf3   : > { %432 = vmax.xlane.f32.xlu0 %v431_v9 }
 0x109   : > { %535 = vrot.lane.b32.xlu0 %v1451_v1, %s1529_s23 }
 0x17c   : > { %v430_v11 = vpop.xlane.xlu0 %429 }
 0x17d   : > { %v434_v12 = vmax.f32 %v430_v11, -1e+30 }
 0x17f   : > { %444 = vperm.xlu1 %1449, %v434_v12   ;;  %v436_v34 = vsub.f32 -1e+30, %v434_v12 }
 0x180   : > { %v433_v13 = vpop.xlane.xlu0 %432 }
 0x181   : > { %v435_v14 = vmax.f32 %v433_v13, -1e+30  ;;  %v438_v36 = vmul.f32 1.442695, %v436_v34 }
 0x183   : > { %449 = vperm.xlu1 %1449, %v435_v14   ;;  %v437_v35 = vsub.f32 -1e+30, %v435_v14 }
 0x184   : > { %v536_v22 = vpop.permute.xlu0 %535 }
 0x185   : > { %v541_v25 = vsel %vm377_vm1, %v536_v22, 0  ;;  %v440_v37 = vmul.f32 1.442695, %v437_v35 }
 0x187   : > { %533 = vrot.lane.b32.xlu1 %v1452_v3, %s1529_s23 }
 0x18b   : > { %709 = vrot.lane.b32.xlu1 %v1451_v1, %s1530_s27 }
 0x18f   : > { %707 = vrot.lane.b32.xlu1 %v1452_v3, %s1530_s27 }
 0x193   : > { %883 = vrot.lane.b32.xlu1 %v1451_v1, %s1531_s28 }
 0x197   : > { %881 = vrot.lane.b32.xlu1 %v1452_v3, %s1531_s28 }
 0x1fe   : > { %v445_v16 = vpop.permute.xlu1 %444 }
 0x1ff   : > { %v452_v17 = vsub.f32 %v418_v4, %v445_v16 }
 0x201   : > { %v454_v18 = vmul.f32 1.442695, %v452_v17 }
 0x202   : > { %v450_v19 = vpop.permute.xlu1 %449 }
 0x203   : > { %v453_v20 = vsub.f32 %v421_v7, %v450_v19  ;;  %1454 = vpow2.f32 %v454_v18 }
 0x205   : > { %v456_v21 = vmul.f32 1.442695, %v453_v20 }
 0x206   : > { %v534_v27 = vpop.permute.xlu1 %533 }
 0x207   : > { %1456 = vpow2.f32 %v456_v21 }
 0x208   : > { %1458 = vpow2.f32 %v438_v36 }
 0x209   : > { %1460 = vpow2.f32 %v440_v37 }
 0x20a   : > { %v710_v28 = vpop.permute.xlu1 %709 }
 0x20b   : > { %v715_v29 = vsel %vm377_vm1, %v710_v28, 0 }
 0x20d   : > { %v1612_v23 = vpop.eup %1454 }
 0x20e   : > { %v708_v30 = vpop.permute.xlu1 %707 }
 0x211   : > { %v1614_v24 = vpop.eup %1456 }
 0x212   : > { %v474_v26 = vpack.c.bf16 %v1614_v24, %v1612_v23  ;;  %v884_v31 = vpop.permute.xlu1 %883  ;;  %v1633_v38 = vpop.eup %1458 }
 0x213   : > { %v889_v32 = vsel %vm377_vm1, %v884_v31, 0  ;;  %v1635_v40 = vpop.eup %1460  ;;  %v527_v42 = vmul.f32 %v1633_v38, %v525_v39 }
 0x214   : > { %1377 = vmatmul.mubr.msk.bf16.vlgmr.msra.gmra.mrb[0].mxu1 %vm427_vm2, %v474_v26  ;;  %v528_v46 = vmul.f32 %v1635_v40, %v526_v41 }
 0x215   : > { %1381 = vmatpush3.bf16.xpose.msra.mxu1 %v541_v25  ;;  %1382 = vmatprep.mubr.msk.bf16.mxu1 %vm1527_vm0, %v1526_v0 }
 0x216   : > { %1392 = vmatprep.subr.bf16.mxu1 %v1526_v0  ;;  %v882_v33 = vpop.permute.xlu1 %881 }
 0x21c   : > { %1383 = vmatmul.mubr.msk.bf16.vlgmr.msra.gmra.mrb[4].mxu1 %vm377_vm1, %v534_v27 }
 0x21d   : > { %1393 = vmatpush3.bf16.xpose.msra.mxu1 %v715_v29  ;;  %1394 = vmatprep.mubr.msk.bf16.mxu1 %vm1527_vm0, %v1526_v0 }
 0x21e   : > { %1404 = vmatprep.subr.bf16.mxu1 %v1526_v0 }
 0x224   : > { %1395 = vmatmul.mubr.msk.bf16.vlgmr.msra.gmra.mrb[8].mxu1 %vm377_vm1, %v708_v30 }
 0x225   : > { %1406 = vmatprep.mubr.msk.bf16.mxu1 %vm1527_vm0, %v1526_v0  ;;  %1405 = vmatpush3.bf16.xpose.msra.mxu1 %v889_v32 }
 0x22c   : > { %1407 = vmatmul.mubr.msk.bf16.vlgmr.msra.gmra.mrb[12].mxu1 %vm377_vm1, %v882_v33 }
 0x2e7   : > { %v518_v43 = vpop.f32.mrb[0].mxu1 }
 0x2e8   : > { %v529_v44 = vadd.f32 %v527_v42, %v518_v43  ;;  %v1378_v45 = vpop.f32.mrb[1].mxu1 }
 0x2e9   : > { %v521_v47 = vpop.f32.mrb[2].mxu1 }
 0x2ea   : > { %531 = vst.msk [vmem:[#allocation4] sm:$0xff] %vm377_vm1, %v529_v44  ;;  %v530_v48 = vadd.f32 %v528_v46, %v521_v47  ;;  %v1379_v49 = vpop.f32.mrb[3].mxu1 }
 0x2ec   : > { %532 = vst.msk [vmem:[#allocation4 + $0x8] sm:$0xff] %vm377_vm1, %v530_v48 }
 0x2ef   : > { %v577_v50 = vpop.f32.mrb[4].mxu1 }
 0x2f0   : > { %v1384_v51 = vpop.f32.mrb[5].mxu1  ;;  %v587_v52 = vsel %vm427_vm2, %v577_v50, -inf }
 0x2f1   : > { %588 = vmax.xlane.f32.xlu1 %v587_v52  ;;  %v580_v53 = vpop.f32.mrb[6].mxu1  ;;  %v682_v27 = vld [vmem:[#allocation4] sm:$0xff] }
 0x2f2   : > { %v1385_v54 = vpop.f32.mrb[7].mxu1  ;;  %v590_v55 = vsel %vm427_vm2, %v580_v53, -inf }
 0x2f3   : > { %591 = vmax.xlane.f32.xlu0 %v590_v55  ;;  %v683_v26 = vld [vmem:[#allocation4 + $0x8] sm:$0xff] }
 0x2f7   : > { %v751_v56 = vpop.f32.mrb[8].mxu1 }
 0x2f8   : > { %v1396_v57 = vpop.f32.mrb[9].mxu1  ;;  %v761_v6 = vsel %vm427_vm2, %v751_v56, -inf }
 0x2f9   : > { %v754_v58 = vpop.f32.mrb[10].mxu1 }
 0x2fa   : > { %v1397_v59 = vpop.f32.mrb[11].mxu1  ;;  %v764_v5 = vsel %vm427_vm2, %v754_v58, -inf }
 0x2ff   : > { %v1650_v1 = vpop.f32.mrb[12].mxu1 }
 0x300   : > { %v1408_v2 = vpop.f32.mrb[13].mxu1  ;;  %v935_v25 = vsel %vm427_vm2, %v1650_v1, -inf }
 0x301   : > { %v1652_v3 = vpop.f32.mrb[14].mxu1 }
 0x302   : > { %v1409_v4 = vpop.f32.mrb[15].mxu1  ;;  %v938_v22 = vsel %vm427_vm2, %v1652_v3, -inf }
 0x37e   : > { %v1643_v60 = vpop.xlane.xlu1 %588 }
 0x37f   : > { %v593_v61 = vmax.f32 %v1643_v60, -1e+30 }
 0x380   : > { %v592_v62 = vpop.xlane.xlu0 %591 }
 0x381   : > { %v594_v63 = vmax.f32 %v592_v62, -1e+30  ;;  %603 = vperm.xlu0 %1450, %v593_v61   ;;  %v595_v44 = vsub.f32 -1e+30, %v593_v61 }
 0x383   : > { %608 = vperm.xlu1 %1449, %v594_v63   ;;  %v596_v39 = vsub.f32 -1e+30, %v594_v63 }
 0x385   : > { %v599_v41 = vmul.f32 1.442695, %v596_v39 }
 0x387   : > { %635 = vrot.lane.b32.xlu1 %v1604_v15, %s1529_s23 }
 0x3a0   : > { %765 = vmax.xlane.f32.xlu0 %v764_v5 }
 0x3ab   : > { %762 = vmax.xlane.f32.xlu1 %v761_v6 }
 0x400   : > { %v604_v7 = vpop.permute.xlu0 %603 }
 0x401   : > { %v611_v8 = vsub.f32 %v577_v50, %v604_v7  ;;  %v597_v50 = vmul.f32 1.442695, %v595_v44 }
 0x402   : > { %v609_v9 = vpop.permute.xlu1 %608 }
 0x403   : > { %v613_v10 = vmul.f32 1.442695, %v611_v8  ;;  %v612_v11 = vsub.f32 %v580_v53, %v609_v9 }
 0x405   : > { %v615_v12 = vmul.f32 1.442695, %v612_v11  ;;  %1462 = vpow2.f32 %v613_v10 }
 0x406   : > { %v636_v13 = vpop.permute.xlu1 %635 }
 0x407   : > { %1464 = vpow2.f32 %v615_v12  ;;  %1387 = vmatpush3.bf16.msra.mxu0 %v636_v13 }
 0x408   : > { %1398 = vmatprep.subr.bf16.mxu0 %v1526_v0 }
 0x40f   : > { %v1657_v14 = vpop.eup %1462 }
 0x411   : > { %v1659_v16 = vpop.eup %1464 }
 0x412   : > { %v634_v17 = vpack.c.bf16 %v1659_v16, %v1657_v14 }
 0x414   : > { %1389 = vmatmul.mubr.msk.bf16.vlgmr.msra.gmra.mrb[4].mxu0 %vm427_vm2, %v634_v17 }
 0x415   : > { %1400 = vmatprep.mubr.msk.bf16.mxu0 %vm1527_vm0, %v1526_v0 }
 0x42d   : > { %v1666_v18 = vpop.xlane.xlu0 %765 }
 0x42e   : > { %v768_v19 = vmax.f32 %v1666_v18, -1e+30 }
 0x430   : > { %782 = vperm.xlu0 %1450, %v768_v19   ;;  %v770_v13 = vsub.f32 -1e+30, %v768_v19 }
 0x432   : > { %v773_v17 = vmul.f32 1.442695, %v770_v13 }
 0x438   : > { %v1671_v20 = vpop.xlane.xlu1 %762 }
 0x439   : > { %v767_v21 = vmax.f32 %v1671_v20, -1e+30  ;;  %v622_v20 = vsel %vm427_vm2, %v1657_v14, 0.0 }
 0x43b   : > { %777 = vperm.xlu1 %1449, %v767_v21  }
 0x43f   : > { %809 = vrot.lane.b32.xlu1 %v1604_v15, %s1530_s27 }
 0x44f   : > { %939 = vmax.xlane.f32.xlu0 %v938_v22 }
 0x463   : > { %936 = vmax.xlane.f32.xlu1 %v935_v25 }
 0x465   : > { %688 = vrot.lane.b32.xlu0 %v683_v26, %s1529_s23 }
 0x474   : > { %686 = vrot.lane.b32.xlu1 %v682_v27, %s1529_s23 }
 0x4af   : > { %v783_v28 = vpop.permute.xlu0 %782 }
 0x4b0   : > { %v786_v29 = vsub.f32 %v754_v58, %v783_v28  ;;  %v769_v28 = vsub.f32 -1e+30, %v767_v21 }
 0x4b2   : > { %v789_v30 = vmul.f32 1.442695, %v786_v29  ;;  %v771_v29 = vmul.f32 1.442695, %v769_v28 }
 0x4b4   : > { %1466 = vpow2.f32 %v789_v30 }
 0x4ba   : > { %v778_v31 = vpop.permute.xlu1 %777 }
 0x4bb   : > { %v785_v32 = vsub.f32 %v751_v56, %v778_v31 }
 0x4bd   : > { %v787_v33 = vmul.f32 1.442695, %v785_v32  ;;  %v625_v32 = vsel %vm427_vm2, %v1659_v16, 0.0 }
 0x4be   : > { %v810_v34 = vpop.permute.xlu1 %809  ;;  %v1685_v35 = vpop.eup %1466 }
 0x4bf   : > { %1468 = vpow2.f32 %v787_v33  ;;  %1399 = vmatpush3.bf16.msra.mxu0 %v810_v34  ;;  %v799_v21 = vsel %vm427_vm2, %v1685_v35, 0.0 }
 0x4c0   : > { %1410 = vmatprep.subr.bf16.mxu0 %v1526_v0  ;;  %1470 = vpow2.f32 %v599_v41 }
 0x4c1   : > { %1472 = vpow2.f32 %v597_v50 }
 0x4c9   : > { %v1687_v36 = vpop.eup %1468 }
 0x4ca   : > { %v808_v37 = vpack.c.bf16 %v1685_v35, %v1687_v36  ;;  %v1698_v45 = vpop.eup %1470  ;;  %v796_v33 = vsel %vm427_vm2, %v1687_v36, 0.0  ;;  %v462_v35 = vsel %vm427_vm2, %v1612_v23, 0.0 }
 0x4cb   : > { %v1710_v56 = vpop.eup %1472 }
 0x4cc   : > { %1401 = vmatmul.mubr.msk.bf16.vlgmr.msra.gmra.mrb[8].mxu0 %vm427_vm2, %v808_v37  ;;  %v620_v23 = vmul.f32 0.0, %v1710_v56 }
 0x4cd   : > { %1412 = vmatprep.mubr.msk.bf16.mxu0 %vm1527_vm0, %v1526_v0 }
 0x4dc   : > { %v1694_v42 = vpop.xlane.xlu0 %939 }
 0x4dd   : > { %v942_v54 = vmax.f32 %v1694_v42, -1e+30 }
 0x4e0   : > { %v689_v43 = vpop.permute.xlu0 %688 }
 0x4e1   : > { %v693_v47 = vmul.f32 %v1698_v45, %v689_v43 }
 0x4e7   : > { %v675_v46 = vpop.f32.mrb[4].mxu0 }
 0x4e8   : > { %v1390_v48 = vpop.f32.mrb[5].mxu0 }
 0x4e9   : > { %v678_v49 = vpop.f32.mrb[6].mxu0 }
 0x4ea   : > { %v695_v51 = vadd.f32 %v693_v47, %v678_v49  ;;  %v1391_v52 = vpop.f32.mrb[7].mxu0  ;;  %v465_v47 = vsel %vm427_vm2, %v1614_v24, 0.0  ;;  %v944_v49 = vsub.f32 -1e+30, %v942_v54 }
 0x4ec   : > { %700 = vrot.lane.b32.xlu0 %v695_v51, %s1532_s29  ;;  %v947_v52 = vmul.f32 1.442695, %v944_v49 }
 0x4f0   : > { %v1702_v0 = vpop.xlane.xlu1 %936 }
 0x4f1   : > { %v941_v53 = vmax.f32 %v1702_v0, -1e+30 }
 0x4f3   : > { %951 = vperm.xlu1 %1449, %v941_v53   ;;  %v943_v48 = vsub.f32 -1e+30, %v941_v53 }
 0x4f4   : > { %v687_v55 = vpop.permute.xlu1 %686 }
 0x4f5   : > { %v692_v57 = vmul.f32 %v1710_v56, %v687_v55  ;;  %v945_v50 = vmul.f32 1.442695, %v943_v48 }
 0x4f7   : > { %956 = vperm.xlu1 %1449, %v942_v54   ;;  %v694_v58 = vadd.f32 %v692_v57, %v675_v46 }
 0x4fb   : > { %983 = vrot.lane.b32.xlu1 %v1604_v15, %s1531_s28 }
 0x4ff   : > { %698 = vrot.lane.b32.xlu1 %v694_v58, %s1532_s29 }
 0x55e   : > { %v701_v59 = vpop.permute.xlu0 %700 }
 0x55f   : > { %706 = vst.msk [vmem:[#allocation4 + $0x8] sm:$0xff] %vm704_vm4, %v701_v59 }
 0x566   : > { %v857_v60 = vld [vmem:[#allocation4 + $0x8] sm:$0xff] }
 0x567   : > { %862 = vrot.lane.b32.xlu0 %v857_v60, %s1530_s27 }
 0x572   : > { %v952_v61 = vpop.permute.xlu1 %951 }
 0x573   : > { %v959_v62 = vsub.f32 %v1650_v1, %v952_v61 }
 0x575   : > { %v961_v63 = vmul.f32 1.442695, %v959_v62 }
 0x576   : > { %v957_v2 = vpop.permute.xlu1 %956 }
 0x577   : > { %v960_v4 = vsub.f32 %v1652_v3, %v957_v2  ;;  %1474 = vpow2.f32 %v961_v63 }
 0x579   : > { %v963_v5 = vmul.f32 1.442695, %v960_v4 }
 0x57a   : > { %v984_v15 = vpop.permute.xlu1 %983 }
 0x57b   : > { %1476 = vpow2.f32 %v963_v5  ;;  %1411 = vmatpush3.bf16.msra.mxu0 %v984_v15 }
 0x57c   : > { %1478 = vpow2.f32 %v773_v17 }
 0x57d   : > { %1480 = vpow2.f32 %v771_v29 }
 0x57e   : > { %v699_v6 = vpop.permute.xlu1 %698  ;;  %1482 = vpow2.f32 %v945_v50 }
 0x57f   : > { %705 = vst.msk [vmem:[#allocation4] sm:$0xff] %vm704_vm4, %v699_v6  ;;  %1484 = vpow2.f32 %v947_v52  ;;  %v621_v6 = vmul.f32 0.0, %v1698_v45 }
 0x581   : > { %v1475_v7 = vpop.eup %1474 }
 0x582   : > { %v970_v34 = vsel %vm427_vm2, %v1475_v7, 0.0 }
 0x585   : > { %v1477_v8 = vpop.eup %1476 }
 0x586   : > { %v856_v9 = vld [vmem:[#allocation4] sm:$0xff]  ;;  %v982_v10 = vpack.c.bf16 %v1477_v8, %v1475_v7  ;;  %v1725_v22 = vpop.eup %1478  ;;  %v973_v16 = vsel %vm427_vm2, %v1477_v8, 0.0 }
 0x587   : > { %860 = vrot.lane.b32.xlu1 %v856_v9, %s1530_s27  ;;  %v1481_v30 = vpop.eup %1480  ;;  %v795_v8 = vmul.f32 0.0, %v1725_v22 }
 0x588   : > { %1413 = vmatmul.mubr.msk.bf16.vlgmr.msra.gmra.mrb[12].mxu0 %vm427_vm2, %v982_v10  ;;  %v794_v60 = vmul.f32 0.0, %v1481_v30  ;;  %v1483_v61 = vpop.eup %1482 }
 0x589   : > { %v1485_v53 = vpop.eup %1484  ;;  %v968_v42 = vmul.f32 0.0, %v1483_v61 }
 0x58a   : > { %v969_v10 = vmul.f32 0.0, %v1485_v53 }
 0x59f   : > { %v849_v1 = vpop.f32.mrb[8].mxu0 }
 0x5a0   : > { %v1402_v11 = vpop.f32.mrb[9].mxu0 }
 0x5a1   : > { %v852_v12 = vpop.f32.mrb[10].mxu0 }
 0x5a2   : > { %v1403_v3 = vpop.f32.mrb[11].mxu0 }
 0x5d9   : > { %v863_v25 = vpop.permute.xlu0 %862 }
 0x5da   : > { %v867_v26 = vmul.f32 %v1725_v22, %v863_v25  ;;  %v461_v25 = vmul.f32 0.0, %v1635_v40  ;;  %v460_v40 = vmul.f32 0.0, %v1633_v38 }
 0x5dc   : > { %v869_v27 = vadd.f32 %v867_v26, %v852_v12 }
 0x5de   : > { %874 = vrot.lane.b32.xlu0 %v869_v27, %s1533_s30 }
 0x5f9   : > { %v861_v31 = vpop.permute.xlu1 %860 }
 0x5fa   : > { %v866_v18 = vmul.f32 %v1481_v30, %v861_v31 }
 0x5fc   : > { %v868_v19 = vadd.f32 %v866_v18, %v849_v1 }
 0x5fd   : > { %626 = vadd.xlane.f32.xlu0 %v625_v32 }
 0x5fe   : > { %872 = vrot.lane.b32.xlu1 %v868_v19, %s1533_s30 }
 0x601   : > { %797 = vadd.xlane.f32.xlu0 %v796_v33 }
 0x605   : > { %971 = vadd.xlane.f32.xlu0 %v970_v34 }
 0x622   : > { %623 = vadd.xlane.f32.xlu1 %v622_v20 }
 0x626   : > { %800 = vadd.xlane.f32.xlu1 %v799_v21 }
 0x62a   : > { %974 = vadd.xlane.f32.xlu1 %v973_v16 }
 0x650   : > { %v875_v37 = vpop.permute.xlu0 %874 }
 0x651   : > { %880 = vst.msk [vmem:[#allocation4 + $0x8] sm:$0xff] %vm878_vm5, %v875_v37 }
 0x658   : > { %v1031_v39 = vld [vmem:[#allocation4 + $0x8] sm:$0xff] }
 0x659   : > { %1036 = vrot.lane.b32.xlu1 %v1031_v39, %s1531_s28 }
 0x65b   : > { %v1023_v36 = vpop.f32.mrb[12].mxu0 }
 0x65c   : > { %v1414_v41 = vpop.f32.mrb[13].mxu0 }
 0x65d   : > { %v1026_v43 = vpop.f32.mrb[14].mxu0 }
 0x65e   : > { %v1415_v44 = vpop.f32.mrb[15].mxu0 }
 0x670   : > { %v873_v46 = vpop.permute.xlu1 %872 }
 0x671   : > { %879 = vst.msk [vmem:[#allocation4] sm:$0xff] %vm878_vm5, %v873_v46 }
 0x678   : > { %v1030_v14 = vld [vmem:[#allocation4] sm:$0xff] }
 0x679   : > { %1034 = vrot.lane.b32.xlu0 %v1030_v14, %s1531_s28 }
 0x67d   : > { %463 = vadd.xlane.f32.xlu1 %v462_v35 }
 0x68a   : > { %v627_v55 = vpop.xlane.xlu0 %626 }
 0x68b   : > { %v629_v7 = vadd.f32 %v627_v55, %v621_v6 }
 0x68e   : > { %v798_v58 = vpop.xlane.xlu0 %797 }
 0x68f   : > { %v802_v62 = vadd.f32 %v798_v58, %v794_v60 }
 0x692   : > { %v972_v0 = vpop.xlane.xlu0 %971 }
 0x693   : > { %v976_v2 = vadd.f32 %v972_v0, %v968_v42 }
 0x698   : > { %466 = vadd.xlane.f32.xlu0 %v465_v47 }
 0x6af   : > { %v624_v51 = vpop.xlane.xlu1 %623 }
 0x6b0   : > { %v628_v59 = vadd.f32 %v624_v51, %v620_v23 }
 0x6b2   : > { %1486 = vrcp.f32 %v628_v59 }
 0x6b3   : > { %v801_v57 = vpop.xlane.xlu1 %800  ;;  %1488 = vrcp.f32 %v802_v62 }
 0x6b4   : > { %1490 = vrcp.f32 %v976_v2  ;;  %v803_v9 = vadd.f32 %v801_v57, %v795_v8 }
 0x6b5   : > { %1492 = vrcp.f32 %v629_v7 }
 0x6b6   : > { %1494 = vrcp.f32 %v803_v9 }
 0x6b7   : > { %v975_v24 = vpop.xlane.xlu1 %974 }
 0x6b8   : > { %v977_v12 = vadd.f32 %v975_v24, %v969_v10 }
 0x6ba   : > { %1496 = vrcp.f32 %v977_v12 }
 0x6bc   : > { %v1487_v5 = vpop.eup %1486 }
 0x6bd   : > { %v1489_v56 = vpop.eup %1488 }
 0x6be   : > { %v1491_v15 = vpop.eup %1490 }
 0x6bf   : > { %v1493_v13 = vpop.eup %1492 }
 0x6c0   : > { %v1495_v17 = vpop.eup %1494 }
 0x6c4   : > { %v1497_v45 = vpop.eup %1496 }
 0x6cb   : > { %v1037_v54 = vpop.permute.xlu1 %1036 }
 0x6cc   : > { %v1041_v63 = vmul.f32 %v1485_v53, %v1037_v54 }
 0x6ce   : > { %v1043_v4 = vadd.f32 %v1041_v63, %v1026_v43 }
 0x6d0   : > { %1048 = vrot.lane.b32.xlu1 %v1043_v4, %s1534_s4 }
 0x6d4   : > { %1085 = vrot.lane.b32.xlu1 %v1487_v5, %s1532_s29 }
 0x6d8   : > { %1112 = vrot.lane.b32.xlu1 %v1489_v56, %s1533_s30 }
 0x6dc   : > { %1139 = vrot.lane.b32.xlu1 %v1491_v15, %s1534_s4 }
 0x6eb   : > { %v1035_v1 = vpop.permute.xlu0 %1034 }
 0x6ec   : > { %v1040_v11 = vmul.f32 %v1483_v61, %v1035_v1 }
 0x6ee   : > { %v1042_v3 = vadd.f32 %v1040_v11, %v1023_v36 }
 0x6f0   : > { %1046 = vrot.lane.b32.xlu0 %v1042_v3, %s1534_s4 }
 0x6f4   : > { %1087 = vrot.lane.b32.xlu0 %v1493_v13, %s1532_s29 }
 0x6f8   : > { %1114 = vrot.lane.b32.xlu0 %v1495_v17, %s1533_s30 }
 0x6fc   : > { %1141 = vrot.lane.b32.xlu0 %v1497_v45, %s1534_s4 }
 0x70a   : > { %v464_v27 = vpop.xlane.xlu1 %463 }
 0x70b   : > { %v468_v19 = vadd.f32 %v464_v27, %v460_v40 }
 0x725   : > { %v467_v22 = vpop.xlane.xlu0 %466 }
 0x726   : > { %v469_v26 = vadd.f32 %v467_v22, %v461_v25 }
 0x728   : > { %1498 = vrcp.f32 %v469_v26 }
 0x729   : > { %1500 = vrcp.f32 %v468_v19 }
 0x732   : > { %v1499_v29 = vpop.eup %1498 }
 0x733   : > { %v1501_v37 = vpop.eup %1500 }
 0x742   : > { %v1049_v28 = vpop.permute.xlu1 %1048 }
 0x743   : > { %1054 = vst.msk [vmem:[#allocation4 + $0x8] sm:$0xff] %vm1052_vm6, %v1049_v28 }
 0x746   : > { %v1086_v32 = vpop.permute.xlu1 %1085 }
 0x74a   : > { %v1063_v30 = vld [vmem:[#allocation4 + $0x8] sm:$0xff]  ;;  %v1113_v34 = vpop.permute.xlu1 %1112 }
 0x74b   : > { %v1065_v31 = vmul.f32 %v1499_v29, %v1063_v30 }
 0x74d   : > { %v1345_v18 = vpack.c.bf16 %v1065_v31, %v1065_v31 }
 0x74e   : > { %v1140_v41 = vpop.permute.xlu1 %1139 }
 0x74f   : > { %1076 = vst.msk [vmem:[%s1764_s7 + $0x4] sm:$0xf] %vm1074_vm7, %v1345_v18 }
 0x762   : > { %v1047_v33 = vpop.permute.xlu0 %1046 }
 0x763   : > { %1053 = vst.msk [vmem:[#allocation4] sm:$0xff] %vm1052_vm6, %v1047_v33 }
 0x766   : > { %v1088_v20 = vpop.permute.xlu0 %1087 }
 0x767   : > { %v1092_v21 = vmul.f32 %v1088_v20, %v1063_v30 }
 0x769   : > { %v1347_v16 = vpack.c.bf16 %v1092_v21, %v1092_v21 }
 0x76a   : > { %v1062_v39 = vld [vmem:[#allocation4] sm:$0xff]  ;;  %v1115_v36 = vpop.permute.xlu0 %1114 }
 0x76b   : > { %v1064_v43 = vmul.f32 %v1501_v37, %v1062_v39  ;;  %v1091_v38 = vmul.f32 %v1086_v32, %v1062_v39  ;;  %1103 = vst.msk [vmem:[%s1764_s7 + $0x4] sm:$0xf] %vm1101_vm8, %v1347_v16  ;;  %v1118_v44 = vmul.f32 %v1113_v34, %v1062_v39  ;;  %v1119_v46 = vmul.f32 %v1115_v36, %v1063_v30 }
 0x76c   : > { %v1145_v14 = vmul.f32 %v1140_v41, %v1062_v39 }
 0x76d   : > { %v1344_v35 = vpack.c.bf16 %v1064_v43, %v1064_v43  ;;  %v1346_v47 = vpack.c.bf16 %v1091_v38, %v1091_v38  ;;  %v1349_v48 = vpack.c.bf16 %v1119_v46, %v1119_v46  ;;  %v1348_v50 = vpack.c.bf16 %v1118_v44, %v1118_v44 }
 0x76e   : > { %v1142_v49 = vpop.permute.xlu0 %1141  ;;  %v1350_v52 = vpack.c.bf16 %v1145_v14, %v1145_v14 }
 0x76f   : > { %1075 = vst.msk [vmem:[%s1764_s7] sm:$0xf] %vm1074_vm7, %v1344_v35  ;;  %v1146_v51 = vmul.f32 %v1142_v49, %v1063_v30 }
 0x770   : > { %1130 = vst.msk [vmem:[%s1764_s7 + $0x4] sm:$0xf] %vm1128_vm9, %v1349_v48 }
 0x771   : > { %1102 = vst.msk [vmem:[%s1764_s7] sm:$0xf] %vm1101_vm8, %v1346_v47  ;;  %v1351_v55 = vpack.c.bf16 %v1146_v51, %v1146_v51 }
 0x772   : > { %1129 = vst.msk [vmem:[%s1764_s7] sm:$0xf] %vm1128_vm9, %v1348_v50 }
 0x773   : > { %1156 = vst.msk [vmem:[%s1764_s7] sm:$0xf] %vm1155_vm10, %v1350_v52  ;;  %1157 = vst.msk [vmem:[%s1764_s7 + $0x4] sm:$0xf] %vm1155_vm10, %v1351_v55 }
 0x774 PF: > { %s13_s14 = sadd.s32 1, %s1524_s14   ;;  %s1792_s12 = smov %s1520_s13 }
 0x775   : > { %p10_p5 = scmp.ge.s32.totalorder %s13_s14, 4   ;;  %s1793_s13 = smov %s1795_s15 }
 0x777   :  { %12 = sbr.rel (!%p10_p5) target bundleno = 2 (0x2), region = 82 }

// kernel: fast3r_decoder_forward.13
= control target key start
LH: loop header
LB: loop body
LE: loop exit
PB: predicated region body
PF: predicated region fallthrough
CT: control target
= control target key end

     0   :  { %s1519_s0 = inlined_call_operand.vmem [shape: f32[2,16,32], index: 0, kind: input, shape index: {}]   ;;  %s1520_s1 = inlined_call_operand.vmem [shape: bf16[2,16,32], index: 1, kind: input, shape index: {}]   ;;  %s1521_s2 = inlined_call_operand.vmem [shape: bf16[32,32], index: 2, kind: input, shape index: {}]   ;;  %s1522_s3 = inlined_call_operand.vmem [shape: f32[1,32], index: 3, kind: input, shape index: {}]   ;;  %s1523_s4 = inlined_call_operand.vmem [shape: f32[1,32], index: 4, kind: input, shape index: {}]   ;;  %s1524_s5 = inlined_call_operand.vmem [shape: f32[1,32], index: 5, kind: input, shape index: {}]   ;;  %s1525_s6 = inlined_call_operand.vmem [shape: bf16[32,128], index: 6, kind: input, shape index: {}]   ;;  %s1526_s7 = inlined_call_operand.vmem [shape: f32[1,128], index: 7, kind: input, shape index: {}]   ;;  %s1527_s8 = inlined_call_operand.vmem [shape: bf16[128,32], index: 8, kind: input, shape index: {}]   ;;  %s1528_s9 = inlined_call_operand.vmem [shape: f32[1,32], index: 9, kind: input, shape index: {}]   ;;  %s1529_s10 = inlined_call_operand.vmem [shape: f32[1,32], index: 10, kind: input, shape index: {}]   ;;  %s1530_s11 = inlined_call_operand.vmem [shape: f32[1,32], index: 11, kind: input, shape index: {}]   ;;  %s1531_s12 = inlined_call_operand.hbm [shape: f32[2,16,32], index: 12, kind: output, shape index: {}]  }
   0x1   :  { %1534 = sst [smem:[#allocation7_spill]] %s1521_s2 }
   0x2   :  { %17 = vsyncpa [#allocation3], 0 }
   0x3   :  { %19 = vsyncpa [#allocation3 + $0x1], 0  ;;  %s1303_s21 = smov 0   ;;  %s1305_s22 = smov 0  }
   0x4   :  { %s1307_s23 = smov 0   ;;  %s1309_s24 = smov 0  }
   0x5   :  { %s1311_s25 = smov 0   ;;  %s1313_s26 = smov 0  }
   0x6 LB: > { %1535 = sst [smem:[#allocation5_spill]] %s1227_s25  ;;  %s978_s27 = sadd.s32 4294967295, %s1231_s26   ;;  %s1231_s26 = sphi %s1313_s26, %s25_s26   ;;  %s1227_s25 = sphi %s1311_s25, %s1541_s25   ;;  %s1223_s24 = sphi %s1309_s24, %s1540_s24   ;;  %s1219_s23 = sphi %s1307_s23, %s1544_s23   ;;  %s1215_s22 = sphi %s1305_s22, %s1543_s22   ;;  %s1211_s21 = sphi %s1303_s21, %s1542_s21  }
   0x7   : > { %s979_s28 = sadd.s32 4294967294, %s1231_s26   ;;  %s37_s29 = sadd.s32 1, %s1227_s25 }
   0x8   : > { %s312_s30 = sadd.s32 1, %s1219_s23  ;;  %p39_p0 = scmp.ge.s32.totalorder %s37_s29, 2 }
   0x9   : > { %p322_p1 = scmp.ne.s32.totalorder %s1219_s23, %s1215_s22  ;;  %p323_p2 = scmp.eq.s32.totalorder %s978_s27, 1 }
   0xa   : > { %p328_p3 = scmp.ne.s32.totalorder %s1215_s22, %s1211_s21  ;;  %s1546_s29 = smov (%p39_p0, %s37_s29), 0 }
   0xb   : > { %1536 = sst [smem:[#allocation6_spill]] %s1546_s29  ;;  %p1343_p4 = por %p323_p2, %p322_p1 }
   0xc   : > { %p329_p5 = scmp.eq.s32.totalorder %s979_s28, 1  ;;  %s307_s14 = ssub.s32 %s1227_s25, %s1546_s29 }
   0xd   : > { %p982_p6 = scmp.ge.s32.totalorder %s1231_s26, 1  ;;  %p310_p7 = scmp.eq.s32.totalorder %s307_s14, 0 }
   0xe   : > { %p1350_p8 = por %p329_p5, %p328_p3  ;;  %p403_p9 = scmp.lt.s32.totalorder %s1231_s26, 3 }
   0xf   : > { %s1356_s16 = scalar_select %p310_p7, %s1219_s23, %s312_s30  }
  0x10   : > { %p404_p10 = pnand %p982_p6, %p403_p9 }
  0x11   : > { %s1539_s2 = sld [smem:[#allocation7_spill]] (!%p404_p10)  ;;  %v1233_v1 = vmov (!%p404_p10), 0.0   ;;  %vm1234_vm0 = vmmov (!%p404_p10), 0   ;;  %p459_p11 = scmp.lt.s32.totalorder (!%p404_p10), %s1223_s24, 1  ;;  %vm505_vm1 = vcmask (!%p404_p10), 261120   ;;  %v1131_v21 = vld [vmem:[%s1525_s6] sm:$0xff] (!%p404_p10)  }
  0x12   : > { %407 = sbr.rel (%p404_p10) target bundleno = 1073 (0x431), region = 68  ;;  %1033 = vmatprep.subr.bf16.mxu1 (!%p404_p10), %v1233_v1  ;;  %1049 = vmatprep.subr.bf16.mxu0 (!%p404_p10), %v1233_v1  ;;  %v992_v6 = vld [vmem:[%s1522_s3] ss:$0 sm:$0xff] (!%p404_p10)  ;;  %v1132_v22 = vld [vmem:[%s1525_s6 + $0x8] sm:$0xff] (!%p404_p10)   ;;  %v1135_v54 = vld [vmem:[%s1527_s8 + $0x10] sm:$0xff] (!%p404_p10)   ;;  %s455_s14 = sand.u32 (!%p404_p10), 1, %s1215_s22  }
  0x13   : > { %1037 = vmatprep.mubr.msk.bf16.mxu1 (!%p404_p10), %vm1234_vm0, %v1233_v1  ;;  %1065 = vmatprep.mubr.msk.bf16.mxu0 (!%p404_p10), %vm1234_vm0, %v1233_v1  ;;  %v993_v42 = vld [vmem:[%s1523_s4] ss:$0 sm:$0xff] (!%p404_p10)  ;;  %v1134_v53 = vld [vmem:[%s1527_s8 + $0x8] sm:$0xff] (!%p404_p10)   ;;  %v1136_v55 = vld [vmem:[%s1527_s8 + $0x18] sm:$0xff] (!%p404_p10)   ;;  %s1017_s25 = sshll.u32 (!%p404_p10), %s1223_s24, 8  ;;  %s1235_s19 = smov (!%p404_p10), [#allocation2]  }
  0x14   : > { %v994_v47 = vld [vmem:[%s1524_s5] ss:$0 sm:$0xff] (!%p404_p10)  ;;  %v1138_v57 = vld [vmem:[%s1527_s8 + $0x28] sm:$0xff] (!%p404_p10)   ;;  %v1139_v58 = vld [vmem:[%s1527_s8 + $0x30] sm:$0xff] (!%p404_p10)   ;;  %s1157_s20 = sshll.u32 (!%p404_p10), %s1235_s19, 4  ;;  %s1158_s20 = int_to_ptr.vmem [resolvable:$false] %s1157_s20 }
  0x15   : > { %v1133_v52 = vld [vmem:[%s1527_s8] sm:$0xff] (!%p404_p10)   ;;  %v1140_v59 = vld [vmem:[%s1527_s8 + $0x38] sm:$0xff] (!%p404_p10)  }
  0x16   : > { %1050 = vmatpush3.bf16.msra.mxu0 (!%p404_p10), %v1133_v52  ;;  %v1137_v56 = vld [vmem:[%s1527_s8 + $0x20] sm:$0xff] (!%p404_p10)  }
  0x17   : > { %v1128_v0 = vld [vmem:[%s1539_s2] sm:$0xff] (!%p404_p10)   ;;  %v1129_v2 = vld [vmem:[%s1539_s2 + $0x8] sm:$0xff] (!%p404_p10)   ;;  %1051 = vmatprep.subr.bf16.mxu0 (!%p404_p10), %v1233_v1 }
  0x18   : > { %1034 = vmatpush3.bf16.msra.mxu1 (!%p404_p10), %v1128_v0  ;;  %v995_v60 = vld [vmem:[%s1526_s7] ss:$0 sm:$0xff] (!%p404_p10) }
  0x19   : > { %1035 = vmatprep.subr.bf16.mxu1 %v1233_v1  ;;  %s460_s27 = scalar_select %p459_p11, %s1223_s24, 1 }
  0x1a   : > { %1052 = vmatpush3.bf16.msra.mxu0 %v1134_v53  ;;  %s1473_s24 = scalar_lea.sflag [#allocation3], %s455_s14 }
  0x1b   : > { %s1016_s28 = sshll.u32 %s460_s27, 3  ;;  %s1015_s18 = sshll.u32 %s460_s27, 4  ;;  %1053 = vmatprep.subr.bf16.mxu0 %v1233_v1 }
  0x1c   : > { %1036 = vmatpush3.bf16.msra.mxu1 %v1129_v2  ;;  %s476_s17 = scalar_lea.vmem %s1520_s1, %s1016_s28  ;;  %s466_s2 = scalar_lea.vmem %s1519_s0, %s1015_s18 }
  0x1d   : > { %1041 = vmatprep.subr.bf16.mxu1 %v1233_v1  ;;  %v1130_v3 = vld [vmem:[%s476_s17] sm:$0xff]   ;;  %v481_v7 = vld [vmem:[%s466_s2 + $0x8] sm:$0xff]  ;;  %s983_s17 = sshll.u32 %s455_s14, 4  ;;  %s1467_s18 = scalar_lea.hbm %s1531_s12, %s1017_s25 }
  0x1e   : > { %v480_v4 = vld [vmem:[%s466_s2] sm:$0xff]  ;;  %1054 = vmatpush3.bf16.msra.mxu0 %v1135_v54  ;;  %s457_s29 = scalar_lea.vmem [#allocation2], %s983_s17  ;;  %s1159_s2 = scalar_lea.vmem %s1158_s20, 512 }
  0x1f   : > { %1038 = vmatmul.mubr.msk.bf16.vlgmr.msra.gmra.mrb[0].mxu1 %vm505_vm1, %v1130_v3  ;;  %1055 = vmatprep.subr.bf16.mxu0 %v1233_v1  ;;  %s881_s27 = sshll.u32 %s457_s29, 4  ;;  %s1469_s27 = int_to_ptr.vmem [resolvable:$true] %s881_s27 }
  0x20   : > { %1045 = vmatprep.mubr.msk.bf16.mxu1 %vm1234_vm0, %v1233_v1  ;;  %1042 = vmatpush3.bf16.msra.mxu1 %v1131_v21  ;;  %s1153_s17 = scalar_lea.vmem %s1469_s27, 256  ;;  %p1160_p1 = scmp.lt.s32.totalorder %s1469_s27, %s1158_s20 }
  0x21   : > { %1043 = vmatprep.subr.bf16.mxu1 %v1233_v1  ;;  %p1154_p12 = scmp.ne.s32.totalorder %s1469_s27, %s1153_s17  ;;  %p1161_p2 = scmp.lt.s32.totalorder %s1159_s2, %s1153_s17 }
  0x22   : > { %1056 = vmatpush3.bf16.msra.mxu0 %v1136_v55  ;;  %v1008_v55 = vld [vmem:[%s1529_s10] ss:$0 sm:$0xff] }
  0x23   : > { %1057 = vmatprep.subr.bf16.mxu0 %v1233_v1  ;;  %p1155_p13 = pnand %p1154_p12, %p1343_p4  ;;  %p1162_p3 = por %p1161_p2, %p1160_p1 }
  0x24   : > { %1044 = vmatpush3.bf16.msra.mxu1 %v1132_v22 }
  0x25   : > { %p1156_p0 = pneg %p1155_p13 }
  0x26   : > { %1058 = vmatpush3.bf16.msra.mxu0 %v1137_v56 }
  0x27   : > { %1059 = vmatprep.subr.bf16.mxu0 %v1233_v1  ;;  %p1163_p5 = pnand %p1162_p3, %p1156_p0 }
  0x2a   : > { %1060 = vmatpush3.bf16.msra.mxu0 %v1138_v57 }
  0x2b   : > { %1061 = vmatprep.subr.bf16.mxu0 %v1233_v1 }
  0x2e   : > { %1062 = vmatpush3.bf16.msra.mxu0 %v1139_v58 }
  0x2f   : > { %1063 = vmatprep.subr.bf16.mxu0 %v1233_v1 }
  0x32   : > { %1064 = vmatpush3.bf16.msra.mxu0 %v1140_v59  ;;  %v1009_v59 = vld [vmem:[%s1530_s11] ss:$0 sm:$0xff] }
  0xf2   : > { %v543_v5 = vpop.f32.mrb[0].mxu1 }
  0xf3   : > { %v550_v8 = vadd.f32 %v543_v5, %v480_v4  ;;  %v1039_v9 = vpop.f32.mrb[1].mxu1 }
  0xf4   : > { %v546_v10 = vpop.f32.mrb[2].mxu1 }
  0xf5   : > { %v1383_v11 = vadd.f32 %v992_v6, %v550_v8  ;;  %v551_v12 = vadd.f32 %v546_v10, %v481_v7  ;;  %v1040_v13 = vpop.f32.mrb[3].mxu1 }
  0xf7   : > { %v1385_v14 = vadd.f32 %v992_v6, %v551_v12  ;;  %v563_v15 = vsel %vm505_vm1, %v1383_v11, 0.0  ;;  %v572_v16 = vmul.f32 %v1383_v11, %v1383_v11 }
  0xf8   : > { %564 = vadd.xlane.f32.xlu0 %v563_v15 }
  0xf9   : > { %v574_v17 = vsel %vm505_vm1, %v572_v16, 0.0  ;;  %v573_v18 = vmul.f32 %v1385_v14, %v1385_v14  ;;  %v566_v19 = vsel %vm505_vm1, %v1385_v14, 0.0 }
  0xfa   : > { %575 = vadd.xlane.f32.xlu1 %v574_v17 }
  0xfb   : > { %v577_v20 = vsel %vm505_vm1, %v573_v18, 0.0 }
  0xfc   : > { %567 = vadd.xlane.f32.xlu0 %v566_v19 }
  0xfe   : > { %578 = vadd.xlane.f32.xlu1 %v577_v20 }
 0x185   : > { %v565_v23 = vpop.xlane.xlu0 %564 }
 0x186   : > { %v570_v24 = vmul.f32 0.03125, %v565_v23 }
 0x187   : > { %v576_v25 = vpop.xlane.xlu1 %575 }
 0x188   : > { %v582_v26 = vmul.f32 %v570_v24, %v570_v24  ;;  %v580_v27 = vmul.f32 0.03125, %v576_v25  ;;  %v588_v39 = vsub.f32 %v1383_v11, %v570_v24  ;;  %v999_v24 = vld [vmem:[%s1528_s9] ss:$0 sm:$0xff] }
 0x189   : > { %v568_v28 = vpop.xlane.xlu0 %567 }
 0x18a   : > { %v584_v29 = vsub.f32 %v580_v27, %v582_v26  ;;  %v571_v30 = vmul.f32 0.03125, %v568_v28 }
 0x18b   : > { %v579_v31 = vpop.xlane.xlu1 %578 }
 0x18c   : > { %v586_v32 = vmax.f32 %v584_v29, 0.0  ;;  %v583_v33 = vmul.f32 %v571_v30, %v571_v30  ;;  %v581_v34 = vmul.f32 0.03125, %v579_v31  ;;  %v589_v43 = vsub.f32 %v1385_v14, %v571_v30 }
 0x18e   : > { %v590_v35 = vadd.f32 1e-05, %v586_v32  ;;  %v585_v36 = vsub.f32 %v581_v34, %v583_v33 }
 0x190   : > { %1141 = vrsqrt.f32 %v590_v35  ;;  %v587_v37 = vmax.f32 %v585_v36, 0.0 }
 0x192   : > { %v591_v38 = vadd.f32 1e-05, %v587_v37 }
 0x194   : > { %1143 = vrsqrt.f32 %v591_v38 }
 0x19a   : > { %v1142_v40 = vpop.eup %1141 }
 0x19b   : > { %v594_v41 = vmul.f32 %v1142_v40, %v588_v39 }
 0x19d   : > { %v602_v46 = vmul.f32 %v993_v42, %v594_v41 }
 0x19e   : > { %v1144_v44 = vpop.eup %1143 }
 0x19f   : > { %v595_v45 = vmul.f32 %v1144_v44, %v589_v43  ;;  %v610_v49 = vadd.f32 %v994_v47, %v602_v46 }
 0x1a1   : > { %v603_v48 = vmul.f32 %v993_v42, %v595_v45 }
 0x1a3   : > { %v611_v50 = vadd.f32 %v994_v47, %v603_v48 }
 0x1a5   : > { %v612_v51 = vpack.c.bf16 %v611_v50, %v610_v49 }
 0x1a7   : > { %1046 = vmatmul.mubr.msk.bf16.vlgmr.msra.gmra.mrb[4].mxu1 %vm505_vm1, %v612_v51 }
 0x27a   : > { %v673_v61 = vpop.f32.mrb[4].mxu1 }
 0x27b   : > { %v674_v62 = vadd.f32 %v995_v60, %v673_v61  ;;  %v1047_v63 = vpop.f32.mrb[5].mxu1 }
 0x27c   : > { %v676_v0 = vpop.f32.mrb[6].mxu1 }
 0x27d   : > { %v680_v2 = vmul.f32 %v674_v62, %v674_v62  ;;  %v677_v3 = vadd.f32 %v995_v60, %v676_v0  ;;  %v1048_v4 = vpop.f32.mrb[7].mxu1 }
 0x27f   : > { %v682_v5 = vmul.f32 %v680_v2, %v674_v62  ;;  %v681_v6 = vmul.f32 %v677_v3, %v677_v3 }
 0x281   : > { %v684_v7 = vmul.f32 0.044715, %v682_v5  ;;  %v683_v8 = vmul.f32 %v681_v6, %v677_v3 }
 0x283   : > { %v686_v9 = vadd.f32 %v684_v7, %v674_v62  ;;  %v685_v10 = vmul.f32 0.044715, %v683_v8 }
 0x285   : > { %v688_v12 = vmul.f32 0.7978846, %v686_v9  ;;  %v687_v1 = vadd.f32 %v685_v10, %v677_v3 }
 0x287   : > { %1145 = vtanh.f32 %v688_v12  ;;  %v689_v13 = vmul.f32 0.7978846, %v687_v1 }
 0x289   : > { %1147 = vtanh.f32 %v689_v13 }
 0x291   : > { %v1146_v15 = vpop.eup %1145 }
 0x292   : > { %v692_v16 = vadd.f32 1.0, %v1146_v15 }
 0x293   : > { %v1148_v17 = vpop.eup %1147 }
 0x294   : > { %v693_v18 = vadd.f32 1.0, %v1148_v17  ;;  %v694_v19 = vmul.f32 0.5, %v692_v16 }
 0x296   : > { %v695_v20 = vmul.f32 0.5, %v693_v18  ;;  %v696_v21 = vmul.f32 %v694_v19, %v674_v62 }
 0x298   : > { %v697_v22 = vmul.f32 %v695_v20, %v677_v3 }
 0x29a   : > { %v698_v23 = vpack.c.bf16 %v697_v22, %v696_v21 }
 0x29c   : > { %1066 = vmatmul.mubr.bf16.vlgmr.msra.gmra.mrb[0].mxu0 %v698_v23 }
 0x36f   : > { %v804_v25 = vpop.f32.mrb[0].mxu0 }
 0x370   : > { %v805_v26 = vadd.f32 %v999_v24, %v804_v25  ;;  %v1067_v27 = vpop.f32.mrb[1].mxu0 }
 0x371   : > { %v807_v28 = vpop.f32.mrb[2].mxu0 }
 0x372   : > { %v811_v29 = vadd.f32 %v805_v26, %v1383_v11  ;;  %v808_v30 = vadd.f32 %v999_v24, %v807_v28  ;;  %v1068_v31 = vpop.f32.mrb[3].mxu0 }
 0x374   : > { %v812_v32 = vadd.f32 %v808_v30, %v1385_v14  ;;  %v815_v33 = vsel %vm505_vm1, %v811_v29, 0.0  ;;  %v823_v34 = vmul.f32 %v811_v29, %v811_v29 }
 0x375   : > { %816 = vadd.xlane.f32.xlu0 %v815_v33 }
 0x376   : > { %v818_v35 = vsel %vm505_vm1, %v812_v32, 0.0  ;;  %v824_v36 = vmul.f32 %v812_v32, %v812_v32  ;;  %v825_v37 = vsel %vm505_vm1, %v823_v34, 0.0 }
 0x377   : > { %819 = vadd.xlane.f32.xlu1 %v818_v35 }
 0x378   : > { %v828_v38 = vsel %vm505_vm1, %v824_v36, 0.0 }
 0x379   : > { %826 = vadd.xlane.f32.xlu0 %v825_v37 }
 0x37b   : > { %829 = vadd.xlane.f32.xlu1 %v828_v38 }
 0x402   : > { %v817_v39 = vpop.xlane.xlu0 %816 }
 0x403   : > { %v821_v11 = vmul.f32 0.03125, %v817_v39 }
 0x404   : > { %v820_v40 = vpop.xlane.xlu1 %819 }
 0x405   : > { %v822_v41 = vmul.f32 0.03125, %v820_v40  ;;  %v833_v42 = vmul.f32 %v821_v11, %v821_v11  ;;  %v839_v53 = vsub.f32 %v811_v29, %v821_v11 }
 0x406   : > { %v827_v14 = vpop.xlane.xlu0 %826 }
 0x407   : > { %v831_v43 = vmul.f32 0.03125, %v827_v14  ;;  %v834_v45 = vmul.f32 %v822_v41, %v822_v41  ;;  %v840_v56 = vsub.f32 %v812_v32, %v822_v41 }
 0x408   : > { %v830_v44 = vpop.xlane.xlu1 %829 }
 0x409   : > { %v835_v46 = vsub.f32 %v831_v43, %v833_v42  ;;  %v832_v47 = vmul.f32 0.03125, %v830_v44 }
 0x40b   : > { %v837_v48 = vmax.f32 %v835_v46, 0.0  ;;  %v836_v49 = vsub.f32 %v832_v47, %v834_v45 }
 0x40d   : > { %v841_v50 = vadd.f32 1e-06, %v837_v48  ;;  %v838_v51 = vmax.f32 %v836_v49, 0.0 }
 0x40f   : > { %1149 = vrsqrt.f32 %v841_v50  ;;  %v842_v52 = vadd.f32 1e-06, %v838_v51 }
 0x411   : > { %1151 = vrsqrt.f32 %v842_v52 }
 0x419   : > { %v1150_v54 = vpop.eup %1149 }
 0x41a   : > { %v845_v57 = vmul.f32 %v1150_v54, %v839_v53 }
 0x41b   : > { %v1152_v58 = vpop.eup %1151 }
 0x41c   : > { %v853_v60 = vmul.f32 %v1008_v55, %v845_v57  ;;  %v846_v61 = vmul.f32 %v1152_v58, %v840_v56 }
 0x41e   : > { %v854_v62 = vmul.f32 %v1008_v55, %v846_v61  ;;  %v861_v63 = vadd.f32 %v1009_v59, %v853_v60 }
 0x420   : > { %v862_v0 = vadd.f32 %v1009_v59, %v854_v62  ;;  %863 = vst.msk [vmem:[%s457_s29] sm:$0xff] %vm505_vm1, %v861_v63 }
 0x422   : > { %864 = vst.msk [vmem:[%s457_s29 + $0x8] sm:$0xff] %vm505_vm1, %v862_v0 }
 0x423   : > { %1166 = shalt.err (!%p1163_p5)
}
 0x424   : > { %s1167_s14 = scalar_lea.hbm %s1467_s18, 256  ;;  %s1171_s28 = scalar_lea.hbm %s1531_s12, 512 }
 0x425   : > { %p1168_p6 = scmp.ne.s32.totalorder %s1467_s18, %s1167_s14  ;;  %p1172_p10 = scmp.lt.u32.totalorder %s1467_s18, %s1531_s12 }
 0x426   : > { %p1173_p11 = scmp.lt.u32.totalorder %s1171_s28, %s1167_s14  ;;  %p1175_p13 = scmp.lt.u32.totalorder %s1167_s14, %s1467_s18 }
 0x427   : > { %p1169_p7 = pnand %p1168_p6, %p1343_p4 }
 0x428   : > { %p1174_p12 = por %p1173_p11, %p1172_p10 }
 0x429   : > { %p1170_p9 = pneg %p1169_p7 }
 0x42a   : > { %p1176_p0 = por %p1175_p13, %p1174_p12 }
 0x42c   : > { %p1177_p1 = pnand %p1176_p0, %p1170_p9 }
 0x42e   : > { %1180 = shalt.err (!%p1177_p1)
}
 0x42f   : > { %s1236_s17 = smov 128   ;;  %s1237_s20 = smov 8  }
 0x430   : > { %1069 = dma.vmem_to_hbm [thread:$0]  (%p1343_p4), %s1469_s27, 256, %s1467_s18, %s1473_s24, %s1236_s17, %s1236_s17, %s1237_s20  }
 0x431 PF: > { %p1075_p2 = scmp.ge.s32.totalorder %s1231_s26, 2  ;;  %s896_s2 = sand.u32 1, %s1211_s21  }
 0x432   : > { %s897_s14 = scalar_lea.sflag [#allocation3], %s896_s2 }
 0x433   : > { %p1072_p3 = pnand %p1075_p2, %p1350_p8 }
 0x435   : > { %1206 = dma.done.wait (!%p1072_p3), %s897_s14, 256  }
 0x436   : > { %1208 = vsyncadd (!%p1072_p3), %s897_s14, 4294967040  ;;  %s25_s26 = sadd.s32 1, %s1231_s26   ;;  %s1540_s24 = sld [smem:[#allocation5_spill]] }
 0x437   : > { %p22_p5 = scmp.ge.s32.totalorder %s25_s26, 4   ;;  %s1541_s25 = sld [smem:[#allocation6_spill]] }
 0x438   : > { %s1542_s21 = smov %s1215_s22  ;;  %s1543_s22 = smov %s1219_s23 }
 0x439   : > { %s1544_s23 = smov %s1356_s16  ;;  %24 = sbr.rel (!%p22_p5) target bundleno = 6 (0x6), region = 106 }
 0x440   :  { %902 = vsyncpa [#allocation3], 1 }
 0x441   :  { %904 = vsyncpa [#allocation3 + $0x1], 1 }

</bundles_post_ra>
